<compile_context>
chip_gen: v6e
topology: v6e:2x2x1
jax: 0.10.0
libtpu: 0.0.40
codegen_flags: <defaults>
</compile_context>

<pallas_src>
import functools

import jax
import jax.numpy as jnp
from jax.experimental import pallas as pl
from jax.experimental.pallas import tpu as pltpu

F32 = jnp.float32
VMEM = pltpu.MemorySpace.VMEM


def _vmem_specs(n):
    return [pl.BlockSpec(memory_space=VMEM) for _ in range(n)]


# --------------------------------------------------------------------------
# Fused kernel: edge MLPs -> APPNP -> GAT1 -> GAT2 -> pool -> Linear -> LogSoftmax
# --------------------------------------------------------------------------
def gcn_fused_kernel(x_ref, ea_ref, src_ref, dst_ref, batch_ref,
                     w1_ref, b1_ref, w2_ref, b2_ref,
                     g1w_ref, g1as_ref, g1ad_ref, g1ve_ref, g1b_ref,
                     g2w_ref, g2as_ref, g2ad_ref, g2ve_ref, g2b_ref,
                     linw_ref, linb_ref,
                     out_ref,
                     *, K, alpha, heads, c1, c2, ged, ew_hidden,
                     neg_slope, use_bf16):
    N = x_ref.shape[0]
    E = ea_ref.shape[0]
    B = out_ref.shape[0]

    def mxu(a, b):
        # bf16 MXU operands, f32 accumulation (review item for v6e/v7x).
        if use_bf16:
            a = a.astype(jnp.bfloat16)
            b = b.astype(jnp.bfloat16)
        return jnp.dot(a, b, preferred_element_type=F32)

    # ---------------- packed edge MLPs ----------------
    ea = ea_ref[...]                                                        # [E, Dea]
    h = jnp.dot(ea, w1_ref[...], preferred_element_type=F32) + b1_ref[...]  # [E, 20]
    lane = jax.lax.broadcasted_iota(jnp.int32, h.shape, 1)
    # lanes [0, ew_hidden) belong to the sigmoid MLP, the rest to the relu MLPs
    h_act = jnp.where(lane < ew_hidden, jax.nn.sigmoid(h), jnp.maximum(h, 0.0))
    packed = jnp.dot(h_act, w2_ref[...], preferred_element_type=F32) + b2_ref[...]  # [E, 1+2*ged]
    ew = jax.nn.sigmoid(packed[:, 0:1])            # extra sigmoid from GCN.forward, [E, 1]
    ea1 = packed[:, 1:1 + ged]                     # modified_edge_attr_1, [E, ged]
    ea2 = packed[:, 1 + ged:1 + 2 * ged]           # modified_edge_attr_2, [E, ged]

    # ------------- densify the graph in-VMEM (one-hot via iota, no scatter) -------------
    src = src_ref[...]                                                      # [E, 1] int32
    dst = dst_ref[...]                                                      # [1, E] int32
    iota_en = jax.lax.broadcasted_iota(jnp.int32, (E, N), 1)
    iota_ne = jax.lax.broadcasted_iota(jnp.int32, (N, E), 0)
    S = (iota_en == src).astype(F32)               # S[e, n]  = 1 if src[e] == n
    Dt = (iota_ne == dst).astype(F32)              # Dt[n, e] = 1 if dst[e] == n
    eye = (jax.lax.broadcasted_iota(jnp.int32, (N, N), 0)
           == jax.lax.broadcasted_iota(jnp.int32, (N, N), 1)).astype(F32)

    adj_cnt = jnp.dot(Dt, S, preferred_element_type=F32)   # [N, N] edge multiplicity (no self loops)
    cnt = jnp.sum(adj_cnt, axis=1, keepdims=True)          # in-degree per dst node, [N, 1]
    inv_cnt = 1.0 / jnp.maximum(cnt, 1.0)
    adj_mask = (adj_cnt + eye) > 0.0                       # adjacency incl. self loops

    # ---------------- APPNP: gcn_norm + K power iterations + ReLU ----------------
    Aw = jnp.dot(Dt, ew * S, preferred_element_type=F32)   # A[dst, src] = sum of edge weights
    deg = jnp.sum(Aw, axis=1, keepdims=True) + 1.0         # + self-loop weight 1.0
    dinv = jax.lax.rsqrt(deg)                              # deg >= 1 thanks to self loops
    a_norm = (Aw + eye) * (dinv * jnp.transpose(dinv))     # D^-1/2 (A + I_w) D^-1/2

    x0 = x_ref[...]
    xcur = x0
    for _ in range(K):
        xcur = (1.0 - alpha) * mxu(a_norm, xcur) + alpha * x0
    xcur = jnp.maximum(xcur, 0.0)                          # F.relu

    # ---------------- dense GAT layer (heads, concat=False -> mean) + ReLU ----------------
    def gat_layer(x_in, ea_l, w_ref, asrc_ref, adst_ref, vedge_ref, b_ref, C):
        xs = mxu(x_in, w_ref[...])                                           # [N, heads*C]
        # all-heads attention scores via block matmuls (no per-head reductions)
        s_src = jnp.dot(xs, asrc_ref[...], preferred_element_type=F32)       # [N, heads]
        s_dst = jnp.dot(xs, adst_ref[...], preferred_element_type=F32)       # [N, heads]
        s_srcT = jnp.transpose(s_src)                                        # [heads, N] (hoisted)
        ae = jnp.dot(ea_l, vedge_ref[...], preferred_element_type=F32)       # per-edge logits, [E, heads]
        # self-loop edge attributes use fill_value='mean' over incoming edges
        al = jnp.dot(Dt, ae, preferred_element_type=F32) * inv_cnt           # [N, heads]

        acc = jnp.zeros((N, C), F32)
        for hh in range(heads):
            elog = (jnp.dot(Dt, ae[:, hh:hh + 1] * S, preferred_element_type=F32)
                    + eye * al[:, hh:hh + 1])                                # [N_dst, N_src]
            logits = s_dst[:, hh:hh + 1] + s_srcT[hh:hh + 1, :] + elog
            logits = jnp.where(logits >= 0.0, logits, neg_slope * logits)    # leaky_relu
            logits = jnp.where(adj_mask, logits, -1e30)                      # mask non-edges
            m = jnp.max(logits, axis=1, keepdims=True)
            p = jnp.exp(logits - m)
            attn = p * pl.reciprocal(jnp.sum(p, axis=1, keepdims=True), approx=True)
            acc = acc + mxu(attn, xs[:, hh * C:(hh + 1) * C])
        return jnp.maximum(acc * (1.0 / heads) + b_ref[...], 0.0)            # mean-over-heads + bias + ReLU

    x1 = gat_layer(xcur, ea1, g1w_ref, g1as_ref, g1ad_ref, g1ve_ref, g1b_ref, c1)
    x2 = gat_layer(x1, ea2, g2w_ref, g2as_ref, g2ad_ref, g2ve_ref, g2b_ref, c2)

    # ---------------- global mean pool + ReLU + Linear + LogSoftmax ----------------
    batch = batch_ref[...]                                                   # [1, N] int32
    P = (jax.lax.broadcasted_iota(jnp.int32, (B, N), 0) == batch).astype(F32)
    counts = jnp.sum(P, axis=1, keepdims=True)
    pooled = jnp.dot(P, x2, preferred_element_type=F32) / jnp.maximum(counts, 1.0)
    pooled = jnp.maximum(pooled, 0.0)                                        # F.relu (no-op, kept for fidelity)
    logits = jnp.dot(pooled, linw_ref[...], preferred_element_type=F32) + linb_ref[...]
    m = jnp.max(logits, axis=1, keepdims=True)
    z = logits - m
    lse = jnp.log(jnp.sum(jnp.exp(z), axis=1, keepdims=True))
    out_ref[...] = z - lse                                                   # log_softmax(dim=1)


# --------------------------------------------------------------------------
# Parameter packing helpers (param-only, tiny; done in the wrapper)
# --------------------------------------------------------------------------
def _block_diag(mats):
    rows = sum(m.shape[0] for m in mats)
    cols = sum(m.shape[1] for m in mats)
    out = jnp.zeros((rows, cols), F32)
    r = c = 0
    for m in mats:
        out = out.at[r:r + m.shape[0], c:c + m.shape[1]].set(m)
        r += m.shape[0]
        c += m.shape[1]
    return out


def _head_block(att):
    """[H, C] -> [H*C, H] block matrix so that (x @ W) @ blk == per-head <xs_h, att_h>."""
    H, C = att.shape
    return (att[:, :, None] * jnp.eye(H, dtype=att.dtype)[:, None, :]).reshape(H * C, H)


def _edge_vec(w_edge, att_edge):
    """[D, H*C], [H, C] -> [D, H] so that ea @ V == per-head edge attention logit."""
    D = w_edge.shape[0]
    H, C = att_edge.shape
    return jnp.einsum('dhc,hc->dh', w_edge.reshape(D, H, C), att_edge)


# --------------------------------------------------------------------------
# Parameter init (deterministic, synthetic)
# --------------------------------------------------------------------------
def _glorot(key, shape):
    s = jnp.sqrt(2.0 / (shape[0] + shape[-1]))
    return (jax.random.normal(key, shape) * s).astype(F32)


def _init_mlp(key, din, dh, dout):
    k1, k2 = jax.random.split(key)
    return dict(w1=_glorot(k1, (din, dh)), b1=jnp.zeros((1, dh), F32),
                w2=_glorot(k2, (dh, dout)), b2=jnp.zeros((1, dout), F32))


def _init_gat(key, din, dout, heads, edge_dim):
    k1, k2, k3, k4, k5 = jax.random.split(key, 5)
    return dict(w=_glorot(k1, (din, heads * dout)),
                att_src=_glorot(k2, (heads, dout)),
                att_dst=_glorot(k3, (heads, dout)),
                w_edge=_glorot(k4, (edge_dim, heads * dout)),
                att_edge=_glorot(k5, (heads, dout)),
                bias=jnp.zeros((1, dout), F32))


def init_params(key, f_in, hidden_channels, num_classes, heads,
                edge_attr_dim, gat_edge_dim):
    ks = jax.random.split(key, 6)
    return dict(
        ew=_init_mlp(ks[0], edge_attr_dim, 4, 1),
        e1=_init_mlp(ks[1], edge_attr_dim, 8, gat_edge_dim),
        e2=_init_mlp(ks[2], edge_attr_dim, 8, gat_edge_dim),
        conv1=_init_gat(ks[3], f_in, hidden_channels[0], heads, gat_edge_dim),
        conv2=_init_gat(ks[4], hidden_channels[0], hidden_channels[1], heads, gat_edge_dim),
        lin=dict(w=_glorot(ks[5], (hidden_channels[1], num_classes)),
                 b=jnp.zeros((1, num_classes), F32)),
    )


# --------------------------------------------------------------------------
# Forward
# --------------------------------------------------------------------------
def gcn_forward(params, x, edge_index, edge_attr, batch, *,
                num_graphs, K=5, alpha=0.1, heads=6, use_bf16=True):
    n = x.shape[0]
    e = edge_attr.shape[0]
    c1 = params['conv1']['att_src'].shape[1]
    c2 = params['conv2']['att_src'].shape[1]
    num_classes = params['lin']['w'].shape[1]
    ged = params['e1']['w2'].shape[1]
    ew_hidden = params['ew']['w1'].shape[1]

    # pack the three edge MLPs into one fc1 (concat) + one fc2 (block-diagonal)
    w1cat = jnp.concatenate([params['ew']['w1'], params['e1']['w1'], params['e2']['w1']], axis=1)
    b1cat = jnp.concatenate([params['ew']['b1'], params['e1']['b1'], params['e2']['b1']], axis=1)
    w2blk = _block_diag([params['ew']['w2'], params['e1']['w2'], params['e2']['w2']])
    b2cat = jnp.concatenate([params['ew']['b2'], params['e1']['b2'], params['e2']['b2']], axis=1)

    def gat_pack(p):
        return (p['w'], _head_block(p['att_src']), _head_block(p['att_dst']),
                _edge_vec(p['w_edge'], p['att_edge']), p['bias'])

    g1 = gat_pack(params['conv1'])
    g2 = gat_pack(params['conv2'])

    src_ids = edge_index[0].reshape(e, 1).astype(jnp.int32)
    dst_ids = edge_index[1].reshape(1, e).astype(jnp.int32)
    batch2d = batch.reshape(1, n).astype(jnp.int32)

    kernel = functools.partial(
        gcn_fused_kernel, K=K, alpha=alpha, heads=heads, c1=c1, c2=c2,
        ged=ged, ew_hidden=ew_hidden, neg_slope=0.2, use_bf16=use_bf16)

    return pl.pallas_call(
        kernel,
        out_shape=jax.ShapeDtypeStruct((num_graphs, num_classes), F32),
        in_specs=_vmem_specs(21),
        out_specs=pl.BlockSpec(memory_space=VMEM),
    )(x, edge_attr, src_ids, dst_ids, batch2d,
      w1cat, b1cat, w2blk, b2cat,
      *g1, *g2,
      params['lin']['w'], params['lin']['b'])


# --------------------------------------------------------------------------
# Demo
# --------------------------------------------------------------------------
if __name__ == "__main__":
    key = jax.random.PRNGKey(0)
    N, E, B = 16, 32, 2
    F_IN = 8
    HIDDEN = (16, 8)
    NUM_CLASSES = 4
    HEADS = 6
    EDGE_ATTR_DIM, GAT_EDGE_DIM = 2, 4
    K, ALPHA = 5, 0.1

    kx, ke, kei, kp = jax.random.split(key, 4)
    x = jax.random.normal(kx, (N, F_IN), dtype=F32)
    edge_attr = jax.random.normal(ke, (E, EDGE_ATTR_DIM), dtype=F32)

    # unique directed edges, no self loops
    offdiag = jnp.array([i * N + j for i in range(N) for j in range(N) if i != j],
                        dtype=jnp.int32)
    sel = jax.random.choice(kei, offdiag, (E,), replace=False)
    edge_index = jnp.stack([sel // N, sel % N]).astype(jnp.int32)   # [2, E] (src, dst)

    batch = jnp.where(jnp.arange(N) < N // 2, 0, 1).astype(jnp.int32)

    params = init_params(kp, F_IN, HIDDEN, NUM_CLASSES, HEADS,
                         EDGE_ATTR_DIM, GAT_EDGE_DIM)

    fwd = jax.jit(gcn_forward,
                  static_argnames=("num_graphs", "K", "alpha", "heads", "use_bf16"))
    out = fwd(params, x, edge_index, edge_attr, batch,
              num_graphs=B, K=K, alpha=ALPHA, heads=HEADS)
    jax.block_until_ready(out)
    assert out.shape == (B, NUM_CLASSES)
    assert bool(jnp.all(jnp.isfinite(out)))
    print("KERNEL_OK")
</pallas_src>

<mosaic_0001>
module attributes {stable_mosaic.version = 11 : i64} {
  func.func @gcn_fused_kernel(%arg0: memref<16x8xf32, #tpu.memory_space<vmem>>, %arg1: memref<32x2xf32, #tpu.memory_space<vmem>>, %arg2: memref<32x1xi32, #tpu.memory_space<vmem>>, %arg3: memref<1x32xi32, #tpu.memory_space<vmem>>, %arg4: memref<1x16xi32, #tpu.memory_space<vmem>>, %arg5: memref<2x20xf32, #tpu.memory_space<vmem>>, %arg6: memref<1x20xf32, #tpu.memory_space<vmem>>, %arg7: memref<20x9xf32, #tpu.memory_space<vmem>>, %arg8: memref<1x9xf32, #tpu.memory_space<vmem>>, %arg9: memref<8x96xf32, #tpu.memory_space<vmem>>, %arg10: memref<96x6xf32, #tpu.memory_space<vmem>>, %arg11: memref<96x6xf32, #tpu.memory_space<vmem>>, %arg12: memref<4x6xf32, #tpu.memory_space<vmem>>, %arg13: memref<1x16xf32, #tpu.memory_space<vmem>>, %arg14: memref<16x48xf32, #tpu.memory_space<vmem>>, %arg15: memref<48x6xf32, #tpu.memory_space<vmem>>, %arg16: memref<48x6xf32, #tpu.memory_space<vmem>>, %arg17: memref<4x6xf32, #tpu.memory_space<vmem>>, %arg18: memref<1x8xf32, #tpu.memory_space<vmem>>, %arg19: memref<8x4xf32, #tpu.memory_space<vmem>>, %arg20: memref<1x4xf32, #tpu.memory_space<vmem>>, %arg21: memref<2x4xf32, #tpu.memory_space<vmem>>) attributes {dimension_semantics = [], scalar_prefetch = 0 : i64, scratch_operands = 0 : i64, tpu.core_type = #tpu.core_type<tc>} {
    %c0 = arith.constant 0 : index
    %c0_0 = arith.constant 0 : index
    %0 = vector.load %arg1[%c0, %c0_0] : memref<32x2xf32, #tpu.memory_space<vmem>>, vector<32x2xf32>
    %c0_1 = arith.constant 0 : index
    %c0_2 = arith.constant 0 : index
    %1 = vector.load %arg5[%c0_1, %c0_2] : memref<2x20xf32, #tpu.memory_space<vmem>>, vector<2x20xf32>
    %cst = arith.constant dense<0.000000e+00> : vector<32x20xf32>
    %2 = tpu.matmul %0, %1, %cst {dimension_numbers = #tpu.dot_dimension_numbers<[1], [0], [0], [1], [0, 0, 1, 1], [], []>} : vector<32x2xf32>, vector<2x20xf32>, vector<32x20xf32> -> vector<32x20xf32>
    %c0_3 = arith.constant 0 : index
    %c0_4 = arith.constant 0 : index
    %3 = vector.load %arg6[%c0_3, %c0_4] : memref<1x20xf32, #tpu.memory_space<vmem>>, vector<1x20xf32>
    %4 = vector.broadcast %3 : vector<1x20xf32> to vector<32x20xf32>
    %5 = arith.addf %2, %4 : vector<32x20xf32>
    %6 = tpu.iota {dimensions = array<i32: 1>} : vector<32x20xi32>
    %c4_i32 = arith.constant 4 : i32
    %7 = vector.broadcast %c4_i32 : i32 to vector<32x20xi32>
    %8 = arith.cmpi slt, %6, %7 : vector<32x20xi32>
    %9 = arith.negf %5 : vector<32x20xf32>
    %10 = math.exp %9 : vector<32x20xf32>
    %cst_5 = arith.constant 1.000000e+00 : f32
    %11 = vector.broadcast %cst_5 : f32 to vector<32x20xf32>
    %12 = arith.addf %11, %10 : vector<32x20xf32>
    %13 = arith.divf %11, %12 : vector<32x20xf32>
    %cst_6 = arith.constant 0.000000e+00 : f32
    %14 = vector.broadcast %cst_6 : f32 to vector<32x20xf32>
    %15 = arith.maximumf %5, %14 : vector<32x20xf32>
    %16 = arith.select %8, %13, %15 : vector<32x20xi1>, vector<32x20xf32>
    %c0_7 = arith.constant 0 : index
    %c0_8 = arith.constant 0 : index
    %17 = vector.load %arg7[%c0_7, %c0_8] : memref<20x9xf32, #tpu.memory_space<vmem>>, vector<20x9xf32>
    %cst_9 = arith.constant dense<0.000000e+00> : vector<32x9xf32>
    %18 = tpu.matmul %16, %17, %cst_9 {dimension_numbers = #tpu.dot_dimension_numbers<[1], [0], [0], [1], [0, 0, 1, 1], [], []>} : vector<32x20xf32>, vector<20x9xf32>, vector<32x9xf32> -> vector<32x9xf32>
    %c0_10 = arith.constant 0 : index
    %c0_11 = arith.constant 0 : index
    %19 = vector.load %arg8[%c0_10, %c0_11] : memref<1x9xf32, #tpu.memory_space<vmem>>, vector<1x9xf32>
    %20 = vector.broadcast %19 : vector<1x9xf32> to vector<32x9xf32>
    %21 = arith.addf %18, %20 : vector<32x9xf32>
    %22 = vector.extract_strided_slice %21 {offsets = [0, 0], sizes = [32, 1], strides = [1, 1]} : vector<32x9xf32> to vector<32x1xf32>
    %23 = arith.negf %22 : vector<32x1xf32>
    %24 = math.exp %23 : vector<32x1xf32>
    %cst_12 = arith.constant 1.000000e+00 : f32
    %25 = vector.broadcast %cst_12 : f32 to vector<32x1xf32>
    %26 = arith.addf %25, %24 : vector<32x1xf32>
    %27 = arith.divf %25, %26 : vector<32x1xf32>
    %28 = vector.extract_strided_slice %21 {offsets = [0, 1], sizes = [32, 4], strides = [1, 1]} : vector<32x9xf32> to vector<32x4xf32>
    %29 = vector.extract_strided_slice %21 {offsets = [0, 5], sizes = [32, 4], strides = [1, 1]} : vector<32x9xf32> to vector<32x4xf32>
    %c0_13 = arith.constant 0 : index
    %c0_14 = arith.constant 0 : index
    %30 = vector.load %arg2[%c0_13, %c0_14] : memref<32x1xi32, #tpu.memory_space<vmem>>, vector<32x1xi32>
    %c0_15 = arith.constant 0 : index
    %c0_16 = arith.constant 0 : index
    %31 = vector.load %arg3[%c0_15, %c0_16] : memref<1x32xi32, #tpu.memory_space<vmem>>, vector<1x32xi32>
    %32 = tpu.iota {dimensions = array<i32: 1>} : vector<32x16xi32>
    %33 = tpu.iota {dimensions = array<i32: 0>} : vector<16x32xi32>
    %34 = vector.broadcast %30 : vector<32x1xi32> to vector<32x16xi32>
    %35 = arith.cmpi eq, %32, %34 : vector<32x16xi32>
    %36 = arith.extui %35 : vector<32x16xi1> to vector<32x16xi32>
    %37 = arith.sitofp %36 : vector<32x16xi32> to vector<32x16xf32>
    %38 = vector.broadcast %31 : vector<1x32xi32> to vector<16x32xi32>
    %39 = arith.cmpi eq, %33, %38 : vector<16x32xi32>
    %40 = arith.extui %39 : vector<16x32xi1> to vector<16x32xi32>
    %41 = arith.sitofp %40 : vector<16x32xi32> to vector<16x32xf32>
    %42 = tpu.iota {dimensions = array<i32: 0>} : vector<16x16xi32>
    %43 = tpu.iota {dimensions = array<i32: 1>} : vector<16x16xi32>
    %44 = arith.cmpi eq, %42, %43 : vector<16x16xi32>
    %45 = arith.extui %44 : vector<16x16xi1> to vector<16x16xi32>
    %46 = arith.sitofp %45 : vector<16x16xi32> to vector<16x16xf32>
    %cst_17 = arith.constant dense<0.000000e+00> : vector<16x16xf32>
    %47 = tpu.matmul %41, %37, %cst_17 {dimension_numbers = #tpu.dot_dimension_numbers<[1], [0], [0], [1], [0, 0, 1, 1], [], []>} : vector<16x32xf32>, vector<32x16xf32>, vector<16x16xf32> -> vector<16x16xf32>
    %cst_18 = arith.constant dense<0.000000e+00> : vector<16xf32>
    %48 = vector.multi_reduction <add>, %47, %cst_18 [1] : vector<16x16xf32> to vector<16xf32>
    %49 = vector.shape_cast %48 : vector<16xf32> to vector<16x1xf32>
    %cst_19 = arith.constant 1.000000e+00 : f32
    %50 = vector.broadcast %cst_19 : f32 to vector<16x1xf32>
    %51 = arith.maximumf %49, %50 : vector<16x1xf32>
    %cst_20 = arith.constant 1.000000e+00 : f32
    %52 = vector.broadcast %cst_20 : f32 to vector<16x1xf32>
    %53 = arith.divf %52, %51 : vector<16x1xf32>
    %54 = arith.addf %47, %46 : vector<16x16xf32>
    %cst_21 = arith.constant 0.000000e+00 : f32
    %55 = vector.broadcast %cst_21 : f32 to vector<16x16xf32>
    %56 = arith.cmpf ogt, %54, %55 : vector<16x16xf32>
    %57 = vector.broadcast %27 : vector<32x1xf32> to vector<32x16xf32>
    %58 = arith.mulf %57, %37 : vector<32x16xf32>
    %cst_22 = arith.constant dense<0.000000e+00> : vector<16x16xf32>
    %59 = tpu.matmul %41, %58, %cst_22 {dimension_numbers = #tpu.dot_dimension_numbers<[1], [0], [0], [1], [0, 0, 1, 1], [], []>} : vector<16x32xf32>, vector<32x16xf32>, vector<16x16xf32> -> vector<16x16xf32>
    %cst_23 = arith.constant dense<0.000000e+00> : vector<16xf32>
    %60 = vector.multi_reduction <add>, %59, %cst_23 [1] : vector<16x16xf32> to vector<16xf32>
    %61 = vector.shape_cast %60 : vector<16xf32> to vector<16x1xf32>
    %cst_24 = arith.constant 1.000000e+00 : f32
    %62 = vector.broadcast %cst_24 : f32 to vector<16x1xf32>
    %63 = arith.addf %61, %62 : vector<16x1xf32>
    %64 = math.rsqrt %63 : vector<16x1xf32>
    %65 = arith.addf %59, %46 : vector<16x16xf32>
    %66 = tpu.transpose %64, [1, 0] : vector<16x1xf32> -> vector<1x16xf32>
    %67 = vector.broadcast %64 : vector<16x1xf32> to vector<16x16xf32>
    %68 = vector.broadcast %66 : vector<1x16xf32> to vector<16x16xf32>
    %69 = arith.mulf %67, %68 : vector<16x16xf32>
    %70 = arith.mulf %65, %69 : vector<16x16xf32>
    %c0_25 = arith.constant 0 : index
    %c0_26 = arith.constant 0 : index
    %71 = vector.load %arg0[%c0_25, %c0_26] : memref<16x8xf32, #tpu.memory_space<vmem>>, vector<16x8xf32>
    %72 = arith.truncf %70 : vector<16x16xf32> to vector<16x16xbf16>
    %73 = arith.truncf %71 : vector<16x8xf32> to vector<16x8xbf16>
    %cst_27 = arith.constant dense<0.000000e+00> : vector<16x8xf32>
    %74 = tpu.matmul %72, %73, %cst_27 {dimension_numbers = #tpu.dot_dimension_numbers<[1], [0], [0], [1], [0, 0, 1, 1], [], []>} : vector<16x16xbf16>, vector<16x8xbf16>, vector<16x8xf32> -> vector<16x8xf32>
    %cst_28 = arith.constant 0.899999976 : f32
    %75 = vector.broadcast %cst_28 : f32 to vector<16x8xf32>
    %76 = arith.mulf %75, %74 : vector<16x8xf32>
    %cst_29 = arith.constant 1.000000e-01 : f32
    %77 = vector.broadcast %cst_29 : f32 to vector<16x8xf32>
    %78 = arith.mulf %77, %71 : vector<16x8xf32>
    %79 = arith.addf %76, %78 : vector<16x8xf32>
    %80 = arith.truncf %70 : vector<16x16xf32> to vector<16x16xbf16>
    %81 = arith.truncf %79 : vector<16x8xf32> to vector<16x8xbf16>
    %cst_30 = arith.constant dense<0.000000e+00> : vector<16x8xf32>
    %82 = tpu.matmul %80, %81, %cst_30 {dimension_numbers = #tpu.dot_dimension_numbers<[1], [0], [0], [1], [0, 0, 1, 1], [], []>} : vector<16x16xbf16>, vector<16x8xbf16>, vector<16x8xf32> -> vector<16x8xf32>
    %cst_31 = arith.constant 0.899999976 : f32
    %83 = vector.broadcast %cst_31 : f32 to vector<16x8xf32>
    %84 = arith.mulf %83, %82 : vector<16x8xf32>
    %cst_32 = arith.constant 1.000000e-01 : f32
    %85 = vector.broadcast %cst_32 : f32 to vector<16x8xf32>
    %86 = arith.mulf %85, %71 : vector<16x8xf32>
    %87 = arith.addf %84, %86 : vector<16x8xf32>
    %88 = arith.truncf %70 : vector<16x16xf32> to vector<16x16xbf16>
    %89 = arith.truncf %87 : vector<16x8xf32> to vector<16x8xbf16>
    %cst_33 = arith.constant dense<0.000000e+00> : vector<16x8xf32>
    %90 = tpu.matmul %88, %89, %cst_33 {dimension_numbers = #tpu.dot_dimension_numbers<[1], [0], [0], [1], [0, 0, 1, 1], [], []>} : vector<16x16xbf16>, vector<16x8xbf16>, vector<16x8xf32> -> vector<16x8xf32>
    %cst_34 = arith.constant 0.899999976 : f32
    %91 = vector.broadcast %cst_34 : f32 to vector<16x8xf32>
    %92 = arith.mulf %91, %90 : vector<16x8xf32>
    %cst_35 = arith.constant 1.000000e-01 : f32
    %93 = vector.broadcast %cst_35 : f32 to vector<16x8xf32>
    %94 = arith.mulf %93, %71 : vector<16x8xf32>
    %95 = arith.addf %92, %94 : vector<16x8xf32>
    %96 = arith.truncf %70 : vector<16x16xf32> to vector<16x16xbf16>
    %97 = arith.truncf %95 : vector<16x8xf32> to vector<16x8xbf16>
    %cst_36 = arith.constant dense<0.000000e+00> : vector<16x8xf32>
    %98 = tpu.matmul %96, %97, %cst_36 {dimension_numbers = #tpu.dot_dimension_numbers<[1], [0], [0], [1], [0, 0, 1, 1], [], []>} : vector<16x16xbf16>, vector<16x8xbf16>, vector<16x8xf32> -> vector<16x8xf32>
    %cst_37 = arith.constant 0.899999976 : f32
    %99 = vector.broadcast %cst_37 : f32 to vector<16x8xf32>
    %100 = arith.mulf %99, %98 : vector<16x8xf32>
    %cst_38 = arith.constant 1.000000e-01 : f32
    %101 = vector.broadcast %cst_38 : f32 to vector<16x8xf32>
    %102 = arith.mulf %101, %71 : vector<16x8xf32>
    %103 = arith.addf %100, %102 : vector<16x8xf32>
    %104 = arith.truncf %70 : vector<16x16xf32> to vector<16x16xbf16>
    %105 = arith.truncf %103 : vector<16x8xf32> to vector<16x8xbf16>
    %cst_39 = arith.constant dense<0.000000e+00> : vector<16x8xf32>
    %106 = tpu.matmul %104, %105, %cst_39 {dimension_numbers = #tpu.dot_dimension_numbers<[1], [0], [0], [1], [0, 0, 1, 1], [], []>} : vector<16x16xbf16>, vector<16x8xbf16>, vector<16x8xf32> -> vector<16x8xf32>
    %cst_40 = arith.constant 0.899999976 : f32
    %107 = vector.broadcast %cst_40 : f32 to vector<16x8xf32>
    %108 = arith.mulf %107, %106 : vector<16x8xf32>
    %cst_41 = arith.constant 1.000000e-01 : f32
    %109 = vector.broadcast %cst_41 : f32 to vector<16x8xf32>
    %110 = arith.mulf %109, %71 : vector<16x8xf32>
    %111 = arith.addf %108, %110 : vector<16x8xf32>
    %cst_42 = arith.constant 0.000000e+00 : f32
    %112 = vector.broadcast %cst_42 : f32 to vector<16x8xf32>
    %113 = arith.maximumf %111, %112 : vector<16x8xf32>
    %c0_43 = arith.constant 0 : index
    %c0_44 = arith.constant 0 : index
    %114 = vector.load %arg9[%c0_43, %c0_44] : memref<8x96xf32, #tpu.memory_space<vmem>>, vector<8x96xf32>
    %115 = arith.truncf %113 : vector<16x8xf32> to vector<16x8xbf16>
    %116 = arith.truncf %114 : vector<8x96xf32> to vector<8x96xbf16>
    %cst_45 = arith.constant dense<0.000000e+00> : vector<16x96xf32>
    %117 = tpu.matmul %115, %116, %cst_45 {dimension_numbers = #tpu.dot_dimension_numbers<[1], [0], [0], [1], [0, 0, 1, 1], [], []>} : vector<16x8xbf16>, vector<8x96xbf16>, vector<16x96xf32> -> vector<16x96xf32>
    %c0_46 = arith.constant 0 : index
    %c0_47 = arith.constant 0 : index
    %118 = vector.load %arg10[%c0_46, %c0_47] : memref<96x6xf32, #tpu.memory_space<vmem>>, vector<96x6xf32>
    %cst_48 = arith.constant dense<0.000000e+00> : vector<16x6xf32>
    %119 = tpu.matmul %117, %118, %cst_48 {dimension_numbers = #tpu.dot_dimension_numbers<[1], [0], [0], [1], [0, 0, 1, 1], [], []>} : vector<16x96xf32>, vector<96x6xf32>, vector<16x6xf32> -> vector<16x6xf32>
    %c0_49 = arith.constant 0 : index
    %c0_50 = arith.constant 0 : index
    %120 = vector.load %arg11[%c0_49, %c0_50] : memref<96x6xf32, #tpu.memory_space<vmem>>, vector<96x6xf32>
    %cst_51 = arith.constant dense<0.000000e+00> : vector<16x6xf32>
    %121 = tpu.matmul %117, %120, %cst_51 {dimension_numbers = #tpu.dot_dimension_numbers<[1], [0], [0], [1], [0, 0, 1, 1], [], []>} : vector<16x96xf32>, vector<96x6xf32>, vector<16x6xf32> -> vector<16x6xf32>
    %122 = tpu.transpose %119, [1, 0] : vector<16x6xf32> -> vector<6x16xf32>
    %c0_52 = arith.constant 0 : index
    %c0_53 = arith.constant 0 : index
    %123 = vector.load %arg12[%c0_52, %c0_53] : memref<4x6xf32, #tpu.memory_space<vmem>>, vector<4x6xf32>
    %cst_54 = arith.constant dense<0.000000e+00> : vector<32x6xf32>
    %124 = tpu.matmul %28, %123, %cst_54 {dimension_numbers = #tpu.dot_dimension_numbers<[1], [0], [0], [1], [0, 0, 1, 1], [], []>} : vector<32x4xf32>, vector<4x6xf32>, vector<32x6xf32> -> vector<32x6xf32>
    %cst_55 = arith.constant dense<0.000000e+00> : vector<16x6xf32>
    %125 = tpu.matmul %41, %124, %cst_55 {dimension_numbers = #tpu.dot_dimension_numbers<[1], [0], [0], [1], [0, 0, 1, 1], [], []>} : vector<16x32xf32>, vector<32x6xf32>, vector<16x6xf32> -> vector<16x6xf32>
    %126 = vector.broadcast %53 : vector<16x1xf32> to vector<16x6xf32>
    %127 = arith.mulf %125, %126 : vector<16x6xf32>
    %cst_56 = arith.constant 0.000000e+00 : f32
    %128 = vector.broadcast %cst_56 : f32 to vector<16x16xf32>
    %129 = vector.extract_strided_slice %124 {offsets = [0, 0], sizes = [32, 1], strides = [1, 1]} : vector<32x6xf32> to vector<32x1xf32>
    %130 = vector.broadcast %129 : vector<32x1xf32> to vector<32x16xf32>
    %131 = arith.mulf %130, %37 : vector<32x16xf32>
    %cst_57 = arith.constant dense<0.000000e+00> : vector<16x16xf32>
    %132 = tpu.matmul %41, %131, %cst_57 {dimension_numbers = #tpu.dot_dimension_numbers<[1], [0], [0], [1], [0, 0, 1, 1], [], []>} : vector<16x32xf32>, vector<32x16xf32>, vector<16x16xf32> -> vector<16x16xf32>
    %133 = vector.extract_strided_slice %127 {offsets = [0, 0], sizes = [16, 1], strides = [1, 1]} : vector<16x6xf32> to vector<16x1xf32>
    %134 = vector.broadcast %133 : vector<16x1xf32> to vector<16x16xf32>
    %135 = arith.mulf %46, %134 : vector<16x16xf32>
    %136 = arith.addf %132, %135 : vector<16x16xf32>
    %137 = vector.extract_strided_slice %121 {offsets = [0, 0], sizes = [16, 1], strides = [1, 1]} : vector<16x6xf32> to vector<16x1xf32>
    %138 = vector.extract_strided_slice %122 {offsets = [0, 0], sizes = [1, 16], strides = [1, 1]} : vector<6x16xf32> to vector<1x16xf32>
    %139 = vector.broadcast %137 : vector<16x1xf32> to vector<16x16xf32>
    %140 = vector.broadcast %138 : vector<1x16xf32> to vector<16x16xf32>
    %141 = arith.addf %139, %140 : vector<16x16xf32>
    %142 = arith.addf %141, %136 : vector<16x16xf32>
    %cst_58 = arith.constant 0.000000e+00 : f32
    %143 = vector.broadcast %cst_58 : f32 to vector<16x16xf32>
    %144 = arith.cmpf oge, %142, %143 : vector<16x16xf32>
    %cst_59 = arith.constant 2.000000e-01 : f32
    %145 = vector.broadcast %cst_59 : f32 to vector<16x16xf32>
    %146 = arith.mulf %145, %142 : vector<16x16xf32>
    %147 = arith.select %144, %142, %146 : vector<16x16xi1>, vector<16x16xf32>
    %cst_60 = arith.constant -1.000000e+30 : f32
    %148 = vector.broadcast %cst_60 : f32 to vector<16x16xf32>
    %149 = arith.select %56, %147, %148 : vector<16x16xi1>, vector<16x16xf32>
    %cst_61 = arith.constant dense<0xFF800000> : vector<16xf32>
    %150 = vector.multi_reduction <maximumf>, %149, %cst_61 [1] : vector<16x16xf32> to vector<16xf32>
    %151 = vector.shape_cast %150 : vector<16xf32> to vector<16x1xf32>
    %152 = vector.broadcast %151 : vector<16x1xf32> to vector<16x16xf32>
    %153 = arith.subf %149, %152 : vector<16x16xf32>
    %154 = math.exp %153 : vector<16x16xf32>
    %cst_62 = arith.constant dense<0.000000e+00> : vector<16xf32>
    %155 = vector.multi_reduction <add>, %154, %cst_62 [1] : vector<16x16xf32> to vector<16xf32>
    %156 = vector.shape_cast %155 : vector<16xf32> to vector<16x1xf32>
    %157 = tpu.reciprocal %156 {approx = true} : vector<16x1xf32> -> vector<16x1xf32>
    %158 = vector.broadcast %157 : vector<16x1xf32> to vector<16x16xf32>
    %159 = arith.mulf %154, %158 : vector<16x16xf32>
    %160 = vector.extract_strided_slice %117 {offsets = [0, 0], sizes = [16, 16], strides = [1, 1]} : vector<16x96xf32> to vector<16x16xf32>
    %161 = arith.truncf %159 : vector<16x16xf32> to vector<16x16xbf16>
    %162 = arith.truncf %160 : vector<16x16xf32> to vector<16x16xbf16>
    %cst_63 = arith.constant dense<0.000000e+00> : vector<16x16xf32>
    %163 = tpu.matmul %161, %162, %cst_63 {dimension_numbers = #tpu.dot_dimension_numbers<[1], [0], [0], [1], [0, 0, 1, 1], [], []>} : vector<16x16xbf16>, vector<16x16xbf16>, vector<16x16xf32> -> vector<16x16xf32>
    %164 = arith.addf %128, %163 : vector<16x16xf32>
    %165 = vector.extract_strided_slice %124 {offsets = [0, 1], sizes = [32, 1], strides = [1, 1]} : vector<32x6xf32> to vector<32x1xf32>
    %166 = vector.broadcast %165 : vector<32x1xf32> to vector<32x16xf32>
    %167 = arith.mulf %166, %37 : vector<32x16xf32>
    %cst_64 = arith.constant dense<0.000000e+00> : vector<16x16xf32>
    %168 = tpu.matmul %41, %167, %cst_64 {dimension_numbers = #tpu.dot_dimension_numbers<[1], [0], [0], [1], [0, 0, 1, 1], [], []>} : vector<16x32xf32>, vector<32x16xf32>, vector<16x16xf32> -> vector<16x16xf32>
    %169 = vector.extract_strided_slice %127 {offsets = [0, 1], sizes = [16, 1], strides = [1, 1]} : vector<16x6xf32> to vector<16x1xf32>
    %170 = vector.broadcast %169 : vector<16x1xf32> to vector<16x16xf32>
    %171 = arith.mulf %46, %170 : vector<16x16xf32>
    %172 = arith.addf %168, %171 : vector<16x16xf32>
    %173 = vector.extract_strided_slice %121 {offsets = [0, 1], sizes = [16, 1], strides = [1, 1]} : vector<16x6xf32> to vector<16x1xf32>
    %174 = vector.extract_strided_slice %122 {offsets = [1, 0], sizes = [1, 16], strides = [1, 1]} : vector<6x16xf32> to vector<1x16xf32>
    %175 = vector.broadcast %173 : vector<16x1xf32> to vector<16x16xf32>
    %176 = vector.broadcast %174 : vector<1x16xf32> to vector<16x16xf32>
    %177 = arith.addf %175, %176 : vector<16x16xf32>
    %178 = arith.addf %177, %172 : vector<16x16xf32>
    %cst_65 = arith.constant 0.000000e+00 : f32
    %179 = vector.broadcast %cst_65 : f32 to vector<16x16xf32>
    %180 = arith.cmpf oge, %178, %179 : vector<16x16xf32>
    %cst_66 = arith.constant 2.000000e-01 : f32
    %181 = vector.broadcast %cst_66 : f32 to vector<16x16xf32>
    %182 = arith.mulf %181, %178 : vector<16x16xf32>
    %183 = arith.select %180, %178, %182 : vector<16x16xi1>, vector<16x16xf32>
    %cst_67 = arith.constant -1.000000e+30 : f32
    %184 = vector.broadcast %cst_67 : f32 to vector<16x16xf32>
    %185 = arith.select %56, %183, %184 : vector<16x16xi1>, vector<16x16xf32>
    %cst_68 = arith.constant dense<0xFF800000> : vector<16xf32>
    %186 = vector.multi_reduction <maximumf>, %185, %cst_68 [1] : vector<16x16xf32> to vector<16xf32>
    %187 = vector.shape_cast %186 : vector<16xf32> to vector<16x1xf32>
    %188 = vector.broadcast %187 : vector<16x1xf32> to vector<16x16xf32>
    %189 = arith.subf %185, %188 : vector<16x16xf32>
    %190 = math.exp %189 : vector<16x16xf32>
    %cst_69 = arith.constant dense<0.000000e+00> : vector<16xf32>
    %191 = vector.multi_reduction <add>, %190, %cst_69 [1] : vector<16x16xf32> to vector<16xf32>
    %192 = vector.shape_cast %191 : vector<16xf32> to vector<16x1xf32>
    %193 = tpu.reciprocal %192 {approx = true} : vector<16x1xf32> -> vector<16x1xf32>
    %194 = vector.broadcast %193 : vector<16x1xf32> to vector<16x16xf32>
    %195 = arith.mulf %190, %194 : vector<16x16xf32>
    %196 = vector.extract_strided_slice %117 {offsets = [0, 16], sizes = [16, 16], strides = [1, 1]} : vector<16x96xf32> to vector<16x16xf32>
    %197 = arith.truncf %195 : vector<16x16xf32> to vector<16x16xbf16>
    %198 = arith.truncf %196 : vector<16x16xf32> to vector<16x16xbf16>
    %cst_70 = arith.constant dense<0.000000e+00> : vector<16x16xf32>
    %199 = tpu.matmul %197, %198, %cst_70 {dimension_numbers = #tpu.dot_dimension_numbers<[1], [0], [0], [1], [0, 0, 1, 1], [], []>} : vector<16x16xbf16>, vector<16x16xbf16>, vector<16x16xf32> -> vector<16x16xf32>
    %200 = arith.addf %164, %199 : vector<16x16xf32>
    %201 = vector.extract_strided_slice %124 {offsets = [0, 2], sizes = [32, 1], strides = [1, 1]} : vector<32x6xf32> to vector<32x1xf32>
    %202 = vector.broadcast %201 : vector<32x1xf32> to vector<32x16xf32>
    %203 = arith.mulf %202, %37 : vector<32x16xf32>
    %cst_71 = arith.constant dense<0.000000e+00> : vector<16x16xf32>
    %204 = tpu.matmul %41, %203, %cst_71 {dimension_numbers = #tpu.dot_dimension_numbers<[1], [0], [0], [1], [0, 0, 1, 1], [], []>} : vector<16x32xf32>, vector<32x16xf32>, vector<16x16xf32> -> vector<16x16xf32>
    %205 = vector.extract_strided_slice %127 {offsets = [0, 2], sizes = [16, 1], strides = [1, 1]} : vector<16x6xf32> to vector<16x1xf32>
    %206 = vector.broadcast %205 : vector<16x1xf32> to vector<16x16xf32>
    %207 = arith.mulf %46, %206 : vector<16x16xf32>
    %208 = arith.addf %204, %207 : vector<16x16xf32>
    %209 = vector.extract_strided_slice %121 {offsets = [0, 2], sizes = [16, 1], strides = [1, 1]} : vector<16x6xf32> to vector<16x1xf32>
    %210 = vector.extract_strided_slice %122 {offsets = [2, 0], sizes = [1, 16], strides = [1, 1]} : vector<6x16xf32> to vector<1x16xf32>
    %211 = vector.broadcast %209 : vector<16x1xf32> to vector<16x16xf32>
    %212 = vector.broadcast %210 : vector<1x16xf32> to vector<16x16xf32>
    %213 = arith.addf %211, %212 : vector<16x16xf32>
    %214 = arith.addf %213, %208 : vector<16x16xf32>
    %cst_72 = arith.constant 0.000000e+00 : f32
    %215 = vector.broadcast %cst_72 : f32 to vector<16x16xf32>
    %216 = arith.cmpf oge, %214, %215 : vector<16x16xf32>
    %cst_73 = arith.constant 2.000000e-01 : f32
    %217 = vector.broadcast %cst_73 : f32 to vector<16x16xf32>
    %218 = arith.mulf %217, %214 : vector<16x16xf32>
    %219 = arith.select %216, %214, %218 : vector<16x16xi1>, vector<16x16xf32>
    %cst_74 = arith.constant -1.000000e+30 : f32
    %220 = vector.broadcast %cst_74 : f32 to vector<16x16xf32>
    %221 = arith.select %56, %219, %220 : vector<16x16xi1>, vector<16x16xf32>
    %cst_75 = arith.constant dense<0xFF800000> : vector<16xf32>
    %222 = vector.multi_reduction <maximumf>, %221, %cst_75 [1] : vector<16x16xf32> to vector<16xf32>
    %223 = vector.shape_cast %222 : vector<16xf32> to vector<16x1xf32>
    %224 = vector.broadcast %223 : vector<16x1xf32> to vector<16x16xf32>
    %225 = arith.subf %221, %224 : vector<16x16xf32>
    %226 = math.exp %225 : vector<16x16xf32>
    %cst_76 = arith.constant dense<0.000000e+00> : vector<16xf32>
    %227 = vector.multi_reduction <add>, %226, %cst_76 [1] : vector<16x16xf32> to vector<16xf32>
    %228 = vector.shape_cast %227 : vector<16xf32> to vector<16x1xf32>
    %229 = tpu.reciprocal %228 {approx = true} : vector<16x1xf32> -> vector<16x1xf32>
    %230 = vector.broadcast %229 : vector<16x1xf32> to vector<16x16xf32>
    %231 = arith.mulf %226, %230 : vector<16x16xf32>
    %232 = vector.extract_strided_slice %117 {offsets = [0, 32], sizes = [16, 16], strides = [1, 1]} : vector<16x96xf32> to vector<16x16xf32>
    %233 = arith.truncf %231 : vector<16x16xf32> to vector<16x16xbf16>
    %234 = arith.truncf %232 : vector<16x16xf32> to vector<16x16xbf16>
    %cst_77 = arith.constant dense<0.000000e+00> : vector<16x16xf32>
    %235 = tpu.matmul %233, %234, %cst_77 {dimension_numbers = #tpu.dot_dimension_numbers<[1], [0], [0], [1], [0, 0, 1, 1], [], []>} : vector<16x16xbf16>, vector<16x16xbf16>, vector<16x16xf32> -> vector<16x16xf32>
    %236 = arith.addf %200, %235 : vector<16x16xf32>
    %237 = vector.extract_strided_slice %124 {offsets = [0, 3], sizes = [32, 1], strides = [1, 1]} : vector<32x6xf32> to vector<32x1xf32>
    %238 = vector.broadcast %237 : vector<32x1xf32> to vector<32x16xf32>
    %239 = arith.mulf %238, %37 : vector<32x16xf32>
    %cst_78 = arith.constant dense<0.000000e+00> : vector<16x16xf32>
    %240 = tpu.matmul %41, %239, %cst_78 {dimension_numbers = #tpu.dot_dimension_numbers<[1], [0], [0], [1], [0, 0, 1, 1], [], []>} : vector<16x32xf32>, vector<32x16xf32>, vector<16x16xf32> -> vector<16x16xf32>
    %241 = vector.extract_strided_slice %127 {offsets = [0, 3], sizes = [16, 1], strides = [1, 1]} : vector<16x6xf32> to vector<16x1xf32>
    %242 = vector.broadcast %241 : vector<16x1xf32> to vector<16x16xf32>
    %243 = arith.mulf %46, %242 : vector<16x16xf32>
    %244 = arith.addf %240, %243 : vector<16x16xf32>
    %245 = vector.extract_strided_slice %121 {offsets = [0, 3], sizes = [16, 1], strides = [1, 1]} : vector<16x6xf32> to vector<16x1xf32>
    %246 = vector.extract_strided_slice %122 {offsets = [3, 0], sizes = [1, 16], strides = [1, 1]} : vector<6x16xf32> to vector<1x16xf32>
    %247 = vector.broadcast %245 : vector<16x1xf32> to vector<16x16xf32>
    %248 = vector.broadcast %246 : vector<1x16xf32> to vector<16x16xf32>
    %249 = arith.addf %247, %248 : vector<16x16xf32>
    %250 = arith.addf %249, %244 : vector<16x16xf32>
    %cst_79 = arith.constant 0.000000e+00 : f32
    %251 = vector.broadcast %cst_79 : f32 to vector<16x16xf32>
    %252 = arith.cmpf oge, %250, %251 : vector<16x16xf32>
    %cst_80 = arith.constant 2.000000e-01 : f32
    %253 = vector.broadcast %cst_80 : f32 to vector<16x16xf32>
    %254 = arith.mulf %253, %250 : vector<16x16xf32>
    %255 = arith.select %252, %250, %254 : vector<16x16xi1>, vector<16x16xf32>
    %cst_81 = arith.constant -1.000000e+30 : f32
    %256 = vector.broadcast %cst_81 : f32 to vector<16x16xf32>
    %257 = arith.select %56, %255, %256 : vector<16x16xi1>, vector<16x16xf32>
    %cst_82 = arith.constant dense<0xFF800000> : vector<16xf32>
    %258 = vector.multi_reduction <maximumf>, %257, %cst_82 [1] : vector<16x16xf32> to vector<16xf32>
    %259 = vector.shape_cast %258 : vector<16xf32> to vector<16x1xf32>
    %260 = vector.broadcast %259 : vector<16x1xf32> to vector<16x16xf32>
    %261 = arith.subf %257, %260 : vector<16x16xf32>
    %262 = math.exp %261 : vector<16x16xf32>
    %cst_83 = arith.constant dense<0.000000e+00> : vector<16xf32>
    %263 = vector.multi_reduction <add>, %262, %cst_83 [1] : vector<16x16xf32> to vector<16xf32>
    %264 = vector.shape_cast %263 : vector<16xf32> to vector<16x1xf32>
    %265 = tpu.reciprocal %264 {approx = true} : vector<16x1xf32> -> vector<16x1xf32>
    %266 = vector.broadcast %265 : vector<16x1xf32> to vector<16x16xf32>
    %267 = arith.mulf %262, %266 : vector<16x16xf32>
    %268 = vector.extract_strided_slice %117 {offsets = [0, 48], sizes = [16, 16], strides = [1, 1]} : vector<16x96xf32> to vector<16x16xf32>
    %269 = arith.truncf %267 : vector<16x16xf32> to vector<16x16xbf16>
    %270 = arith.truncf %268 : vector<16x16xf32> to vector<16x16xbf16>
    %cst_84 = arith.constant dense<0.000000e+00> : vector<16x16xf32>
    %271 = tpu.matmul %269, %270, %cst_84 {dimension_numbers = #tpu.dot_dimension_numbers<[1], [0], [0], [1], [0, 0, 1, 1], [], []>} : vector<16x16xbf16>, vector<16x16xbf16>, vector<16x16xf32> -> vector<16x16xf32>
    %272 = arith.addf %236, %271 : vector<16x16xf32>
    %273 = vector.extract_strided_slice %124 {offsets = [0, 4], sizes = [32, 1], strides = [1, 1]} : vector<32x6xf32> to vector<32x1xf32>
    %274 = vector.broadcast %273 : vector<32x1xf32> to vector<32x16xf32>
    %275 = arith.mulf %274, %37 : vector<32x16xf32>
    %cst_85 = arith.constant dense<0.000000e+00> : vector<16x16xf32>
    %276 = tpu.matmul %41, %275, %cst_85 {dimension_numbers = #tpu.dot_dimension_numbers<[1], [0], [0], [1], [0, 0, 1, 1], [], []>} : vector<16x32xf32>, vector<32x16xf32>, vector<16x16xf32> -> vector<16x16xf32>
    %277 = vector.extract_strided_slice %127 {offsets = [0, 4], sizes = [16, 1], strides = [1, 1]} : vector<16x6xf32> to vector<16x1xf32>
    %278 = vector.broadcast %277 : vector<16x1xf32> to vector<16x16xf32>
    %279 = arith.mulf %46, %278 : vector<16x16xf32>
    %280 = arith.addf %276, %279 : vector<16x16xf32>
    %281 = vector.extract_strided_slice %121 {offsets = [0, 4], sizes = [16, 1], strides = [1, 1]} : vector<16x6xf32> to vector<16x1xf32>
    %282 = vector.extract_strided_slice %122 {offsets = [4, 0], sizes = [1, 16], strides = [1, 1]} : vector<6x16xf32> to vector<1x16xf32>
    %283 = vector.broadcast %281 : vector<16x1xf32> to vector<16x16xf32>
    %284 = vector.broadcast %282 : vector<1x16xf32> to vector<16x16xf32>
    %285 = arith.addf %283, %284 : vector<16x16xf32>
    %286 = arith.addf %285, %280 : vector<16x16xf32>
    %cst_86 = arith.constant 0.000000e+00 : f32
    %287 = vector.broadcast %cst_86 : f32 to vector<16x16xf32>
    %288 = arith.cmpf oge, %286, %287 : vector<16x16xf32>
    %cst_87 = arith.constant 2.000000e-01 : f32
    %289 = vector.broadcast %cst_87 : f32 to vector<16x16xf32>
    %290 = arith.mulf %289, %286 : vector<16x16xf32>
    %291 = arith.select %288, %286, %290 : vector<16x16xi1>, vector<16x16xf32>
    %cst_88 = arith.constant -1.000000e+30 : f32
    %292 = vector.broadcast %cst_88 : f32 to vector<16x16xf32>
    %293 = arith.select %56, %291, %292 : vector<16x16xi1>, vector<16x16xf32>
    %cst_89 = arith.constant dense<0xFF800000> : vector<16xf32>
    %294 = vector.multi_reduction <maximumf>, %293, %cst_89 [1] : vector<16x16xf32> to vector<16xf32>
    %295 = vector.shape_cast %294 : vector<16xf32> to vector<16x1xf32>
    %296 = vector.broadcast %295 : vector<16x1xf32> to vector<16x16xf32>
    %297 = arith.subf %293, %296 : vector<16x16xf32>
    %298 = math.exp %297 : vector<16x16xf32>
    %cst_90 = arith.constant dense<0.000000e+00> : vector<16xf32>
    %299 = vector.multi_reduction <add>, %298, %cst_90 [1] : vector<16x16xf32> to vector<16xf32>
    %300 = vector.shape_cast %299 : vector<16xf32> to vector<16x1xf32>
    %301 = tpu.reciprocal %300 {approx = true} : vector<16x1xf32> -> vector<16x1xf32>
    %302 = vector.broadcast %301 : vector<16x1xf32> to vector<16x16xf32>
    %303 = arith.mulf %298, %302 : vector<16x16xf32>
    %304 = vector.extract_strided_slice %117 {offsets = [0, 64], sizes = [16, 16], strides = [1, 1]} : vector<16x96xf32> to vector<16x16xf32>
    %305 = arith.truncf %303 : vector<16x16xf32> to vector<16x16xbf16>
    %306 = arith.truncf %304 : vector<16x16xf32> to vector<16x16xbf16>
    %cst_91 = arith.constant dense<0.000000e+00> : vector<16x16xf32>
    %307 = tpu.matmul %305, %306, %cst_91 {dimension_numbers = #tpu.dot_dimension_numbers<[1], [0], [0], [1], [0, 0, 1, 1], [], []>} : vector<16x16xbf16>, vector<16x16xbf16>, vector<16x16xf32> -> vector<16x16xf32>
    %308 = arith.addf %272, %307 : vector<16x16xf32>
    %309 = vector.extract_strided_slice %124 {offsets = [0, 5], sizes = [32, 1], strides = [1, 1]} : vector<32x6xf32> to vector<32x1xf32>
    %310 = vector.broadcast %309 : vector<32x1xf32> to vector<32x16xf32>
    %311 = arith.mulf %310, %37 : vector<32x16xf32>
    %cst_92 = arith.constant dense<0.000000e+00> : vector<16x16xf32>
    %312 = tpu.matmul %41, %311, %cst_92 {dimension_numbers = #tpu.dot_dimension_numbers<[1], [0], [0], [1], [0, 0, 1, 1], [], []>} : vector<16x32xf32>, vector<32x16xf32>, vector<16x16xf32> -> vector<16x16xf32>
    %313 = vector.extract_strided_slice %127 {offsets = [0, 5], sizes = [16, 1], strides = [1, 1]} : vector<16x6xf32> to vector<16x1xf32>
    %314 = vector.broadcast %313 : vector<16x1xf32> to vector<16x16xf32>
    %315 = arith.mulf %46, %314 : vector<16x16xf32>
    %316 = arith.addf %312, %315 : vector<16x16xf32>
    %317 = vector.extract_strided_slice %121 {offsets = [0, 5], sizes = [16, 1], strides = [1, 1]} : vector<16x6xf32> to vector<16x1xf32>
    %318 = vector.extract_strided_slice %122 {offsets = [5, 0], sizes = [1, 16], strides = [1, 1]} : vector<6x16xf32> to vector<1x16xf32>
    %319 = vector.broadcast %317 : vector<16x1xf32> to vector<16x16xf32>
    %320 = vector.broadcast %318 : vector<1x16xf32> to vector<16x16xf32>
    %321 = arith.addf %319, %320 : vector<16x16xf32>
    %322 = arith.addf %321, %316 : vector<16x16xf32>
    %cst_93 = arith.constant 0.000000e+00 : f32
    %323 = vector.broadcast %cst_93 : f32 to vector<16x16xf32>
    %324 = arith.cmpf oge, %322, %323 : vector<16x16xf32>
    %cst_94 = arith.constant 2.000000e-01 : f32
    %325 = vector.broadcast %cst_94 : f32 to vector<16x16xf32>
    %326 = arith.mulf %325, %322 : vector<16x16xf32>
    %327 = arith.select %324, %322, %326 : vector<16x16xi1>, vector<16x16xf32>
    %cst_95 = arith.constant -1.000000e+30 : f32
    %328 = vector.broadcast %cst_95 : f32 to vector<16x16xf32>
    %329 = arith.select %56, %327, %328 : vector<16x16xi1>, vector<16x16xf32>
    %cst_96 = arith.constant dense<0xFF800000> : vector<16xf32>
    %330 = vector.multi_reduction <maximumf>, %329, %cst_96 [1] : vector<16x16xf32> to vector<16xf32>
    %331 = vector.shape_cast %330 : vector<16xf32> to vector<16x1xf32>
    %332 = vector.broadcast %331 : vector<16x1xf32> to vector<16x16xf32>
    %333 = arith.subf %329, %332 : vector<16x16xf32>
    %334 = math.exp %333 : vector<16x16xf32>
    %cst_97 = arith.constant dense<0.000000e+00> : vector<16xf32>
    %335 = vector.multi_reduction <add>, %334, %cst_97 [1] : vector<16x16xf32> to vector<16xf32>
    %336 = vector.shape_cast %335 : vector<16xf32> to vector<16x1xf32>
    %337 = tpu.reciprocal %336 {approx = true} : vector<16x1xf32> -> vector<16x1xf32>
    %338 = vector.broadcast %337 : vector<16x1xf32> to vector<16x16xf32>
    %339 = arith.mulf %334, %338 : vector<16x16xf32>
    %340 = vector.extract_strided_slice %117 {offsets = [0, 80], sizes = [16, 16], strides = [1, 1]} : vector<16x96xf32> to vector<16x16xf32>
    %341 = arith.truncf %339 : vector<16x16xf32> to vector<16x16xbf16>
    %342 = arith.truncf %340 : vector<16x16xf32> to vector<16x16xbf16>
    %cst_98 = arith.constant dense<0.000000e+00> : vector<16x16xf32>
    %343 = tpu.matmul %341, %342, %cst_98 {dimension_numbers = #tpu.dot_dimension_numbers<[1], [0], [0], [1], [0, 0, 1, 1], [], []>} : vector<16x16xbf16>, vector<16x16xbf16>, vector<16x16xf32> -> vector<16x16xf32>
    %344 = arith.addf %308, %343 : vector<16x16xf32>
    %cst_99 = arith.constant 0.166666672 : f32
    %345 = vector.broadcast %cst_99 : f32 to vector<16x16xf32>
    %346 = arith.mulf %344, %345 : vector<16x16xf32>
    %c0_100 = arith.constant 0 : index
    %c0_101 = arith.constant 0 : index
    %347 = vector.load %arg13[%c0_100, %c0_101] : memref<1x16xf32, #tpu.memory_space<vmem>>, vector<1x16xf32>
    %348 = vector.broadcast %347 : vector<1x16xf32> to vector<16x16xf32>
    %349 = arith.addf %346, %348 : vector<16x16xf32>
    %cst_102 = arith.constant 0.000000e+00 : f32
    %350 = vector.broadcast %cst_102 : f32 to vector<16x16xf32>
    %351 = arith.maximumf %349, %350 : vector<16x16xf32>
    %c0_103 = arith.constant 0 : index
    %c0_104 = arith.constant 0 : index
    %352 = vector.load %arg14[%c0_103, %c0_104] : memref<16x48xf32, #tpu.memory_space<vmem>>, vector<16x48xf32>
    %353 = arith.truncf %351 : vector<16x16xf32> to vector<16x16xbf16>
    %354 = arith.truncf %352 : vector<16x48xf32> to vector<16x48xbf16>
    %cst_105 = arith.constant dense<0.000000e+00> : vector<16x48xf32>
    %355 = tpu.matmul %353, %354, %cst_105 {dimension_numbers = #tpu.dot_dimension_numbers<[1], [0], [0], [1], [0, 0, 1, 1], [], []>} : vector<16x16xbf16>, vector<16x48xbf16>, vector<16x48xf32> -> vector<16x48xf32>
    %c0_106 = arith.constant 0 : index
    %c0_107 = arith.constant 0 : index
    %356 = vector.load %arg15[%c0_106, %c0_107] : memref<48x6xf32, #tpu.memory_space<vmem>>, vector<48x6xf32>
    %cst_108 = arith.constant dense<0.000000e+00> : vector<16x6xf32>
    %357 = tpu.matmul %355, %356, %cst_108 {dimension_numbers = #tpu.dot_dimension_numbers<[1], [0], [0], [1], [0, 0, 1, 1], [], []>} : vector<16x48xf32>, vector<48x6xf32>, vector<16x6xf32> -> vector<16x6xf32>
    %c0_109 = arith.constant 0 : index
    %c0_110 = arith.constant 0 : index
    %358 = vector.load %arg16[%c0_109, %c0_110] : memref<48x6xf32, #tpu.memory_space<vmem>>, vector<48x6xf32>
    %cst_111 = arith.constant dense<0.000000e+00> : vector<16x6xf32>
    %359 = tpu.matmul %355, %358, %cst_111 {dimension_numbers = #tpu.dot_dimension_numbers<[1], [0], [0], [1], [0, 0, 1, 1], [], []>} : vector<16x48xf32>, vector<48x6xf32>, vector<16x6xf32> -> vector<16x6xf32>
    %360 = tpu.transpose %357, [1, 0] : vector<16x6xf32> -> vector<6x16xf32>
    %c0_112 = arith.constant 0 : index
    %c0_113 = arith.constant 0 : index
    %361 = vector.load %arg17[%c0_112, %c0_113] : memref<4x6xf32, #tpu.memory_space<vmem>>, vector<4x6xf32>
    %cst_114 = arith.constant dense<0.000000e+00> : vector<32x6xf32>
    %362 = tpu.matmul %29, %361, %cst_114 {dimension_numbers = #tpu.dot_dimension_numbers<[1], [0], [0], [1], [0, 0, 1, 1], [], []>} : vector<32x4xf32>, vector<4x6xf32>, vector<32x6xf32> -> vector<32x6xf32>
    %cst_115 = arith.constant dense<0.000000e+00> : vector<16x6xf32>
    %363 = tpu.matmul %41, %362, %cst_115 {dimension_numbers = #tpu.dot_dimension_numbers<[1], [0], [0], [1], [0, 0, 1, 1], [], []>} : vector<16x32xf32>, vector<32x6xf32>, vector<16x6xf32> -> vector<16x6xf32>
    %364 = vector.broadcast %53 : vector<16x1xf32> to vector<16x6xf32>
    %365 = arith.mulf %363, %364 : vector<16x6xf32>
    %cst_116 = arith.constant 0.000000e+00 : f32
    %366 = vector.broadcast %cst_116 : f32 to vector<16x8xf32>
    %367 = vector.extract_strided_slice %362 {offsets = [0, 0], sizes = [32, 1], strides = [1, 1]} : vector<32x6xf32> to vector<32x1xf32>
    %368 = vector.broadcast %367 : vector<32x1xf32> to vector<32x16xf32>
    %369 = arith.mulf %368, %37 : vector<32x16xf32>
    %cst_117 = arith.constant dense<0.000000e+00> : vector<16x16xf32>
    %370 = tpu.matmul %41, %369, %cst_117 {dimension_numbers = #tpu.dot_dimension_numbers<[1], [0], [0], [1], [0, 0, 1, 1], [], []>} : vector<16x32xf32>, vector<32x16xf32>, vector<16x16xf32> -> vector<16x16xf32>
    %371 = vector.extract_strided_slice %365 {offsets = [0, 0], sizes = [16, 1], strides = [1, 1]} : vector<16x6xf32> to vector<16x1xf32>
    %372 = vector.broadcast %371 : vector<16x1xf32> to vector<16x16xf32>
    %373 = arith.mulf %46, %372 : vector<16x16xf32>
    %374 = arith.addf %370, %373 : vector<16x16xf32>
    %375 = vector.extract_strided_slice %359 {offsets = [0, 0], sizes = [16, 1], strides = [1, 1]} : vector<16x6xf32> to vector<16x1xf32>
    %376 = vector.extract_strided_slice %360 {offsets = [0, 0], sizes = [1, 16], strides = [1, 1]} : vector<6x16xf32> to vector<1x16xf32>
    %377 = vector.broadcast %375 : vector<16x1xf32> to vector<16x16xf32>
    %378 = vector.broadcast %376 : vector<1x16xf32> to vector<16x16xf32>
    %379 = arith.addf %377, %378 : vector<16x16xf32>
    %380 = arith.addf %379, %374 : vector<16x16xf32>
    %cst_118 = arith.constant 0.000000e+00 : f32
    %381 = vector.broadcast %cst_118 : f32 to vector<16x16xf32>
    %382 = arith.cmpf oge, %380, %381 : vector<16x16xf32>
    %cst_119 = arith.constant 2.000000e-01 : f32
    %383 = vector.broadcast %cst_119 : f32 to vector<16x16xf32>
    %384 = arith.mulf %383, %380 : vector<16x16xf32>
    %385 = arith.select %382, %380, %384 : vector<16x16xi1>, vector<16x16xf32>
    %cst_120 = arith.constant -1.000000e+30 : f32
    %386 = vector.broadcast %cst_120 : f32 to vector<16x16xf32>
    %387 = arith.select %56, %385, %386 : vector<16x16xi1>, vector<16x16xf32>
    %cst_121 = arith.constant dense<0xFF800000> : vector<16xf32>
    %388 = vector.multi_reduction <maximumf>, %387, %cst_121 [1] : vector<16x16xf32> to vector<16xf32>
    %389 = vector.shape_cast %388 : vector<16xf32> to vector<16x1xf32>
    %390 = vector.broadcast %389 : vector<16x1xf32> to vector<16x16xf32>
    %391 = arith.subf %387, %390 : vector<16x16xf32>
    %392 = math.exp %391 : vector<16x16xf32>
    %cst_122 = arith.constant dense<0.000000e+00> : vector<16xf32>
    %393 = vector.multi_reduction <add>, %392, %cst_122 [1] : vector<16x16xf32> to vector<16xf32>
    %394 = vector.shape_cast %393 : vector<16xf32> to vector<16x1xf32>
    %395 = tpu.reciprocal %394 {approx = true} : vector<16x1xf32> -> vector<16x1xf32>
    %396 = vector.broadcast %395 : vector<16x1xf32> to vector<16x16xf32>
    %397 = arith.mulf %392, %396 : vector<16x16xf32>
    %398 = vector.extract_strided_slice %355 {offsets = [0, 0], sizes = [16, 8], strides = [1, 1]} : vector<16x48xf32> to vector<16x8xf32>
    %399 = arith.truncf %397 : vector<16x16xf32> to vector<16x16xbf16>
    %400 = arith.truncf %398 : vector<16x8xf32> to vector<16x8xbf16>
    %cst_123 = arith.constant dense<0.000000e+00> : vector<16x8xf32>
    %401 = tpu.matmul %399, %400, %cst_123 {dimension_numbers = #tpu.dot_dimension_numbers<[1], [0], [0], [1], [0, 0, 1, 1], [], []>} : vector<16x16xbf16>, vector<16x8xbf16>, vector<16x8xf32> -> vector<16x8xf32>
    %402 = arith.addf %366, %401 : vector<16x8xf32>
    %403 = vector.extract_strided_slice %362 {offsets = [0, 1], sizes = [32, 1], strides = [1, 1]} : vector<32x6xf32> to vector<32x1xf32>
    %404 = vector.broadcast %403 : vector<32x1xf32> to vector<32x16xf32>
    %405 = arith.mulf %404, %37 : vector<32x16xf32>
    %cst_124 = arith.constant dense<0.000000e+00> : vector<16x16xf32>
    %406 = tpu.matmul %41, %405, %cst_124 {dimension_numbers = #tpu.dot_dimension_numbers<[1], [0], [0], [1], [0, 0, 1, 1], [], []>} : vector<16x32xf32>, vector<32x16xf32>, vector<16x16xf32> -> vector<16x16xf32>
    %407 = vector.extract_strided_slice %365 {offsets = [0, 1], sizes = [16, 1], strides = [1, 1]} : vector<16x6xf32> to vector<16x1xf32>
    %408 = vector.broadcast %407 : vector<16x1xf32> to vector<16x16xf32>
    %409 = arith.mulf %46, %408 : vector<16x16xf32>
    %410 = arith.addf %406, %409 : vector<16x16xf32>
    %411 = vector.extract_strided_slice %359 {offsets = [0, 1], sizes = [16, 1], strides = [1, 1]} : vector<16x6xf32> to vector<16x1xf32>
    %412 = vector.extract_strided_slice %360 {offsets = [1, 0], sizes = [1, 16], strides = [1, 1]} : vector<6x16xf32> to vector<1x16xf32>
    %413 = vector.broadcast %411 : vector<16x1xf32> to vector<16x16xf32>
    %414 = vector.broadcast %412 : vector<1x16xf32> to vector<16x16xf32>
    %415 = arith.addf %413, %414 : vector<16x16xf32>
    %416 = arith.addf %415, %410 : vector<16x16xf32>
    %cst_125 = arith.constant 0.000000e+00 : f32
    %417 = vector.broadcast %cst_125 : f32 to vector<16x16xf32>
    %418 = arith.cmpf oge, %416, %417 : vector<16x16xf32>
    %cst_126 = arith.constant 2.000000e-01 : f32
    %419 = vector.broadcast %cst_126 : f32 to vector<16x16xf32>
    %420 = arith.mulf %419, %416 : vector<16x16xf32>
    %421 = arith.select %418, %416, %420 : vector<16x16xi1>, vector<16x16xf32>
    %cst_127 = arith.constant -1.000000e+30 : f32
    %422 = vector.broadcast %cst_127 : f32 to vector<16x16xf32>
    %423 = arith.select %56, %421, %422 : vector<16x16xi1>, vector<16x16xf32>
    %cst_128 = arith.constant dense<0xFF800000> : vector<16xf32>
    %424 = vector.multi_reduction <maximumf>, %423, %cst_128 [1] : vector<16x16xf32> to vector<16xf32>
    %425 = vector.shape_cast %424 : vector<16xf32> to vector<16x1xf32>
    %426 = vector.broadcast %425 : vector<16x1xf32> to vector<16x16xf32>
    %427 = arith.subf %423, %426 : vector<16x16xf32>
    %428 = math.exp %427 : vector<16x16xf32>
    %cst_129 = arith.constant dense<0.000000e+00> : vector<16xf32>
    %429 = vector.multi_reduction <add>, %428, %cst_129 [1] : vector<16x16xf32> to vector<16xf32>
    %430 = vector.shape_cast %429 : vector<16xf32> to vector<16x1xf32>
    %431 = tpu.reciprocal %430 {approx = true} : vector<16x1xf32> -> vector<16x1xf32>
    %432 = vector.broadcast %431 : vector<16x1xf32> to vector<16x16xf32>
    %433 = arith.mulf %428, %432 : vector<16x16xf32>
    %434 = vector.extract_strided_slice %355 {offsets = [0, 8], sizes = [16, 8], strides = [1, 1]} : vector<16x48xf32> to vector<16x8xf32>
    %435 = arith.truncf %433 : vector<16x16xf32> to vector<16x16xbf16>
    %436 = arith.truncf %434 : vector<16x8xf32> to vector<16x8xbf16>
    %cst_130 = arith.constant dense<0.000000e+00> : vector<16x8xf32>
    %437 = tpu.matmul %435, %436, %cst_130 {dimension_numbers = #tpu.dot_dimension_numbers<[1], [0], [0], [1], [0, 0, 1, 1], [], []>} : vector<16x16xbf16>, vector<16x8xbf16>, vector<16x8xf32> -> vector<16x8xf32>
    %438 = arith.addf %402, %437 : vector<16x8xf32>
    %439 = vector.extract_strided_slice %362 {offsets = [0, 2], sizes = [32, 1], strides = [1, 1]} : vector<32x6xf32> to vector<32x1xf32>
    %440 = vector.broadcast %439 : vector<32x1xf32> to vector<32x16xf32>
    %441 = arith.mulf %440, %37 : vector<32x16xf32>
    %cst_131 = arith.constant dense<0.000000e+00> : vector<16x16xf32>
    %442 = tpu.matmul %41, %441, %cst_131 {dimension_numbers = #tpu.dot_dimension_numbers<[1], [0], [0], [1], [0, 0, 1, 1], [], []>} : vector<16x32xf32>, vector<32x16xf32>, vector<16x16xf32> -> vector<16x16xf32>
    %443 = vector.extract_strided_slice %365 {offsets = [0, 2], sizes = [16, 1], strides = [1, 1]} : vector<16x6xf32> to vector<16x1xf32>
    %444 = vector.broadcast %443 : vector<16x1xf32> to vector<16x16xf32>
    %445 = arith.mulf %46, %444 : vector<16x16xf32>
    %446 = arith.addf %442, %445 : vector<16x16xf32>
    %447 = vector.extract_strided_slice %359 {offsets = [0, 2], sizes = [16, 1], strides = [1, 1]} : vector<16x6xf32> to vector<16x1xf32>
    %448 = vector.extract_strided_slice %360 {offsets = [2, 0], sizes = [1, 16], strides = [1, 1]} : vector<6x16xf32> to vector<1x16xf32>
    %449 = vector.broadcast %447 : vector<16x1xf32> to vector<16x16xf32>
    %450 = vector.broadcast %448 : vector<1x16xf32> to vector<16x16xf32>
    %451 = arith.addf %449, %450 : vector<16x16xf32>
    %452 = arith.addf %451, %446 : vector<16x16xf32>
    %cst_132 = arith.constant 0.000000e+00 : f32
    %453 = vector.broadcast %cst_132 : f32 to vector<16x16xf32>
    %454 = arith.cmpf oge, %452, %453 : vector<16x16xf32>
    %cst_133 = arith.constant 2.000000e-01 : f32
    %455 = vector.broadcast %cst_133 : f32 to vector<16x16xf32>
    %456 = arith.mulf %455, %452 : vector<16x16xf32>
    %457 = arith.select %454, %452, %456 : vector<16x16xi1>, vector<16x16xf32>
    %cst_134 = arith.constant -1.000000e+30 : f32
    %458 = vector.broadcast %cst_134 : f32 to vector<16x16xf32>
    %459 = arith.select %56, %457, %458 : vector<16x16xi1>, vector<16x16xf32>
    %cst_135 = arith.constant dense<0xFF800000> : vector<16xf32>
    %460 = vector.multi_reduction <maximumf>, %459, %cst_135 [1] : vector<16x16xf32> to vector<16xf32>
    %461 = vector.shape_cast %460 : vector<16xf32> to vector<16x1xf32>
    %462 = vector.broadcast %461 : vector<16x1xf32> to vector<16x16xf32>
    %463 = arith.subf %459, %462 : vector<16x16xf32>
    %464 = math.exp %463 : vector<16x16xf32>
    %cst_136 = arith.constant dense<0.000000e+00> : vector<16xf32>
    %465 = vector.multi_reduction <add>, %464, %cst_136 [1] : vector<16x16xf32> to vector<16xf32>
    %466 = vector.shape_cast %465 : vector<16xf32> to vector<16x1xf32>
    %467 = tpu.reciprocal %466 {approx = true} : vector<16x1xf32> -> vector<16x1xf32>
    %468 = vector.broadcast %467 : vector<16x1xf32> to vector<16x16xf32>
    %469 = arith.mulf %464, %468 : vector<16x16xf32>
    %470 = vector.extract_strided_slice %355 {offsets = [0, 16], sizes = [16, 8], strides = [1, 1]} : vector<16x48xf32> to vector<16x8xf32>
    %471 = arith.truncf %469 : vector<16x16xf32> to vector<16x16xbf16>
    %472 = arith.truncf %470 : vector<16x8xf32> to vector<16x8xbf16>
    %cst_137 = arith.constant dense<0.000000e+00> : vector<16x8xf32>
    %473 = tpu.matmul %471, %472, %cst_137 {dimension_numbers = #tpu.dot_dimension_numbers<[1], [0], [0], [1], [0, 0, 1, 1], [], []>} : vector<16x16xbf16>, vector<16x8xbf16>, vector<16x8xf32> -> vector<16x8xf32>
    %474 = arith.addf %438, %473 : vector<16x8xf32>
    %475 = vector.extract_strided_slice %362 {offsets = [0, 3], sizes = [32, 1], strides = [1, 1]} : vector<32x6xf32> to vector<32x1xf32>
    %476 = vector.broadcast %475 : vector<32x1xf32> to vector<32x16xf32>
    %477 = arith.mulf %476, %37 : vector<32x16xf32>
    %cst_138 = arith.constant dense<0.000000e+00> : vector<16x16xf32>
    %478 = tpu.matmul %41, %477, %cst_138 {dimension_numbers = #tpu.dot_dimension_numbers<[1], [0], [0], [1], [0, 0, 1, 1], [], []>} : vector<16x32xf32>, vector<32x16xf32>, vector<16x16xf32> -> vector<16x16xf32>
    %479 = vector.extract_strided_slice %365 {offsets = [0, 3], sizes = [16, 1], strides = [1, 1]} : vector<16x6xf32> to vector<16x1xf32>
    %480 = vector.broadcast %479 : vector<16x1xf32> to vector<16x16xf32>
    %481 = arith.mulf %46, %480 : vector<16x16xf32>
    %482 = arith.addf %478, %481 : vector<16x16xf32>
    %483 = vector.extract_strided_slice %359 {offsets = [0, 3], sizes = [16, 1], strides = [1, 1]} : vector<16x6xf32> to vector<16x1xf32>
    %484 = vector.extract_strided_slice %360 {offsets = [3, 0], sizes = [1, 16], strides = [1, 1]} : vector<6x16xf32> to vector<1x16xf32>
    %485 = vector.broadcast %483 : vector<16x1xf32> to vector<16x16xf32>
    %486 = vector.broadcast %484 : vector<1x16xf32> to vector<16x16xf32>
    %487 = arith.addf %485, %486 : vector<16x16xf32>
    %488 = arith.addf %487, %482 : vector<16x16xf32>
    %cst_139 = arith.constant 0.000000e+00 : f32
    %489 = vector.broadcast %cst_139 : f32 to vector<16x16xf32>
    %490 = arith.cmpf oge, %488, %489 : vector<16x16xf32>
    %cst_140 = arith.constant 2.000000e-01 : f32
    %491 = vector.broadcast %cst_140 : f32 to vector<16x16xf32>
    %492 = arith.mulf %491, %488 : vector<16x16xf32>
    %493 = arith.select %490, %488, %492 : vector<16x16xi1>, vector<16x16xf32>
    %cst_141 = arith.constant -1.000000e+30 : f32
    %494 = vector.broadcast %cst_141 : f32 to vector<16x16xf32>
    %495 = arith.select %56, %493, %494 : vector<16x16xi1>, vector<16x16xf32>
    %cst_142 = arith.constant dense<0xFF800000> : vector<16xf32>
    %496 = vector.multi_reduction <maximumf>, %495, %cst_142 [1] : vector<16x16xf32> to vector<16xf32>
    %497 = vector.shape_cast %496 : vector<16xf32> to vector<16x1xf32>
    %498 = vector.broadcast %497 : vector<16x1xf32> to vector<16x16xf32>
    %499 = arith.subf %495, %498 : vector<16x16xf32>
    %500 = math.exp %499 : vector<16x16xf32>
    %cst_143 = arith.constant dense<0.000000e+00> : vector<16xf32>
    %501 = vector.multi_reduction <add>, %500, %cst_143 [1] : vector<16x16xf32> to vector<16xf32>
    %502 = vector.shape_cast %501 : vector<16xf32> to vector<16x1xf32>
    %503 = tpu.reciprocal %502 {approx = true} : vector<16x1xf32> -> vector<16x1xf32>
    %504 = vector.broadcast %503 : vector<16x1xf32> to vector<16x16xf32>
    %505 = arith.mulf %500, %504 : vector<16x16xf32>
    %506 = vector.extract_strided_slice %355 {offsets = [0, 24], sizes = [16, 8], strides = [1, 1]} : vector<16x48xf32> to vector<16x8xf32>
    %507 = arith.truncf %505 : vector<16x16xf32> to vector<16x16xbf16>
    %508 = arith.truncf %506 : vector<16x8xf32> to vector<16x8xbf16>
    %cst_144 = arith.constant dense<0.000000e+00> : vector<16x8xf32>
    %509 = tpu.matmul %507, %508, %cst_144 {dimension_numbers = #tpu.dot_dimension_numbers<[1], [0], [0], [1], [0, 0, 1, 1], [], []>} : vector<16x16xbf16>, vector<16x8xbf16>, vector<16x8xf32> -> vector<16x8xf32>
    %510 = arith.addf %474, %509 : vector<16x8xf32>
    %511 = vector.extract_strided_slice %362 {offsets = [0, 4], sizes = [32, 1], strides = [1, 1]} : vector<32x6xf32> to vector<32x1xf32>
    %512 = vector.broadcast %511 : vector<32x1xf32> to vector<32x16xf32>
    %513 = arith.mulf %512, %37 : vector<32x16xf32>
    %cst_145 = arith.constant dense<0.000000e+00> : vector<16x16xf32>
    %514 = tpu.matmul %41, %513, %cst_145 {dimension_numbers = #tpu.dot_dimension_numbers<[1], [0], [0], [1], [0, 0, 1, 1], [], []>} : vector<16x32xf32>, vector<32x16xf32>, vector<16x16xf32> -> vector<16x16xf32>
    %515 = vector.extract_strided_slice %365 {offsets = [0, 4], sizes = [16, 1], strides = [1, 1]} : vector<16x6xf32> to vector<16x1xf32>
    %516 = vector.broadcast %515 : vector<16x1xf32> to vector<16x16xf32>
    %517 = arith.mulf %46, %516 : vector<16x16xf32>
    %518 = arith.addf %514, %517 : vector<16x16xf32>
    %519 = vector.extract_strided_slice %359 {offsets = [0, 4], sizes = [16, 1], strides = [1, 1]} : vector<16x6xf32> to vector<16x1xf32>
    %520 = vector.extract_strided_slice %360 {offsets = [4, 0], sizes = [1, 16], strides = [1, 1]} : vector<6x16xf32> to vector<1x16xf32>
    %521 = vector.broadcast %519 : vector<16x1xf32> to vector<16x16xf32>
    %522 = vector.broadcast %520 : vector<1x16xf32> to vector<16x16xf32>
    %523 = arith.addf %521, %522 : vector<16x16xf32>
    %524 = arith.addf %523, %518 : vector<16x16xf32>
    %cst_146 = arith.constant 0.000000e+00 : f32
    %525 = vector.broadcast %cst_146 : f32 to vector<16x16xf32>
    %526 = arith.cmpf oge, %524, %525 : vector<16x16xf32>
    %cst_147 = arith.constant 2.000000e-01 : f32
    %527 = vector.broadcast %cst_147 : f32 to vector<16x16xf32>
    %528 = arith.mulf %527, %524 : vector<16x16xf32>
    %529 = arith.select %526, %524, %528 : vector<16x16xi1>, vector<16x16xf32>
    %cst_148 = arith.constant -1.000000e+30 : f32
    %530 = vector.broadcast %cst_148 : f32 to vector<16x16xf32>
    %531 = arith.select %56, %529, %530 : vector<16x16xi1>, vector<16x16xf32>
    %cst_149 = arith.constant dense<0xFF800000> : vector<16xf32>
    %532 = vector.multi_reduction <maximumf>, %531, %cst_149 [1] : vector<16x16xf32> to vector<16xf32>
    %533 = vector.shape_cast %532 : vector<16xf32> to vector<16x1xf32>
    %534 = vector.broadcast %533 : vector<16x1xf32> to vector<16x16xf32>
    %535 = arith.subf %531, %534 : vector<16x16xf32>
    %536 = math.exp %535 : vector<16x16xf32>
    %cst_150 = arith.constant dense<0.000000e+00> : vector<16xf32>
    %537 = vector.multi_reduction <add>, %536, %cst_150 [1] : vector<16x16xf32> to vector<16xf32>
    %538 = vector.shape_cast %537 : vector<16xf32> to vector<16x1xf32>
    %539 = tpu.reciprocal %538 {approx = true} : vector<16x1xf32> -> vector<16x1xf32>
    %540 = vector.broadcast %539 : vector<16x1xf32> to vector<16x16xf32>
    %541 = arith.mulf %536, %540 : vector<16x16xf32>
    %542 = vector.extract_strided_slice %355 {offsets = [0, 32], sizes = [16, 8], strides = [1, 1]} : vector<16x48xf32> to vector<16x8xf32>
    %543 = arith.truncf %541 : vector<16x16xf32> to vector<16x16xbf16>
    %544 = arith.truncf %542 : vector<16x8xf32> to vector<16x8xbf16>
    %cst_151 = arith.constant dense<0.000000e+00> : vector<16x8xf32>
    %545 = tpu.matmul %543, %544, %cst_151 {dimension_numbers = #tpu.dot_dimension_numbers<[1], [0], [0], [1], [0, 0, 1, 1], [], []>} : vector<16x16xbf16>, vector<16x8xbf16>, vector<16x8xf32> -> vector<16x8xf32>
    %546 = arith.addf %510, %545 : vector<16x8xf32>
    %547 = vector.extract_strided_slice %362 {offsets = [0, 5], sizes = [32, 1], strides = [1, 1]} : vector<32x6xf32> to vector<32x1xf32>
    %548 = vector.broadcast %547 : vector<32x1xf32> to vector<32x16xf32>
    %549 = arith.mulf %548, %37 : vector<32x16xf32>
    %cst_152 = arith.constant dense<0.000000e+00> : vector<16x16xf32>
    %550 = tpu.matmul %41, %549, %cst_152 {dimension_numbers = #tpu.dot_dimension_numbers<[1], [0], [0], [1], [0, 0, 1, 1], [], []>} : vector<16x32xf32>, vector<32x16xf32>, vector<16x16xf32> -> vector<16x16xf32>
    %551 = vector.extract_strided_slice %365 {offsets = [0, 5], sizes = [16, 1], strides = [1, 1]} : vector<16x6xf32> to vector<16x1xf32>
    %552 = vector.broadcast %551 : vector<16x1xf32> to vector<16x16xf32>
    %553 = arith.mulf %46, %552 : vector<16x16xf32>
    %554 = arith.addf %550, %553 : vector<16x16xf32>
    %555 = vector.extract_strided_slice %359 {offsets = [0, 5], sizes = [16, 1], strides = [1, 1]} : vector<16x6xf32> to vector<16x1xf32>
    %556 = vector.extract_strided_slice %360 {offsets = [5, 0], sizes = [1, 16], strides = [1, 1]} : vector<6x16xf32> to vector<1x16xf32>
    %557 = vector.broadcast %555 : vector<16x1xf32> to vector<16x16xf32>
    %558 = vector.broadcast %556 : vector<1x16xf32> to vector<16x16xf32>
    %559 = arith.addf %557, %558 : vector<16x16xf32>
    %560 = arith.addf %559, %554 : vector<16x16xf32>
    %cst_153 = arith.constant 0.000000e+00 : f32
    %561 = vector.broadcast %cst_153 : f32 to vector<16x16xf32>
    %562 = arith.cmpf oge, %560, %561 : vector<16x16xf32>
    %cst_154 = arith.constant 2.000000e-01 : f32
    %563 = vector.broadcast %cst_154 : f32 to vector<16x16xf32>
    %564 = arith.mulf %563, %560 : vector<16x16xf32>
    %565 = arith.select %562, %560, %564 : vector<16x16xi1>, vector<16x16xf32>
    %cst_155 = arith.constant -1.000000e+30 : f32
    %566 = vector.broadcast %cst_155 : f32 to vector<16x16xf32>
    %567 = arith.select %56, %565, %566 : vector<16x16xi1>, vector<16x16xf32>
    %cst_156 = arith.constant dense<0xFF800000> : vector<16xf32>
    %568 = vector.multi_reduction <maximumf>, %567, %cst_156 [1] : vector<16x16xf32> to vector<16xf32>
    %569 = vector.shape_cast %568 : vector<16xf32> to vector<16x1xf32>
    %570 = vector.broadcast %569 : vector<16x1xf32> to vector<16x16xf32>
    %571 = arith.subf %567, %570 : vector<16x16xf32>
    %572 = math.exp %571 : vector<16x16xf32>
    %cst_157 = arith.constant dense<0.000000e+00> : vector<16xf32>
    %573 = vector.multi_reduction <add>, %572, %cst_157 [1] : vector<16x16xf32> to vector<16xf32>
    %574 = vector.shape_cast %573 : vector<16xf32> to vector<16x1xf32>
    %575 = tpu.reciprocal %574 {approx = true} : vector<16x1xf32> -> vector<16x1xf32>
    %576 = vector.broadcast %575 : vector<16x1xf32> to vector<16x16xf32>
    %577 = arith.mulf %572, %576 : vector<16x16xf32>
    %578 = vector.extract_strided_slice %355 {offsets = [0, 40], sizes = [16, 8], strides = [1, 1]} : vector<16x48xf32> to vector<16x8xf32>
    %579 = arith.truncf %577 : vector<16x16xf32> to vector<16x16xbf16>
    %580 = arith.truncf %578 : vector<16x8xf32> to vector<16x8xbf16>
    %cst_158 = arith.constant dense<0.000000e+00> : vector<16x8xf32>
    %581 = tpu.matmul %579, %580, %cst_158 {dimension_numbers = #tpu.dot_dimension_numbers<[1], [0], [0], [1], [0, 0, 1, 1], [], []>} : vector<16x16xbf16>, vector<16x8xbf16>, vector<16x8xf32> -> vector<16x8xf32>
    %582 = arith.addf %546, %581 : vector<16x8xf32>
    %cst_159 = arith.constant 0.166666672 : f32
    %583 = vector.broadcast %cst_159 : f32 to vector<16x8xf32>
    %584 = arith.mulf %582, %583 : vector<16x8xf32>
    %c0_160 = arith.constant 0 : index
    %c0_161 = arith.constant 0 : index
    %585 = vector.load %arg18[%c0_160, %c0_161] : memref<1x8xf32, #tpu.memory_space<vmem>>, vector<1x8xf32>
    %586 = vector.broadcast %585 : vector<1x8xf32> to vector<16x8xf32>
    %587 = arith.addf %584, %586 : vector<16x8xf32>
    %cst_162 = arith.constant 0.000000e+00 : f32
    %588 = vector.broadcast %cst_162 : f32 to vector<16x8xf32>
    %589 = arith.maximumf %587, %588 : vector<16x8xf32>
    %c0_163 = arith.constant 0 : index
    %c0_164 = arith.constant 0 : index
    %590 = vector.load %arg4[%c0_163, %c0_164] : memref<1x16xi32, #tpu.memory_space<vmem>>, vector<1x16xi32>
    %591 = tpu.iota {dimensions = array<i32: 0>} : vector<2x16xi32>
    %592 = vector.broadcast %590 : vector<1x16xi32> to vector<2x16xi32>
    %593 = arith.cmpi eq, %591, %592 : vector<2x16xi32>
    %594 = arith.extui %593 : vector<2x16xi1> to vector<2x16xi32>
    %595 = arith.sitofp %594 : vector<2x16xi32> to vector<2x16xf32>
    %cst_165 = arith.constant dense<0.000000e+00> : vector<2xf32>
    %596 = vector.multi_reduction <add>, %595, %cst_165 [1] : vector<2x16xf32> to vector<2xf32>
    %597 = vector.shape_cast %596 : vector<2xf32> to vector<2x1xf32>
    %cst_166 = arith.constant dense<0.000000e+00> : vector<2x8xf32>
    %598 = tpu.matmul %595, %589, %cst_166 {dimension_numbers = #tpu.dot_dimension_numbers<[1], [0], [0], [1], [0, 0, 1, 1], [], []>} : vector<2x16xf32>, vector<16x8xf32>, vector<2x8xf32> -> vector<2x8xf32>
    %cst_167 = arith.constant 1.000000e+00 : f32
    %599 = vector.broadcast %cst_167 : f32 to vector<2x1xf32>
    %600 = arith.maximumf %597, %599 : vector<2x1xf32>
    %601 = vector.broadcast %600 : vector<2x1xf32> to vector<2x8xf32>
    %602 = arith.divf %598, %601 : vector<2x8xf32>
    %cst_168 = arith.constant 0.000000e+00 : f32
    %603 = vector.broadcast %cst_168 : f32 to vector<2x8xf32>
    %604 = arith.maximumf %602, %603 : vector<2x8xf32>
    %c0_169 = arith.constant 0 : index
    %c0_170 = arith.constant 0 : index
    %605 = vector.load %arg19[%c0_169, %c0_170] : memref<8x4xf32, #tpu.memory_space<vmem>>, vector<8x4xf32>
    %cst_171 = arith.constant dense<0.000000e+00> : vector<2x4xf32>
    %606 = tpu.matmul %604, %605, %cst_171 {dimension_numbers = #tpu.dot_dimension_numbers<[1], [0], [0], [1], [0, 0, 1, 1], [], []>} : vector<2x8xf32>, vector<8x4xf32>, vector<2x4xf32> -> vector<2x4xf32>
    %c0_172 = arith.constant 0 : index
    %c0_173 = arith.constant 0 : index
    %607 = vector.load %arg20[%c0_172, %c0_173] : memref<1x4xf32, #tpu.memory_space<vmem>>, vector<1x4xf32>
    %608 = vector.broadcast %607 : vector<1x4xf32> to vector<2x4xf32>
    %609 = arith.addf %606, %608 : vector<2x4xf32>
    %cst_174 = arith.constant dense<0xFF800000> : vector<2xf32>
    %610 = vector.multi_reduction <maximumf>, %609, %cst_174 [1] : vector<2x4xf32> to vector<2xf32>
    %611 = vector.shape_cast %610 : vector<2xf32> to vector<2x1xf32>
    %612 = vector.broadcast %611 : vector<2x1xf32> to vector<2x4xf32>
    %613 = arith.subf %609, %612 : vector<2x4xf32>
    %614 = math.exp %613 : vector<2x4xf32>
    %cst_175 = arith.constant dense<0.000000e+00> : vector<2xf32>
    %615 = vector.multi_reduction <add>, %614, %cst_175 [1] : vector<2x4xf32> to vector<2xf32>
    %616 = vector.shape_cast %615 : vector<2xf32> to vector<2x1xf32>
    %617 = math.log %616 : vector<2x1xf32>
    %618 = vector.broadcast %617 : vector<2x1xf32> to vector<2x4xf32>
    %619 = arith.subf %613, %618 : vector<2x4xf32>
    %c0_176 = arith.constant 0 : index
    %c0_177 = arith.constant 0 : index
    %620 = vector.load %arg21[%c0_176, %c0_177] : memref<2x4xf32, #tpu.memory_space<vmem>>, vector<2x4xf32>
    tpu.vector_store %arg21[%c0_176, %c0_177], %619 {strides = array<i32>} : memref<2x4xf32, #tpu.memory_space<vmem>>, vector<2x4xf32>,
    return
  }
}

</mosaic_0001>

<bundles_post_ra>
// kernel: gcn_forward.1
= control target key start
LH: loop header
LB: loop body
LE: loop exit
PB: predicated region body
PF: predicated region fallthrough
CT: control target
= control target key end

     0   :  { %s6520_s0 = inlined_call_operand.vmem [shape: f32[16,8], index: 0, kind: input, shape index: {}]   ;;  %s6521_s1 = inlined_call_operand.vmem [shape: f32[32,2], index: 1, kind: input, shape index: {}]   ;;  %s6522_s2 = inlined_call_operand.vmem [shape: s32[32,1], index: 2, kind: input, shape index: {}]   ;;  %s6523_s3 = inlined_call_operand.vmem [shape: s32[1,32], index: 3, kind: input, shape index: {}]   ;;  %s6524_s4 = inlined_call_operand.vmem [shape: s32[1,16], index: 4, kind: input, shape index: {}]   ;;  %s6525_s5 = inlined_call_operand.vmem [shape: f32[2,20], index: 5, kind: input, shape index: {}]   ;;  %s6526_s6 = inlined_call_operand.vmem [shape: f32[1,20], index: 6, kind: input, shape index: {}]   ;;  %s6527_s7 = inlined_call_operand.vmem [shape: f32[20,9], index: 7, kind: input, shape index: {}]   ;;  %s6528_s8 = inlined_call_operand.vmem [shape: f32[1,9], index: 8, kind: input, shape index: {}]   ;;  %s6529_s9 = inlined_call_operand.vmem [shape: f32[8,96], index: 9, kind: input, shape index: {}]   ;;  %s6530_s10 = inlined_call_operand.vmem [shape: f32[96,6], index: 10, kind: input, shape index: {}]   ;;  %s6531_s11 = inlined_call_operand.vmem [shape: f32[96,6], index: 11, kind: input, shape index: {}]   ;;  %s6532_s12 = inlined_call_operand.vmem [shape: f32[4,6], index: 12, kind: input, shape index: {}]   ;;  %s6533_s13 = inlined_call_operand.vmem [shape: f32[1,16], index: 13, kind: input, shape index: {}]   ;;  %s6534_s14 = inlined_call_operand.vmem [shape: f32[16,48], index: 14, kind: input, shape index: {}]   ;;  %s6535_s15 = inlined_call_operand.vmem [shape: f32[48,6], index: 15, kind: input, shape index: {}]   ;;  %s6536_s16 = inlined_call_operand.vmem [shape: f32[48,6], index: 16, kind: input, shape index: {}]   ;;  %s6537_s17 = inlined_call_operand.vmem [shape: f32[4,6], index: 17, kind: input, shape index: {}]   ;;  %s6538_s18 = inlined_call_operand.vmem [shape: f32[1,8], index: 18, kind: input, shape index: {}]   ;;  %s6539_s19 = inlined_call_operand.vmem [shape: f32[8,4], index: 19, kind: input, shape index: {}]   ;;  %s6540_s20 = inlined_call_operand.vmem [shape: f32[1,4], index: 20, kind: input, shape index: {}]   ;;  %s6541_s21 = inlined_call_operand.hbm [shape: f32[2,4], index: 21, kind: output, shape index: {}]  }
   0x1   :  { %6547 = sst [smem:[#allocation5_spill]] %s6520_s0 }
   0x2   :  { %6548 = sst [smem:[#allocation6_spill]] %s6521_s1 }
   0x3   :  { %6549 = sst [smem:[#allocation7_spill]] %s6522_s2 }
   0x4   :  { %6550 = sst [smem:[#allocation8_spill]] %s6523_s3 }
   0x5   :  { %6551 = sst [smem:[#allocation9_spill]] %s6524_s4 }
   0x6   :  { %6552 = sst [smem:[#allocation10_spill]] %s6525_s5 }
   0x7   :  { %s6553_s26 = sld [smem:[#allocation10_spill]]  ;;  %vm95_vm0 = vcmask 1041408   ;;  %vm82_vm1 = vcmask 15360  }
   0x8   :  { %s6554_s28 = sld [smem:[#allocation6_spill]] }
   0xd   :  { %v74_v0 = vld [vmem:[%s6553_s26] sm:$0x3] }
   0xe   :  { %v70_v1 = vld [vmem:[%s6554_s28] sm:$0xff]  ;;  %v71_v2 = vld [vmem:[%s6554_s28 + $0x8] sm:$0xff]  ;;  %4731 = vmatprep.subr.msk.mxu0 %vm95_vm0, %v74_v0  ;;  %v72_v3 = vld [vmem:[%s6554_s28 + $0x10] sm:$0xff] }
   0xf   :  { %4733 = vmatprep.mubr.msk.f32.mxu0 %vm82_vm1, %v70_v1 }
  0x10   :  { %26 = vsyncpa [#allocation3], 0  ;;  %4732 = vmatpush3.msk.msra.mxu0 %vm95_vm0, %v74_v0  ;;  %v73_v4 = vld [vmem:[%s6554_s28 + $0x18] sm:$0xff]  ;;  %v221_v5 = vld [vmem:[%s6527_s7 + $0x10] sm:$0xf]  ;;  %vm242_vm2 = vcmask 1043456   ;;  %v184_v29 = vlaneseq }
  0x11   :  { %4734 = vmatmul.mubr.msk.f32.vlgmr.msra.gmra.mxu0 %vm82_vm1, %v71_v2  ;;  %v220_v6 = vld [vmem:[%s6527_s7 + $0x8] sm:$0xff]  ;;  %4739 = vmatprep.subr.msk.mxu1 %vm242_vm2, %v221_v5  ;;  %v219_v7 = vld [vmem:[%s6527_s7] sm:$0xff]  ;;  %vm229_vm4 = vcmask 162816   ;;  %v5407_v43 = vmov 0   ;;  %s6555_s28 = sld [smem:[#allocation7_spill]]  ;;  %v5408_v2 = vmov 1.0  }
  0x12   :  { %4736 = vmatprep.mubr.msk.f32.mxu0 %vm82_vm1, %v72_v3  ;;  %4740 = vmatpush3.msk.msra.mxu1 %vm242_vm2, %v221_v5  ;;  %v4417_v8 = vld [vmem:[%s6526_s6] ss:$0 sm:$0xff]  ;;  %v5567_v30 = vand.u32 127, %v184_v29  ;;  %s6556_s1 = sld [smem:[#allocation8_spill]]  ;;  %vm403_vm9 = vcmask 261120   ;;  %vm485_vm12 = vcmask 130048  }
  0x13   :  { %4741 = vmatprep.subr.mxu1 %v220_v6  ;;  %5173 = vset.pattern.permute.xlu0 %v5407_v43  ;;  %v4427_v47 = vld [vmem:[%s6528_s8] ss:$0 sm:$0xff]  ;;  %s5410_s25 = smov 127   ;;  %s6557_s3 = sld [smem:[#allocation5_spill]]  ;;  %vm5411_vm13 = vmmov 0   ;;  %vm896_vm0 = vcmask 64512  }
  0x14   :  { %4742 = vmatpush3.msra.mxu1 %v220_v6  ;;  %vm186_vm3 = vcmp.lt.s32.totalorder %v5567_v30, 4  ;;  %5174 = vset.pattern.permute.xlu1 %v5407_v43  ;;  %s5420_s26 = smov 48   ;;  %s5421_s27 = smov 123  }
  0x15   :  { %4737 = vmatmul.mubr.msk.f32.gmra.mxu0 %vm82_vm1, %v73_v4  ;;  %4743 = vmatprep.subr.mxu1 %v219_v7  ;;  %vm956_vm1 = vcmask 785408  }
  0x16   :  { %4744 = vmatpush3.msra.mxu1 %v219_v7 }
  0x17   :  { %v358_v44 = vld [vmem:[%s6555_s28 + $0x18] sm:$0xff]  ;;  %v356_v45 = vld [vmem:[%s6555_s28 + $0x8] sm:$0xff]  ;;  %v357_v46 = vld [vmem:[%s6555_s28 + $0x10] sm:$0xff] }
  0x18   :  { %373 = vperm.xlu0 %5173, %v358_v44   ;;  %367 = vperm.xlu1 %5174, %v356_v45  }
  0x19   :  { %v654_v44 = vld [vmem:[%s6557_s3 + $0x8] sm:$0xff] }
  0x1c   :  { %370 = vperm.xlu0 %5173, %v357_v46  }
  0x93   :  { %v374_v63 = vpop.permute.xlu0 %373  ;;  %v368_v3 = vpop.permute.xlu1 %367 }
  0x94   :  { %vm378_vm5 = vcmp.eq.s32.totalorder %v5567_v30, %v374_v63  ;;  %vm376_vm7 = vcmp.eq.s32.totalorder %v5567_v30, %v368_v3  ;;  %v5706_v3 = vmul.f32 0.1, %v654_v44 }
  0x95   :  { %4751 = vmatprep.subr.msk.mxu0 %vm378_vm5, %v5408_v2 }
  0x96   :  { %4752 = vmatpush3.msk.msra.mxu0 %vm378_vm5, %v5408_v2 }
  0x97   :  { %v371_v6 = vpop.permute.xlu0 %370 }
  0x98   :  { %vm377_vm6 = vcmp.eq.s32.totalorder %v5567_v30, %v371_v6 }
  0x99   :  { %4753 = vmatprep.subr.msk.mxu0 %vm377_vm6, %v5408_v2 }
  0x9a   :  { %4754 = vmatpush3.msk.msra.mxu0 %vm377_vm6, %v5408_v2 }
  0x9b   :  { %4755 = vmatprep.subr.msk.mxu0 %vm376_vm7, %v5408_v2 }
  0x9c   :  { %4756 = vmatpush3.msk.msra.mxu0 %vm376_vm7, %v5408_v2 }
  0xd1   :  { %v4735_v9 = vpop.f32.mrf.mxu0 }
  0xd2   :  { %v171_v10 = vadd.f32 %v4735_v9, %v4417_v8  ;;  %v4441_v9 = vld [vmem:[%s6556_s1] ss:$0 sm:$0xff] }
  0xd3   :  { %v165_v11 = vpop.f32.mrf.mxu0 }
  0xd4   :  { %v4424_v12 = vmul.f32 -1.442695, %v171_v10  ;;  %v166_v13 = vadd.f32 %v4417_v8, %v165_v11  ;;  %v212_v34 = vmax.f32 %v171_v10, 0.0 }
  0xd5   :  { %v4738_v14 = vpop.f32.mrf.mxu0 }
  0xd6   :  { %5243 = vpow2.f32 %v4424_v12  ;;  %v4423_v15 = vmul.f32 -1.442695, %v166_v13  ;;  %v181_v16 = vadd.f32 %v4738_v14, %v4417_v8  ;;  %v211_v32 = vmax.f32 %v166_v13, 0.0  ;;  %v355_v12 = vld [vmem:[%s6555_s28] sm:$0xff] }
  0xd7   :  { %v175_v17 = vpop.f32.mrf.mxu0  ;;  %v5409_v13 = vmov 0.0  }
  0xd8   :  { %5245 = vpow2.f32 %v4423_v15  ;;  %v4426_v18 = vmul.f32 -1.442695, %v181_v16  ;;  %v176_v19 = vadd.f32 %v4417_v8, %v175_v17  ;;  %v214_v40 = vmax.f32 %v181_v16, 0.0 }
  0xd9   :  { %v5612_v8 = vshrl.u32 %v184_v29, 7 }
  0xda   :  { %5247 = vpow2.f32 %v4426_v18  ;;  %v4425_v20 = vmul.f32 -1.442695, %v176_v19  ;;  %v213_v38 = vmax.f32 %v176_v19, 0.0  ;;  %v5634_v18 = vsel %vm378_vm5, 1.0, %v5409_v13 }
  0xdb   :  { %vm391_vm8 = vcmp.eq.s32.totalorder %v5612_v8, %v4441_v9  ;;  %v5629_v17 = vadd.s32 8, %v5612_v8  ;;  %vm397_vm14 = vcmp.eq.s32.totalorder %v5612_v8, %v5567_v30 }
  0xdc   :  { %5249 = vpow2.f32 %v4425_v20  ;;  %v5622_v14 = vsel %vm391_vm8, 1.0, %v5409_v13 }
  0xdd   :  { %4759 = vmatprep.mubr.msk.f32.mxu0 %vm403_vm9, %v5622_v14  ;;  %vm392_vm10 = vcmp.eq.s32.totalorder %v5629_v17, %v4441_v9  ;;  %vm398_vm15 = vcmp.eq.s32.totalorder %v5629_v17, %v5567_v30 }
  0xe3   :  { %v5244_v21 = vpop.eup %5243 }
  0xe4   :  { %v200_v22 = vadd.f32 1.0, %v5244_v21  ;;  %v5640_v21 = vsel %vm377_vm6, 1.0, %v5409_v13 }
  0xe5   :  { %v5246_v23 = vpop.eup %5245 }
  0xe6   :  { %v199_v24 = vadd.f32 1.0, %v5246_v23  ;;  %5251 = vrcp.f32 %v200_v22 }
  0xe7   :  { %v5248_v25 = vpop.eup %5247 }
  0xe8   :  { %5253 = vrcp.f32 %v199_v24  ;;  %v202_v26 = vadd.f32 1.0, %v5248_v25  ;;  %v5648_v25 = vsel %vm376_vm7, 1.0, %v5409_v13 }
  0xe9   :  { %v5250_v27 = vpop.eup %5249 }
  0xea   :  { %v201_v28 = vadd.f32 1.0, %v5250_v27  ;;  %5255 = vrcp.f32 %v202_v26  ;;  %v5651_v27 = vsel %vm392_vm10, 1.0, %v5409_v13 }
  0xec   :  { %5257 = vrcp.f32 %v201_v28 }
  0xf3   :  { %v5252_v31 = vpop.eup %5251 }
  0xf4   :  { %v216_v36 = vsel %vm186_vm3, %v5252_v31, %v212_v34 }
  0xf5   :  { %v5254_v33 = vpop.eup %5253 }
  0xf6   :  { %v215_v35 = vsel %vm186_vm3, %v5254_v33, %v211_v32 }
  0xf7   :  { %4745 = vmatprep.mubr.msk.f32.mxu1 %vm229_vm4, %v215_v35  ;;  %v5256_v37 = vpop.eup %5255 }
  0xf8   :  { %4746 = vmatmul.mubr.msk.f32.vlgmr.msra.gmra.mxu1 %vm229_vm4, %v216_v36  ;;  %v218_v42 = vsel %vm186_vm3, %v5256_v37, %v214_v40 }
  0xf9   :  { %v5258_v39 = vpop.eup %5257 }
  0xfa   :  { %v217_v41 = vsel %vm186_vm3, %v5258_v39, %v213_v38  ;;  %vm1170_vm3 = vcmask 31744  }
  0xfb   :  { %4748 = vmatprep.mubr.msk.f32.mxu1 %vm229_vm4, %v217_v41 }
  0xfc   :  { %4749 = vmatmul.mubr.msk.f32.gmra.mxu1 %vm229_vm4, %v218_v42  ;;  %v653_v42 = vld [vmem:[%s6557_s3] sm:$0xff]  ;;  %s5422_s3 = smov 64  }
  0xfd   :  { %4770 = vmatprep.mubr.msk.f32.mxu1 %vm403_vm9, %v5622_v14  ;;  %v656_v45 = vpack.c.bf16 %v654_v44, %v653_v42 }
 0x1b8   :  { %v4747_v48 = vpop.f32.mrf.mxu1 }
 0x1b9   :  { %v5584_v49 = vadd.f32 %v4747_v48, %v4427_v47  ;;  %v5689_v48 = vsel %vm398_vm15, 1.0, %v5409_v13 }
 0x1ba   :  { %v312_v50 = vpop.f32.mrf.mxu1 }
 0x1bb   :  { %v5586_v52 = vadd.f32 %v4427_v47, %v312_v50  ;;  %v4434_v54 = vmul.f32 -1.442695, %v5584_v49  ;;  %v5692_v50 = vsel %vm397_vm14, 1.0, %v5409_v13 }
 0x1bc   :  { %v4750_v51 = vpop.f32.mrf.mxu1 }
 0x1bd   :  { %v5588_v53 = vadd.f32 %v4750_v51, %v4427_v47  ;;  %v4433_v58 = vmul.f32 -1.442695, %v5586_v52 }
 0x1be   :  { %v322_v55 = vpop.f32.mrf.mxu1 }
 0x1bf   :  { %v4436_v56 = vmul.f32 -1.442695, %v5588_v53  ;;  %v5592_v57 = vadd.f32 %v4427_v47, %v322_v55  ;;  %v5686_v47 = vsub.s32 0, %v5612_v8 }
 0x1c1   :  { %5259 = vpow2.f32 %v4436_v56  ;;  %v4435_v59 = vmul.f32 -1.442695, %v5592_v57 }
 0x1c2   :  { %5261 = vpow2.f32 %v4434_v54 }
 0x1c3   :  { %5263 = vpow2.f32 %v4435_v59 }
 0x1c4   :  { %5265 = vpow2.f32 %v4433_v58 }
 0x1ce   :  { %v5260_v60 = vpop.eup %5259 }
 0x1cf   :  { %v5262_v61 = vpop.eup %5261  ;;  %v346_v62 = vadd.f32 1.0, %v5260_v60 }
 0x1d0   :  { %v5264_v0 = vpop.eup %5263  ;;  %v344_v5 = vadd.f32 1.0, %v5262_v61 }
 0x1d1   :  { %5267 = vrcp.f32 %v346_v62  ;;  %v345_v1 = vadd.f32 1.0, %v5264_v0  ;;  %v5266_v4 = vpop.eup %5265 }
 0x1d2   :  { %v343_v7 = vadd.f32 1.0, %v5266_v4 }
 0x1d3   :  { %5269 = vrcp.f32 %v345_v1 }
 0x1d4   :  { %5271 = vrcp.f32 %v344_v5 }
 0x1d5   :  { %5273 = vrcp.f32 %v343_v7 }
 0x1de   :  { %v5268_v10 = vpop.eup %5267 }
 0x1df   :  { %519 = vperm.xlu1 %5174, %v5268_v10  }
 0x1e0   :  { %v5270_v11 = vpop.eup %5269 }
 0x1e1   :  { %514 = vperm.xlu0 %5173, %v5270_v11   ;;  %v5272_v15 = vpop.eup %5271 }
 0x1e2   :  { %v5274_v16 = vpop.eup %5273 }
 0x1e3   :  { %364 = vperm.xlu1 %5174, %v355_v12  }
 0x1e5   :  { %509 = vperm.xlu0 %5173, %v5272_v15  }
 0x1e7   :  { %504 = vperm.xlu1 %5174, %v5274_v16  }
 0x25a   :  { %v520_v19 = vpop.permute.xlu1 %519 }
 0x25b   :  { %v525_v20 = vmul.f32 %v5634_v18, %v520_v19 }
 0x25c   :  { %v515_v22 = vpop.permute.xlu0 %514 }
 0x25d   :  { %v524_v23 = vmul.f32 %v5640_v21, %v515_v22  ;;  %4762 = vmatprep.subr.mxu1 %v525_v20 }
 0x25e   :  { %4763 = vmatpush3.msra.mxu1 %v525_v20  ;;  %v365_v24 = vpop.permute.xlu1 %364 }
 0x25f   :  { %vm375_vm11 = vcmp.eq.s32.totalorder %v5567_v30, %v365_v24  ;;  %4764 = vmatprep.subr.mxu1 %v524_v23 }
 0x260   :  { %4757 = vmatprep.subr.msk.mxu0 %vm375_vm11, %v5408_v2  ;;  %4765 = vmatpush3.msra.mxu1 %v524_v23  ;;  %v510_v26 = vpop.permute.xlu0 %509  ;;  %v5655_v29 = vsel %vm375_vm11, 1.0, %v5409_v13 }
 0x261   :  { %v523_v28 = vmul.f32 %v5648_v25, %v510_v26  ;;  %4758 = vmatpush3.msk.msra.mxu0 %vm375_vm11, %v5408_v2  ;;  %v5704_v2 = vmul.f32 0.1, %v653_v42 }
 0x262   :  { %v505_v31 = vpop.permute.xlu1 %504  ;;  %4760 = vmatmul.mubr.msk.f32.vlgmr.msra.gmra.mxu0 %vm403_vm9, %v5651_v27  ;;  %4773 = vmatprep.subr.bf16.mxu0 %v5409_v13 }
 0x263   :  { %v522_v32 = vmul.f32 %v5655_v29, %v505_v31  ;;  %4766 = vmatprep.subr.mxu1 %v523_v28  ;;  %4774 = vmatpush3.bf16.msra.mxu0 %v656_v45 }
 0x264   :  { %4767 = vmatpush3.msra.mxu1 %v523_v28  ;;  %4785 = vmatprep.subr.bf16.mxu0 %v5409_v13 }
 0x265   :  { %4768 = vmatprep.subr.mxu1 %v522_v32  ;;  %4775 = vmatprep.mubr.msk.bf16.mxu0 %vm5411_vm13, %v5409_v13 }
 0x266   :  { %4769 = vmatpush3.msra.mxu1 %v522_v32 }
 0x267   :  { %4771 = vmatmul.mubr.msk.f32.vlgmr.msra.gmra.mxu1 %vm403_vm9, %v5651_v27  ;;  %4779 = vmatprep.subr.bf16.mxu1 %v5409_v13 }
 0x268   :  { %4781 = vmatprep.mubr.msk.bf16.mxu1 %vm5411_vm13, %v5409_v13 }
 0x322   :  { %v5700_v62 = vpop.f32.mrf.mxu0 }
 0x324   :  { %v5702_v63 = vpop.f32.mrf.mxu0 }
 0x327   :  { %v4772_v33 = vpop.f32.mrf.mxu1 }
 0x328   :  { %v604_v34 = vsel %vm485_vm12, %v4772_v33, 0.0  ;;  %v612_v55 = vadd.f32 %v4772_v33, %v5689_v48 }
 0x329   :  { %605 = vadd.xlane.f32.xlu1 %v604_v34  ;;  %v592_v35 = vpop.f32.mrf.mxu1 }
 0x32a   :  { %v601_v36 = vsel %vm485_vm12, %v592_v35, 0.0  ;;  %v611_v56 = vadd.f32 %v5692_v50, %v592_v35 }
 0x32b   :  { %602 = vadd.xlane.f32.xlu0 %v601_v36 }
 0x33a   :  { %1162 = vrot.lane.b32.xlu1 %v5586_v52, %s5410_s25 }
 0x33e   :  { %1164 = vrot.lane.b32.xlu1 %v5584_v49, %s5410_s25 }
 0x342   :  { %1166 = vrot.lane.b32.xlu1 %v5592_v57, %s5410_s25 }
 0x346   :  { %1168 = vrot.lane.b32.xlu1 %v5588_v53, %s5410_s25 }
 0x3b2   :  { %v606_v37 = vpop.xlane.xlu1 %605 }
 0x3b3   :  { %v608_v40 = vadd.f32 1.0, %v606_v37 }
 0x3b4   :  { %v603_v38 = vpop.xlane.xlu0 %602 }
 0x3b5   :  { %v607_v39 = vadd.f32 1.0, %v603_v38 }
 0x3b7   :  { %5275 = vrsqrt.f32 %v607_v39 }
 0x3b8   :  { %5277 = vrsqrt.f32 %v608_v40 }
 0x3c4   :  { %v5276_v41 = vpop.eup %5275 }
 0x3c5   :  { %613 = vxpose.xlu0.b32.start [1/2] (short) (narrow) %v5276_v41, 8  ;;  %v5278_v46 = vpop.eup %5277 }
 0x3c9   :  { %614 = vxpose.xlu0.b32.end [2/2] (short) (narrow) %v5278_v46, 8 }
 0x441   :  { %v629_v51 = vpop.trf.xlu0 }
 0x442   :  { %v648_v54 = vrot.slane %v629_v51, %v5686_v47 }
 0x444   :  { %v649_v58 = vmul.f32 %v5276_v41, %v648_v54  ;;  %v650_v59 = vmul.f32 %v5278_v46, %v648_v54  ;;  %v893_v54 = vld [vmem:[%s6529_s9] sm:$0xff]  ;;  %s6560_s9 = sld [smem:[#allocation9_spill]] }
 0x446   :  { %v651_v60 = vmul.f32 %v649_v58, %v611_v56  ;;  %v652_v30 = vmul.f32 %v650_v59, %v612_v55  ;;  %v895_v55 = vpack.c.bf16 %v893_v54, %v893_v54  ;;  %v955_v58 = vld [vmem:[%s6530_s10 + $0x58] sm:$0xff] }
 0x447   :  { %v1049_v59 = vld [vmem:[%s6531_s11 + $0x58] sm:$0xff] }
 0x448   :  { %v655_v61 = vpack.c.bf16 %v652_v30, %v651_v60  ;;  %v901_v56 = vsel %vm242_vm2, %v895_v55, 0  ;;  %v954_v60 = vld [vmem:[%s6530_s10 + $0x50] sm:$0xff]  ;;  %v953_v30 = vld [vmem:[%s6530_s10 + $0x48] sm:$0xff] }
 0x44a   :  { %4776 = vmatmul.mubr.msk.bf16.vlgmr.msra.gmra.mxu0 %vm485_vm12, %v655_v61 }
 0x44b   :  { %4787 = vmatprep.mubr.msk.bf16.mxu0 %vm5411_vm13, %v5409_v13 }
 0x50a   :  { %v694_v0 = vpop.f32.mrf.mxu0 }
 0x50b   :  { %v701_v4 = vmul.f32 0.9, %v694_v0  ;;  %v951_v0 = vld [vmem:[%s6530_s10 + $0x38] sm:$0xff] }
 0x50c   :  { %v4777_v1 = vpop.f32.mrf.mxu0 }
 0x50d   :  { %v705_v9 = vadd.f32 %v5704_v2, %v701_v4  ;;  %v950_v1 = vld [vmem:[%s6530_s10 + $0x30] sm:$0xff]  ;;  %v949_v4 = vld [vmem:[%s6530_s10 + $0x28] sm:$0xff] }
 0x50e   :  { %v697_v5 = vpop.f32.mrf.mxu0 }
 0x50f   :  { %v702_v6 = vmul.f32 0.9, %v697_v5  ;;  %v948_v5 = vld [vmem:[%s6530_s10 + $0x20] sm:$0xff] }
 0x510   :  { %v4778_v7 = vpop.f32.mrf.mxu0 }
 0x511   :  { %v706_v10 = vadd.f32 %v5706_v3, %v702_v6  ;;  %v947_v6 = vld [vmem:[%s6530_s10 + $0x18] sm:$0xff]  ;;  %v946_v7 = vld [vmem:[%s6530_s10 + $0x10] sm:$0xff] }
 0x513   :  { %v707_v11 = vpack.c.bf16 %v706_v10, %v705_v9 }
 0x515   :  { %4780 = vmatpush3.bf16.msra.mxu1 %v707_v11 }
 0x516   :  { %4791 = vmatprep.subr.bf16.mxu1 %v5409_v13 }
 0x518   :  { %4782 = vmatmul.mubr.msk.bf16.vlgmr.msra.gmra.mxu1 %vm485_vm12, %v655_v61 }
 0x519   :  { %4793 = vmatprep.mubr.msk.bf16.mxu1 %vm5411_vm13, %v5409_v13 }
 0x5d8   :  { %v742_v12 = vpop.f32.mrf.mxu1 }
 0x5d9   :  { %v749_v16 = vmul.f32 0.9, %v742_v12 }
 0x5da   :  { %v4783_v15 = vpop.f32.mrf.mxu1 }
 0x5db   :  { %v751_v22 = vadd.f32 %v749_v16, %v5704_v2 }
 0x5dc   :  { %v745_v17 = vpop.f32.mrf.mxu1 }
 0x5dd   :  { %v750_v19 = vmul.f32 0.9, %v745_v17 }
 0x5de   :  { %v4784_v20 = vpop.f32.mrf.mxu1 }
 0x5df   :  { %v752_v23 = vadd.f32 %v750_v19, %v5706_v3 }
 0x5e1   :  { %v753_v24 = vpack.c.bf16 %v752_v23, %v751_v22 }
 0x5e3   :  { %4786 = vmatpush3.bf16.msra.mxu0 %v753_v24  ;;  %v1048_v24 = vld [vmem:[%s6531_s11 + $0x50] sm:$0xff] }
 0x5e4   :  { %4797 = vmatprep.subr.bf16.mxu0 %v5409_v13 }
 0x5e6   :  { %4788 = vmatmul.mubr.msk.bf16.vlgmr.msra.gmra.mxu0 %vm485_vm12, %v655_v61 }
 0x5e7   :  { %4799 = vmatprep.mubr.msk.bf16.mxu0 %vm5411_vm13, %v5409_v13 }
 0x6a6   :  { %v788_v26 = vpop.f32.mrf.mxu0 }
 0x6a7   :  { %v795_v31 = vmul.f32 0.9, %v788_v26  ;;  %v1047_v26 = vld [vmem:[%s6531_s11 + $0x48] sm:$0xff] }
 0x6a8   :  { %v4789_v28 = vpop.f32.mrf.mxu0 }
 0x6a9   :  { %v797_v35 = vadd.f32 %v795_v31, %v5704_v2  ;;  %v1044_v28 = vld [vmem:[%s6531_s11 + $0x30] sm:$0xff]  ;;  %v1043_v31 = vld [vmem:[%s6531_s11 + $0x28] sm:$0xff] }
 0x6aa   :  { %v791_v32 = vpop.f32.mrf.mxu0 }
 0x6ab   :  { %v796_v33 = vmul.f32 0.9, %v791_v32  ;;  %v1042_v32 = vld [vmem:[%s6531_s11 + $0x20] sm:$0xff] }
 0x6ac   :  { %v4790_v34 = vpop.f32.mrf.mxu0 }
 0x6ad   :  { %v798_v36 = vadd.f32 %v796_v33, %v5706_v3  ;;  %v1041_v33 = vld [vmem:[%s6531_s11 + $0x18] sm:$0xff]  ;;  %v1040_v34 = vld [vmem:[%s6531_s11 + $0x10] sm:$0xff] }
 0x6af   :  { %v799_v37 = vpack.c.bf16 %v798_v36, %v797_v35  ;;  %v945_v35 = vld [vmem:[%s6530_s10 + $0x8] sm:$0xff] }
 0x6b0   :  { %v1039_v36 = vld [vmem:[%s6531_s11 + $0x8] sm:$0xff] }
 0x6b1   :  { %4792 = vmatpush3.bf16.msra.mxu1 %v799_v37  ;;  %v944_v37 = vld [vmem:[%s6530_s10] sm:$0xff] }
 0x6b2   :  { %4803 = vmatprep.subr.bf16.mxu1 %v5409_v13 }
 0x6b4   :  { %4794 = vmatmul.mubr.msk.bf16.vlgmr.msra.gmra.mxu1 %vm485_vm12, %v655_v61 }
 0x6b5   :  { %4805 = vmatprep.mubr.msk.bf16.mxu1 %vm5411_vm13, %v5409_v13  ;;  %4804 = vmatpush3.bf16.msra.mxu1 %v901_v56  ;;  %v5412_v56 = vmov 1  }
 0x6b6   :  { %4836 = vmatprep.subr.mxu1 %v1049_v59  ;;  %5175 = vset.pattern.permute.xlu0 %v5412_v56 }
 0x774   :  { %v834_v38 = vpop.f32.mrf.mxu1 }
 0x775   :  { %v841_v40 = vmul.f32 0.9, %v834_v38  ;;  %v1038_v38 = vld [vmem:[%s6531_s11] sm:$0xff] }
 0x776   :  { %v4795_v39 = vpop.f32.mrf.mxu1 }
 0x777   :  { %v843_v45 = vadd.f32 %v841_v40, %v5704_v2  ;;  %v1157_v39 = vld [vmem:[%s6532_s12] sm:$0xf]  ;;  %v1163_v40 = vpop.permute.xlu1 %1162  ;;  %s5419_s12 = smov 80  }
 0x778   :  { %v837_v41 = vpop.f32.mrf.mxu1 }
 0x779   :  { %v842_v42 = vmul.f32 0.9, %v837_v41 }
 0x77a   :  { %v4796_v44 = vpop.f32.mrf.mxu1 }
 0x77b   :  { %v844_v46 = vadd.f32 %v842_v42, %v5706_v3  ;;  %v1165_v41 = vpop.permute.xlu1 %1164 }
 0x77d   :  { %v845_v51 = vpack.c.bf16 %v844_v46, %v843_v45 }
 0x77f   :  { %4798 = vmatpush3.bf16.msra.mxu0 %v845_v51  ;;  %v1167_v51 = vpop.permute.xlu1 %1166 }
 0x780   :  { %4809 = vmatprep.subr.mxu0 %v955_v58 }
 0x782   :  { %4800 = vmatmul.mubr.msk.bf16.vlgmr.msra.gmra.mxu0 %vm485_vm12, %v655_v61  ;;  %v952_v61 = vld [vmem:[%s6530_s10 + $0x40] sm:$0xff]  ;;  %s5415_s10 = smov 112  }
 0x783   :  { %4810 = vmatpush3.msra.mxu0 %v955_v58  ;;  %v1169_v55 = vpop.permute.xlu1 %1168 }
 0x784   :  { %4811 = vmatprep.subr.mxu0 %v954_v60 }
 0x785   :  { %4812 = vmatpush3.msra.mxu0 %v954_v60 }
 0x786   :  { %4813 = vmatprep.subr.mxu0 %v953_v30 }
 0x787   :  { %4814 = vmatpush3.msra.mxu0 %v953_v30 }
 0x788   :  { %4815 = vmatprep.subr.mxu0 %v952_v61 }
 0x789   :  { %4816 = vmatpush3.msra.mxu0 %v952_v61 }
 0x78a   :  { %4817 = vmatprep.subr.mxu0 %v951_v0 }
 0x78b   :  { %4818 = vmatpush3.msra.mxu0 %v951_v0 }
 0x78c   :  { %4819 = vmatprep.subr.mxu0 %v950_v1 }
 0x78d   :  { %4820 = vmatpush3.msra.mxu0 %v950_v1  ;;  %v489_v1 = vsel %vm485_vm12, %v5700_v62, 0.0 }
 0x78e   :  { %4821 = vmatprep.subr.mxu0 %v949_v4 }
 0x78f   :  { %4822 = vmatpush3.msra.mxu0 %v949_v4  ;;  %v486_v4 = vsel %vm485_vm12, %v5702_v63, 0.0 }
 0x790   :  { %4823 = vmatprep.subr.mxu0 %v948_v5 }
 0x791   :  { %4824 = vmatpush3.msra.mxu0 %v948_v5 }
 0x792   :  { %4825 = vmatprep.subr.mxu0 %v947_v6 }
 0x793   :  { %4826 = vmatpush3.msra.mxu0 %v947_v6 }
 0x794   :  { %4827 = vmatprep.subr.mxu0 %v946_v7 }
 0x795   :  { %4828 = vmatpush3.msra.mxu0 %v946_v7 }
 0x796   :  { %4829 = vmatprep.subr.mxu0 %v945_v35 }
 0x797   :  { %4830 = vmatpush3.msra.mxu0 %v945_v35 }
 0x798   :  { %4831 = vmatprep.subr.mxu0 %v944_v37 }
 0x799   :  { %4832 = vmatpush3.msra.mxu0 %v944_v37 }
 0x79a   :  { %4863 = vmatprep.subr.msk.mxu0 %vm242_vm2, %v1157_v39 }
 0x842   :  { %v880_v9 = vpop.f32.mrf.mxu0 }
 0x843   :  { %v887_v10 = vmul.f32 0.9, %v880_v9 }
 0x844   :  { %v4801_v11 = vpop.f32.mrf.mxu0 }
 0x845   :  { %v889_v15 = vadd.f32 %v887_v10, %v5704_v2  ;;  %v1046_v2 = vld [vmem:[%s6531_s11 + $0x40] sm:$0xff] }
 0x846   :  { %v883_v12 = vpop.f32.mrf.mxu0 }
 0x847   :  { %v888_v16 = vmul.f32 0.9, %v883_v12  ;;  %v891_v20 = vmax.f32 %v889_v15, 0.0 }
 0x848   :  { %v4802_v17 = vpop.f32.mrf.mxu0 }
 0x849   :  { %v890_v19 = vadd.f32 %v888_v16, %v5706_v3  ;;  %v1045_v3 = vld [vmem:[%s6531_s11 + $0x38] sm:$0xff]  ;;  %s5418_s11 = smov 96  }
 0x84b   :  { %v892_v22 = vmax.f32 %v890_v19, 0.0 }
 0x84d   :  { %v894_v23 = vpack.c.bf16 %v892_v22, %v891_v20 }
 0x84f   :  { %4806 = vmatmul.mubr.msk.bf16.vlgmr.msra.gmra.mxu1 %vm896_vm0, %v894_v23 }
 0x850   :  { %4837 = vmatpush3.msra.mxu1 %v1049_v59 }
 0x851   :  { %4838 = vmatprep.subr.mxu1 %v1048_v24 }
 0x852   :  { %4839 = vmatpush3.msra.mxu1 %v1048_v24 }
 0x853   :  { %4840 = vmatprep.subr.mxu1 %v1047_v26 }
 0x854   :  { %4841 = vmatpush3.msra.mxu1 %v1047_v26 }
 0x855   :  { %4842 = vmatprep.subr.mxu1 %v1046_v2 }
 0x856   :  { %4843 = vmatpush3.msra.mxu1 %v1046_v2 }
 0x857   :  { %4844 = vmatprep.subr.mxu1 %v1045_v3 }
 0x858   :  { %4845 = vmatpush3.msra.mxu1 %v1045_v3 }
 0x859   :  { %4846 = vmatprep.subr.mxu1 %v1044_v28 }
 0x85a   :  { %4847 = vmatpush3.msra.mxu1 %v1044_v28 }
 0x85b   :  { %4848 = vmatprep.subr.mxu1 %v1043_v31 }
 0x85c   :  { %4849 = vmatpush3.msra.mxu1 %v1043_v31 }
 0x85d   :  { %4850 = vmatprep.subr.mxu1 %v1042_v32 }
 0x85e   :  { %4851 = vmatpush3.msra.mxu1 %v1042_v32 }
 0x85f   :  { %4852 = vmatprep.subr.mxu1 %v1041_v33 }
 0x860   :  { %4853 = vmatpush3.msra.mxu1 %v1041_v33 }
 0x861   :  { %4854 = vmatprep.subr.mxu1 %v1040_v34 }
 0x862   :  { %4855 = vmatpush3.msra.mxu1 %v1040_v34 }
 0x863   :  { %4856 = vmatprep.subr.mxu1 %v1039_v36 }
 0x864   :  { %4857 = vmatpush3.msra.mxu1 %v1039_v36 }
 0x865   :  { %4858 = vmatprep.subr.mxu1 %v1038_v38 }
 0x866   :  { %4859 = vmatpush3.msra.mxu1 %v1038_v38 }
 0x90f   :  { %v937_v42 = vpop.f32.mrf.mxu1 }
 0x910   :  { %4833 = vmatprep.mubr.msk.f32.mxu0 %vm956_vm1, %v937_v42  ;;  %4860 = vmatprep.mubr.msk.f32.mxu1 %vm956_vm1, %v937_v42 }
 0x911   :  { %v4807_v44 = vpop.f32.mrf.mxu1 }
 0x913   :  { %v940_v45 = vpop.f32.mrf.mxu1 }
 0x914   :  { %v5812_v46 = vpack.c.bf16 %v940_v45, %v937_v42  ;;  %4834 = vmatmul.mubr.msk.f32.vlgmr.msra.gmra.mxu0 %vm956_vm1, %v940_v45  ;;  %4861 = vmatmul.mubr.msk.f32.vlgmr.msra.gmra.mxu1 %vm956_vm1, %v940_v45 }
 0x915   :  { %v4808_v54 = vpop.f32.mrf.mxu1  ;;  %4865 = vmatprep.mubr.msk.f32.mxu0 %vm1170_vm3, %v1163_v40  ;;  %4864 = vmatpush3.msk.msra.mxu0 %vm242_vm2, %v1157_v39  ;;  %v5413_v40 = vmov 2  }
 0x916   :  { %4890 = vmatprep.mubr.msk.f32.mxu1 %vm403_vm9, %v5622_v14 }
 0x918   :  { %4866 = vmatmul.mubr.msk.f32.vlgmr.msra.gmra.mxu0 %vm1170_vm3, %v1165_v41 }
 0x919   :  { %4868 = vmatprep.mubr.msk.f32.mxu0 %vm1170_vm3, %v1167_v51 }
 0x91c   :  { %4869 = vmatmul.mubr.msk.f32.gmra.mxu0 %vm1170_vm3, %v1169_v55 }
 0x91d   :  { %4879 = vmatprep.mubr.msk.f32.mxu0 %vm403_vm9, %v5622_v14 }
 0x9d4   :  { %v5824_v58 = vpop.f32.mrf.mxu0  ;;  %v5890_v34 = vpop.f32.mrf.mxu1 }
 0x9d6   :  { %v5826_v59 = vpop.f32.mrf.mxu0  ;;  %v5894_v36 = vpop.f32.mrf.mxu1 }
 0x9d8   :  { %v5828_v60 = vpop.f32.mrf.mxu0 }
 0x9d9   :  { %1351 = vperm.xlu1 %5174, %v5828_v60   ;;  %1510 = vperm.xlu0 %5175, %v5828_v60  }
 0x9da   :  { %v5832_v30 = vpop.f32.mrf.mxu0 }
 0x9dc   :  { %v5834_v61 = vpop.f32.mrf.mxu0 }
 0x9dd   :  { %5176 = vset.pattern.permute.xlu1 %v5412_v56  ;;  %4871 = vmatprep.subr.mxu0 %v5834_v61 }
 0x9de   :  { %1506 = vperm.xlu1 %5176, %v5832_v30   ;;  %v5839_v0 = vpop.f32.mrf.mxu0  ;;  %4872 = vmatpush3.msra.mxu0 %v5834_v61 }
 0x9df   :  { %4873 = vmatprep.subr.mxu0 %v5839_v0  ;;  %5181 = vset.pattern.permute.xlu0 %v5407_v43 }
 0x9e0   :  { %4874 = vmatpush3.msra.mxu0 %v5839_v0 }
 0x9e1   :  { %4875 = vmatprep.subr.mxu0 %v5828_v60 }
 0x9e2   :  { %1518 = vperm.xlu1 %5176, %v5834_v61   ;;  %4876 = vmatpush3.msra.mxu0 %v5828_v60 }
 0x9e3   :  { %4877 = vmatprep.subr.mxu0 %v5832_v30 }
 0x9e4   :  { %4878 = vmatpush3.msra.mxu0 %v5832_v30 }
 0x9e5   :  { %4880 = vmatmul.mubr.msk.f32.vlgmr.msra.gmra.mxu0 %vm403_vm9, %v5651_v27 }
 0x9e6   :  { %5177 = vset.pattern.permute.xlu1 %v5407_v43  ;;  %4901 = vmatprep.mubr.msk.f32.mxu0 %vm403_vm9, %v5622_v14 }
 0x9e7   :  { %1361 = vperm.xlu1 %5177, %v5834_v61  }
 0x9eb   :  { %5178 = vset.pattern.permute.xlu1 %v5412_v56 }
 0x9ec   :  { %1514 = vperm.xlu1 %5178, %v5839_v0  }
 0x9f0   :  { %5179 = vset.pattern.permute.xlu1 %v5407_v43 }
 0x9f1   :  { %1356 = vperm.xlu1 %5179, %v5839_v0  }
 0x9f5   :  { %1346 = vperm.xlu1 %5179, %v5832_v30  }
 0x9f8   :  { %490 = vadd.xlane.f32.xlu0 %v489_v1 }
 0x9f9   :  { %5180 = vset.pattern.permute.xlu1 %v5412_v56 }
 0xa19   :  { %487 = vadd.xlane.f32.xlu1 %v486_v4 }
 0xa54   :  { %v1352_v5 = vpop.permute.xlu1 %1351  ;;  %v1511_v12 = vpop.permute.xlu0 %1510 }
 0xa55   :  { %v1522_v17 = vmul.f32 %v5648_v25, %v1511_v12  ;;  %v1365_v23 = vmul.f32 %v5648_v25, %v1352_v5 }
 0xa59   :  { %v1507_v6 = vpop.permute.xlu1 %1506 }
 0xa5a   :  { %v1521_v19 = vmul.f32 %v5655_v29, %v1507_v6  ;;  %v1620_v6 = vsub.s32 1, %v5612_v8 }
 0xa5d   :  { %v1519_v7 = vpop.permute.xlu1 %1518 }
 0xa5e   :  { %v1524_v9 = vmul.f32 %v5634_v18, %v1519_v7 }
 0xa60   :  { %4893 = vmatprep.subr.mxu0 %v1524_v9 }
 0xa61   :  { %4894 = vmatpush3.msra.mxu0 %v1524_v9 }
 0xa62   :  { %v1362_v10 = vpop.permute.xlu1 %1361 }
 0xa63   :  { %v1367_v11 = vmul.f32 %v5634_v18, %v1362_v10 }
 0xa65   :  { %4882 = vmatprep.subr.mxu1 %v1367_v11 }
 0xa66   :  { %4883 = vmatpush3.msra.mxu1 %v1367_v11 }
 0xa67   :  { %v1515_v15 = vpop.permute.xlu1 %1514 }
 0xa68   :  { %v1523_v16 = vmul.f32 %v5640_v21, %v1515_v15 }
 0xa6a   :  { %4895 = vmatprep.subr.mxu0 %v1523_v16 }
 0xa6b   :  { %4896 = vmatpush3.msra.mxu0 %v1523_v16 }
 0xa6c   :  { %v1357_v20 = vpop.permute.xlu1 %1356  ;;  %4897 = vmatprep.subr.mxu0 %v1522_v17 }
 0xa6d   :  { %v1366_v22 = vmul.f32 %v5640_v21, %v1357_v20  ;;  %4898 = vmatpush3.msra.mxu0 %v1522_v17 }
 0xa6e   :  { %4899 = vmatprep.subr.mxu0 %v1521_v19 }
 0xa6f   :  { %4884 = vmatprep.subr.mxu1 %v1366_v22  ;;  %4900 = vmatpush3.msra.mxu0 %v1521_v19 }
 0xa70   :  { %4885 = vmatpush3.msra.mxu1 %v1366_v22  ;;  %v1347_v24 = vpop.permute.xlu1 %1346  ;;  %4902 = vmatmul.mubr.msk.f32.vlgmr.msra.gmra.mxu0 %vm403_vm9, %v5651_v27 }
 0xa71   :  { %v1364_v26 = vmul.f32 %v5655_v29, %v1347_v24  ;;  %4910 = vmatprep.subr.bf16.mxu0 %v5409_v13  ;;  %4886 = vmatprep.subr.mxu1 %v1365_v23 }
 0xa72   :  { %4911 = vmatpush3.bf16.msra.mxu0 %v5812_v46  ;;  %4887 = vmatpush3.msra.mxu1 %v1365_v23 }
 0xa73   :  { %4888 = vmatprep.subr.mxu1 %v1364_v26  ;;  %4912 = vmatprep.mubr.msk.bf16.mxu0 %vm5411_vm13, %v5409_v13 }
 0xa74   :  { %4889 = vmatpush3.msra.mxu1 %v1364_v26 }
 0xa75   :  { %4891 = vmatmul.mubr.msk.f32.vlgmr.msra.gmra.mxu1 %vm403_vm9, %v5651_v27  ;;  %4904 = vmatprep.subr.bf16.mxu1 %v5409_v13 }
 0xa76   :  { %4906 = vmatprep.mubr.msk.bf16.mxu1 %vm5411_vm13, %v5409_v13 }
 0xa81   :  { %v491_v2 = vpop.xlane.xlu0 %490 }
 0xa82   :  { %v493_v3 = vmax.f32 %v491_v2, 1.0 }
 0xa84   :  { %5279 = vrcp.f32 %v493_v3  ;;  %v5928_v3 = vadd.f32 %v5700_v62, %v5689_v48 }
 0xa86   :  { %vm501_vm7 = vcmp.gt.f32.partialorder %v5928_v3, 0.0 }
 0xa91   :  { %v5885_v28 = vpop.eup %5279 }
 0xaa2   :  { %v488_v31 = vpop.xlane.xlu1 %487 }
 0xaa3   :  { %v492_v35 = vmax.f32 %v488_v31, 1.0 }
 0xaa5   :  { %v4881_v32 = vpop.f32.mrf.mxu0  ;;  %5281 = vrcp.f32 %v492_v35 }
 0xaa6   :  { %v5888_v33 = vmul.f32 %v5885_v28, %v4881_v32 }
 0xaa7   :  { %v1333_v38 = vpop.f32.mrf.mxu0 }
 0xaa8   :  { %1375 = vperm.xlu0 %5181, %v5888_v33   ;;  %1530 = vperm.xlu1 %5180, %v5888_v33  }
 0xaac   :  { %1611 = vperm.xlu1 %5180, %v5894_v36   ;;  %5185 = vset.pattern.permute.xlu0 %v5413_v40 }
 0xab0   :  { %1615 = vperm.xlu1 %5180, %v5890_v34  }
 0xab2   :  { %v5900_v37 = vpop.eup %5281 }
 0xab3   :  { %v5904_v39 = vmul.f32 %v5900_v37, %v1333_v38 }
 0xab4   :  { %5182 = vset.pattern.permute.xlu1 %v5407_v43 }
 0xab5   :  { %1457 = vperm.xlu1 %5182, %v5894_v36  }
 0xab9   :  { %1462 = vperm.xlu1 %5182, %v5890_v34  }
 0xabd   :  { %5183 = vset.pattern.permute.xlu1 %v5412_v56 }
 0xabe   :  { %1526 = vperm.xlu1 %5183, %v5904_v39  }
 0xac2   :  { %5184 = vset.pattern.permute.xlu1 %v5407_v43 }
 0xac3   :  { %1370 = vperm.xlu1 %5184, %v5904_v39  }
 0xaec   :  { %1125 = vxpose.xlu1.b32.start [1/2] (short) (narrow) %v5826_v59, 8 }
 0xaf0   :  { %1126 = vxpose.xlu1.b32.end [2/2] (short) (narrow) %v5824_v58, 8 }
 0xb0e   :  { %5186 = vset.pattern.permute.xlu1 %v5413_v40 }
 0xb23   :  { %v1531_v41 = vpop.permute.xlu1 %1530  ;;  %v1376_v1 = vpop.permute.xlu0 %1375 }
 0xb24   :  { %v1379_v10 = vmul.f32 %v5689_v48, %v1376_v1  ;;  %v1534_v11 = vmul.f32 %v5689_v48, %v1531_v41  ;;  %v5932_v41 = vadd.f32 %v5692_v50, %v5702_v63 }
 0xb26   :  { %vm500_vm10 = vcmp.gt.f32.partialorder %v5932_v41, 0.0 }
 0xb27   :  { %v1612_v42 = vpop.permute.xlu1 %1611 }
 0xb2b   :  { %v1616_v44 = vpop.permute.xlu1 %1615 }
 0xb30   :  { %v1458_v45 = vpop.permute.xlu1 %1457  ;;  %v4903_v4 = vpop.f32.mrf.mxu0 }
 0xb31   :  { %v1607_v17 = vadd.f32 %v4903_v4, %v1534_v11  ;;  %v5414_v11 = vmov 3  }
 0xb32   :  { %v1601_v7 = vpop.f32.mrf.mxu0 }
 0xb34   :  { %v1463_v51 = vpop.permute.xlu1 %1462 }
 0xb35   :  { %v4892_v5 = vpop.f32.mrf.mxu1 }
 0xb36   :  { %v1452_v19 = vadd.f32 %v4892_v5, %v1379_v10 }
 0xb37   :  { %v1446_v9 = vpop.f32.mrf.mxu1 }
 0xb39   :  { %v1527_v54 = vpop.permute.xlu1 %1526 }
 0xb3a   :  { %v1533_v59 = vmul.f32 %v5692_v50, %v1527_v54 }
 0xb3c   :  { %v1602_v20 = vadd.f32 %v1601_v7, %v1533_v59 }
 0xb3e   :  { %v1371_v55 = vpop.permute.xlu1 %1370 }
 0xb3f   :  { %v1378_v58 = vmul.f32 %v5692_v50, %v1371_v55 }
 0xb41   :  { %v1447_v22 = vadd.f32 %v1446_v9, %v1378_v58 }
 0xb68   :  { %v5919_v12 = vpop.trf.xlu1 }
 0xb69   :  { %v1621_v15 = vrot.slane %v5919_v12, %v1620_v6  ;;  %v1468_v16 = vrot.slane %v5919_v12, %v5686_v47 }
 0xb6b   :  { %v1623_v23 = vadd.f32 %v1621_v15, %v1616_v44  ;;  %v1470_v24 = vadd.f32 %v1468_v16, %v1463_v51  ;;  %v1622_v26 = vadd.f32 %v1621_v15, %v1612_v42  ;;  %v1469_v2 = vadd.f32 %v1468_v16, %v1458_v45 }
 0xb6d   :  { %v1625_v31 = vadd.f32 %v1623_v23, %v1607_v17  ;;  %v1472_v32 = vadd.f32 %v1470_v24, %v1452_v19  ;;  %v1624_v35 = vadd.f32 %v1622_v26, %v1602_v20  ;;  %v1471_v38 = vadd.f32 %v1469_v2, %v1447_v22 }
 0xb6f   :  { %vm1627_vm4 = vcmp.ge.f32.partialorder %v1625_v31, 0.0  ;;  %v1629_v54 = vmul.f32 0.2, %v1625_v31  ;;  %vm1474_vm5 = vcmp.ge.f32.partialorder %v1472_v32, 0.0  ;;  %v1476_v55 = vmul.f32 0.2, %v1472_v32 }
 0xb70   :  { %vm1626_vm6 = vcmp.ge.f32.partialorder %v1624_v35, 0.0  ;;  %v1628_v44 = vmul.f32 0.2, %v1624_v35  ;;  %v1475_v62 = vmul.f32 0.2, %v1471_v38  ;;  %vm1473_vm8 = vcmp.ge.f32.partialorder %v1471_v38, 0.0 }
 0xb71   :  { %v1631_v42 = vsel %vm1627_vm4, %v1625_v31, %v1629_v54  ;;  %v1478_v45 = vsel %vm1474_vm5, %v1472_v32, %v1476_v55 }
 0xb72   :  { %v1633_v51 = vsel %vm501_vm7, %v1631_v42, -1e+30  ;;  %v1480_v1 = vsel %vm501_vm7, %v1478_v45, -1e+30  ;;  %v1630_v4 = vsel %vm1626_vm6, %v1624_v35, %v1628_v44  ;;  %v1477_v58 = vsel %vm1473_vm8, %v1471_v38, %v1475_v62 }
 0xb73   :  { %v1637_v63 = vsel %vm485_vm12, %v1633_v51, -inf  ;;  %v1484_v5 = vsel %vm485_vm12, %v1480_v1, -inf  ;;  %v1632_v59 = vsel %vm500_vm10, %v1630_v4, -1e+30  ;;  %v1479_v9 = vsel %vm500_vm10, %v1477_v58, -1e+30 }
 0xb74   :  { %1638 = vmax.xlane.f32.xlu1 %v1637_v63  ;;  %1485 = vmax.xlane.f32.xlu0 %v1484_v5  ;;  %v1634_v7 = vsel %vm485_vm12, %v1632_v59, -inf  ;;  %v1481_v10 = vsel %vm485_vm12, %v1479_v9, -inf }
 0xb78   :  { %1635 = vmax.xlane.f32.xlu0 %v1634_v7 }
 0xb7c   :  { %1482 = vmax.xlane.f32.xlu0 %v1481_v10 }
 0xb85   :  { %1758 = vperm.xlu1 %5186, %v5839_v0  }
 0xb89   :  { %5187 = vset.pattern.permute.xlu1 %v5414_v11 }
 0xb8a   :  { %1963 = vperm.xlu1 %5187, %v5834_v61  }
 0xb8e   :  { %1658 = vrot.lane.b32.xlu1 %v5812_v46, %s5415_s10 }
 0xb8f   :  { %5188 = vset.pattern.permute.xlu1 %v5413_v40 }
 0xb92   :  { %1754 = vperm.xlu1 %5188, %v5828_v60   ;;  %1762 = vperm.xlu0 %5185, %v5834_v61  }
 0xb96   :  { %5189 = vset.pattern.permute.xlu1 %v5414_v11  ;;  %5192 = vset.pattern.permute.xlu0 %v5414_v11 }
 0xb97   :  { %1959 = vperm.xlu1 %5189, %v5839_v0  }
 0xb9b   :  { %5190 = vset.pattern.permute.xlu1 %v5413_v40 }
 0xb9c   :  { %1750 = vperm.xlu1 %5190, %v5832_v30  }
 0xba0   :  { %5191 = vset.pattern.permute.xlu1 %v5414_v11 }
 0xba1   :  { %1955 = vperm.xlu1 %5191, %v5828_v60  }
 0xba5   :  { %5193 = vset.pattern.permute.xlu1 %v5413_v40 }
 0xba6   :  { %1770 = vperm.xlu1 %5193, %v5904_v39  }
 0xbaa   :  { %1774 = vperm.xlu1 %5193, %v5888_v33  }
 0xbae   :  { %1859 = vperm.xlu1 %5193, %v5890_v34  }
 0xbb2   :  { %5195 = vset.pattern.permute.xlu1 %v5414_v11 }
 0xbb3   :  { %1971 = vperm.xlu1 %5195, %v5904_v39  }
 0xbb7   :  { %2056 = vperm.xlu1 %5195, %v5894_v36  }
 0xbbb   :  { %2060 = vperm.xlu1 %5195, %v5890_v34  }
 0xbfd   :  { %v1639_v15 = vpop.xlane.xlu1 %1638  ;;  %v1486_v16 = vpop.xlane.xlu0 %1485 }
 0xbfe   :  { %v1641_v17 = vsub.f32 %v1633_v51, %v1639_v15  ;;  %v1488_v19 = vsub.f32 %v1480_v1, %v1486_v16 }
 0xc00   :  { %v1644_v20 = vmul.f32 1.442695, %v1641_v17  ;;  %v1491_v22 = vmul.f32 1.442695, %v1488_v19 }
 0xc01   :  { %v1759_v23 = vpop.permute.xlu1 %1758  ;;  %v1636_v24 = vpop.xlane.xlu0 %1635 }
 0xc02   :  { %5283 = vpow2.f32 %v1644_v20  ;;  %v1640_v26 = vsub.f32 %v1632_v59, %v1636_v24 }
 0xc03   :  { %5285 = vpow2.f32 %v1491_v22 }
 0xc04   :  { %v1642_v2 = vmul.f32 1.442695, %v1640_v26 }
 0xc05   :  { %v1964_v31 = vpop.permute.xlu1 %1963  ;;  %v1483_v32 = vpop.xlane.xlu0 %1482 }
 0xc06   :  { %v1969_v35 = vmul.f32 %v5634_v18, %v1964_v31  ;;  %v1487_v38 = vsub.f32 %v1479_v9, %v1483_v32  ;;  %5287 = vpow2.f32 %v1642_v2  ;;  %v1767_v32 = vmul.f32 %v5640_v21, %v1759_v23 }
 0xc08   :  { %v1489_v54 = vmul.f32 1.442695, %v1487_v38  ;;  %4933 = vmatprep.subr.mxu0 %v1969_v35 }
 0xc09   :  { %v1659_v55 = vpop.permute.xlu1 %1658 }
 0xc0a   :  { %4905 = vmatpush3.bf16.msra.mxu1 %v1659_v55  ;;  %5289 = vpow2.f32 %v1489_v54 }
 0xc0d   :  { %v1763_v44 = vpop.permute.xlu0 %1762  ;;  %v1755_v10 = vpop.permute.xlu1 %1754 }
 0xc0e   :  { %v1768_v42 = vmul.f32 %v5634_v18, %v1763_v44  ;;  %v1766_v55 = vmul.f32 %v5648_v25, %v1755_v10  ;;  %v6545_v10 = vsub.s32 2, %v5612_v8 }
 0xc0f   :  { %v5284_v45 = vpop.eup %5283 }
 0xc10   :  { %4916 = vmatprep.subr.mxu1 %v1768_v42  ;;  %v1649_v62 = vsel %vm485_vm12, %v5284_v45, 0.0  ;;  %v5286_v51 = vpop.eup %5285 }
 0xc11   :  { %1650 = vadd.xlane.f32.xlu0 %v1649_v62  ;;  %v1496_v1 = vsel %vm485_vm12, %v5286_v51, 0.0 }
 0xc12   :  { %v1960_v16 = vpop.permute.xlu1 %1959 }
 0xc13   :  { %v5288_v4 = vpop.eup %5287 }
 0xc14   :  { %v1646_v63 = vsel %vm485_vm12, %v5288_v4, 0.0 }
 0xc15   :  { %1497 = vadd.xlane.f32.xlu0 %v1496_v1 }
 0xc17   :  { %v5290_v5 = vpop.eup %5289  ;;  %v1751_v26 = vpop.permute.xlu1 %1750 }
 0xc18   :  { %v1493_v59 = vsel %vm485_vm12, %v5290_v5, 0.0  ;;  %v1765_v1 = vmul.f32 %v5655_v29, %v1751_v26 }
 0xc19   :  { %1647 = vadd.xlane.f32.xlu0 %v1646_v63 }
 0xc1c   :  { %v1956_v62 = vpop.permute.xlu1 %1955 }
 0xc1d   :  { %1494 = vadd.xlane.f32.xlu0 %v1493_v59 }
 0xc33   :  { %1951 = vperm.xlu0 %5192, %v5832_v30  }
 0xc37   :  { %5194 = vset.pattern.permute.xlu0 %v5413_v40 }
 0xc38   :  { %1855 = vperm.xlu0 %5194, %v5894_v36  }
 0xc3c   :  { %5196 = vset.pattern.permute.xlu0 %v5414_v11 }
 0xc3d   :  { %1975 = vperm.xlu0 %5196, %v5888_v33  }
 0xc9a   :  { %v1651_v58 = vpop.xlane.xlu0 %1650 }
 0xc9b   :  { %5291 = vrcp.f32 %v1651_v58 }
 0xc9e   :  { %v1498_v7 = vpop.xlane.xlu0 %1497 }
 0xca2   :  { %v1648_v9 = vpop.xlane.xlu0 %1647 }
 0xca3   :  { %5293 = vrcp.f32 %v1648_v9 }
 0xca4   :  { %5295 = vrcp.f32 %v1498_v7 }
 0xca6   :  { %v1495_v15 = vpop.xlane.xlu0 %1494 }
 0xca7   :  { %5297 = vrcp.f32 %v1495_v15 }
 0xca8   :  { %v5292_v17 = vpop.eup %5291 }
 0xca9   :  { %v1655_v22 = vmul.f32 %v5292_v17, %v5284_v45  ;;  %v1968_v45 = vmul.f32 %v5640_v21, %v1960_v16 }
 0xcae   :  { %v1952_v23 = vpop.permute.xlu0 %1951 }
 0xcb0   :  { %v5294_v19 = vpop.eup %5293 }
 0xcb1   :  { %v1654_v20 = vmul.f32 %v5294_v19, %v5288_v4  ;;  %v5296_v24 = vpop.eup %5295  ;;  %v1771_v4 = vpop.permute.xlu1 %1770 }
 0xcb2   :  { %v1502_v54 = vmul.f32 %v5296_v24, %v5286_v51  ;;  %v1966_v51 = vmul.f32 %v5655_v29, %v1952_v23 }
 0xcb3   :  { %v1656_v2 = vpack.c.bf16 %v1655_v22, %v1654_v20  ;;  %v1856_v7 = vpop.permute.xlu0 %1855  ;;  %v6546_v20 = vsub.s32 3, %v5612_v8 }
 0xcb4   :  { %v5298_v31 = vpop.eup %5297 }
 0xcb5   :  { %4907 = vmatmul.mubr.msk.bf16.vlgmr.msra.gmra.mxu1 %vm485_vm12, %v1656_v2  ;;  %v1501_v38 = vmul.f32 %v5298_v31, %v5290_v5  ;;  %v1775_v63 = vpop.permute.xlu1 %1774  ;;  %v1865_v2 = vrot.slane %v5919_v12, %v6545_v10 }
 0xcb6   :  { %4917 = vmatpush3.msra.mxu1 %v1768_v42  ;;  %4924 = vmatprep.mubr.msk.f32.mxu1 %vm403_vm9, %v5622_v14  ;;  %v1967_v42 = vmul.f32 %v5648_v25, %v1956_v62  ;;  %v1778_v26 = vmul.f32 %v5689_v48, %v1775_v63 }
 0xcb7   :  { %4918 = vmatprep.subr.mxu1 %v1767_v32  ;;  %v1503_v44 = vpack.c.bf16 %v1502_v54, %v1501_v38  ;;  %v1777_v54 = vmul.f32 %v5692_v50, %v1771_v4 }
 0xcb8   :  { %4919 = vmatpush3.msra.mxu1 %v1767_v32  ;;  %v1976_v31 = vpop.permute.xlu0 %1975 }
 0xcb9   :  { %4920 = vmatprep.subr.mxu1 %v1766_v55  ;;  %4913 = vmatmul.mubr.msk.bf16.vlgmr.msra.gmra.mxu0 %vm485_vm12, %v1503_v44  ;;  %v1860_v5 = vpop.permute.xlu1 %1859  ;;  %v1979_v63 = vmul.f32 %v5689_v48, %v1976_v31 }
 0xcba   :  { %4921 = vmatpush3.msra.mxu1 %v1766_v55  ;;  %4934 = vmatpush3.msra.mxu0 %v1969_v35  ;;  %v5416_v35 = vmov 4   ;;  %v1867_v55 = vadd.f32 %v1865_v2, %v1860_v5 }
 0xcbb   :  { %4922 = vmatprep.subr.mxu1 %v1765_v1  ;;  %4935 = vmatprep.subr.mxu0 %v1968_v45 }
 0xcbc   :  { %4923 = vmatpush3.msra.mxu1 %v1765_v1  ;;  %4936 = vmatpush3.msra.mxu0 %v1968_v45  ;;  %v2066_v1 = vrot.slane %v5919_v12, %v6546_v20 }
 0xcbd   :  { %4937 = vmatprep.subr.mxu0 %v1967_v42  ;;  %4925 = vmatmul.mubr.msk.f32.vlgmr.msra.gmra.mxu1 %vm403_vm9, %v5651_v27  ;;  %v1972_v59 = vpop.permute.xlu1 %1971 }
 0xcbe   :  { %4938 = vmatpush3.msra.mxu0 %v1967_v42  ;;  %4941 = vmatprep.mubr.msk.f32.mxu0 %vm403_vm9, %v5622_v14 }
 0xcbf   :  { %4939 = vmatprep.subr.mxu0 %v1966_v51  ;;  %4927 = vmatprep.subr.bf16.mxu1 %v5409_v13 }
 0xcc0   :  { %4940 = vmatpush3.msra.mxu0 %v1966_v51  ;;  %4929 = vmatprep.mubr.msk.bf16.mxu1 %vm5411_vm13, %v5409_v13  ;;  %v1866_v51 = vadd.f32 %v1865_v2, %v1856_v7 }
 0xcc1   :  { %4942 = vmatmul.mubr.msk.f32.vlgmr.msra.gmra.mxu0 %vm403_vm9, %v5651_v27  ;;  %4944 = vmatprep.subr.bf16.mxu0 %v5409_v13  ;;  %v2057_v15 = vpop.permute.xlu1 %2056 }
 0xcc2   :  { %4946 = vmatprep.mubr.msk.bf16.mxu0 %vm5411_vm13, %v5409_v13  ;;  %5197 = vset.pattern.permute.xlu1 %v5416_v35 }
 0xcc3   :  { %5198 = vset.pattern.permute.xlu0 %v5416_v35 }
 0xcc5   :  { %v2061_v44 = vpop.permute.xlu1 %2060 }
 0xd75   :  { %v1698_v58 = vpop.f32.mrf.mxu1 }
 0xd77   :  { %v4908_v9 = vpop.f32.mrf.mxu1 }
 0xd79   :  { %v1701_v16 = vpop.f32.mrf.mxu1  ;;  %v1742_v17 = vpop.f32.mrf.mxu0 }
 0xd7a   :  { %v6007_v19 = vadd.f32 %v1742_v17, %v1698_v58  ;;  %v1978_v17 = vmul.f32 %v5692_v50, %v1972_v59 }
 0xd7b   :  { %v4909_v22 = vpop.f32.mrf.mxu1  ;;  %v4914_v24 = vpop.f32.mrf.mxu0 }
 0xd7c   :  { %v2068_v22 = vadd.f32 %v2066_v1, %v2061_v44 }
 0xd7d   :  { %v1745_v32 = vpop.f32.mrf.mxu0  ;;  %v4926_v38 = vpop.f32.mrf.mxu1 }
 0xd7e   :  { %v6015_v62 = vadd.f32 %v1745_v32, %v1701_v16  ;;  %v1851_v45 = vadd.f32 %v4926_v38, %v1778_v26  ;;  %v2067_v26 = vadd.f32 %v2066_v1, %v2057_v15 }
 0xd7f   :  { %v4915_v23 = vpop.f32.mrf.mxu0  ;;  %v1845_v42 = vpop.f32.mrf.mxu1 }
 0xd80   :  { %v1869_v58 = vadd.f32 %v1867_v55, %v1851_v45  ;;  %v1846_v9 = vadd.f32 %v1845_v42, %v1777_v54 }
 0xd81   :  { %v4943_v4 = vpop.f32.mrf.mxu0 }
 0xd82   :  { %v1868_v5 = vadd.f32 %v1866_v51, %v1846_v9  ;;  %v2052_v24 = vadd.f32 %v4943_v4, %v1979_v63  ;;  %vm1871_vm11 = vcmp.ge.f32.partialorder %v1869_v58, 0.0  ;;  %v1873_v16 = vmul.f32 0.2, %v1869_v58 }
 0xd83   :  { %v2046_v32 = vpop.f32.mrf.mxu0  ;;  %v5417_v63 = vmov 5  }
 0xd84   :  { %v2070_v38 = vadd.f32 %v2068_v22, %v2052_v24  ;;  %v2047_v10 = vadd.f32 %v2046_v32, %v1978_v17  ;;  %v1875_v20 = vsel %vm1871_vm11, %v1869_v58, %v1873_v16  ;;  %vm1870_vm14 = vcmp.ge.f32.partialorder %v1868_v5, 0.0 }
 0xd85   :  { %v1877_v7 = vsel %vm501_vm7, %v1875_v20, -1e+30  ;;  %v1872_v2 = vmul.f32 0.2, %v1868_v5  ;;  %vm2620_vm11 = vcmask 392192  }
 0xd86   :  { %v2069_v31 = vadd.f32 %v2067_v26, %v2047_v10  ;;  %v1881_v54 = vsel %vm485_vm12, %v1877_v7, -inf  ;;  %v2074_v55 = vmul.f32 0.2, %v2070_v38  ;;  %vm2072_vm1 = vcmp.ge.f32.partialorder %v2070_v38, 0.0 }
 0xd87   :  { %1882 = vmax.xlane.f32.xlu1 %v1881_v54  ;;  %v1874_v59 = vsel %vm1870_vm14, %v1868_v5, %v1872_v2 }
 0xd88   :  { %v1876_v44 = vsel %vm500_vm10, %v1874_v59, -1e+30  ;;  %vm2071_vm15 = vcmp.ge.f32.partialorder %v2069_v31, 0.0  ;;  %v2073_v15 = vmul.f32 0.2, %v2069_v31  ;;  %v2076_v23 = vsel %vm2072_vm1, %v2070_v38, %v2074_v55 }
 0xd89   :  { %v1878_v45 = vsel %vm485_vm12, %v1876_v44, -inf  ;;  %v2078_v42 = vsel %vm501_vm7, %v2076_v23, -1e+30 }
 0xd8a   :  { %1879 = vmax.xlane.f32.xlu0 %v1878_v45  ;;  %v2075_v1 = vsel %vm2071_vm15, %v2069_v31, %v2073_v15  ;;  %v2082_v51 = vsel %vm485_vm12, %v2078_v42, -inf }
 0xd8b   :  { %v2077_v20 = vsel %vm500_vm10, %v2075_v1, -1e+30 }
 0xd8c   :  { %v2079_v10 = vsel %vm485_vm12, %v2077_v20, -inf }
 0xd8e   :  { %2080 = vmax.xlane.f32.xlu0 %v2079_v10 }
 0xd92   :  { %2083 = vmax.xlane.f32.xlu0 %v2082_v51 }
 0xd98   :  { %2164 = vperm.xlu1 %5197, %v5834_v61  }
 0xd9c   :  { %5199 = vset.pattern.permute.xlu1 %v5417_v63 }
 0xd9d   :  { %2365 = vperm.xlu1 %5199, %v5834_v61  }
 0xda1   :  { %1901 = vrot.lane.b32.xlu1 %v5812_v46, %s5418_s11 }
 0xda2   :  { %5200 = vset.pattern.permute.xlu1 %v5416_v35 }
 0xda5   :  { %2156 = vperm.xlu1 %5200, %v5828_v60  }
 0xda9   :  { %5201 = vset.pattern.permute.xlu1 %v5417_v63 }
 0xdaa   :  { %2361 = vperm.xlu1 %5201, %v5839_v0  }
 0xdae   :  { %2102 = vrot.lane.b32.xlu1 %v5812_v46, %s5419_s12 }
 0xdaf   :  { %5202 = vset.pattern.permute.xlu1 %v5416_v35 }
 0xdb2   :  { %2152 = vperm.xlu1 %5202, %v5832_v30  }
 0xdb6   :  { %5203 = vset.pattern.permute.xlu1 %v5417_v63 }
 0xdb7   :  { %2357 = vperm.xlu1 %5203, %v5828_v60  }
 0xe10   :  { %v1883_v61 = vpop.xlane.xlu1 %1882 }
 0xe11   :  { %v1885_v58 = vsub.f32 %v1877_v7, %v1883_v61 }
 0xe13   :  { %v1888_v9 = vmul.f32 1.442695, %v1885_v58  ;;  %v1880_v17 = vpop.xlane.xlu0 %1879 }
 0xe14   :  { %v1884_v22 = vsub.f32 %v1876_v44, %v1880_v17  ;;  %v2165_v4 = vpop.permute.xlu1 %2164 }
 0xe15   :  { %5299 = vpow2.f32 %v1888_v9  ;;  %v2170_v2 = vmul.f32 %v5634_v18, %v2165_v4 }
 0xe16   :  { %v1886_v5 = vmul.f32 1.442695, %v1884_v22 }
 0xe17   :  { %v2081_v24 = vpop.xlane.xlu0 %2080 }
 0xe18   :  { %5301 = vpow2.f32 %v1886_v5  ;;  %v2085_v16 = vsub.f32 %v2077_v20, %v2081_v24  ;;  %v2366_v26 = vpop.permute.xlu1 %2365 }
 0xe19   :  { %v2371_v20 = vmul.f32 %v5634_v18, %v2366_v26 }
 0xe1a   :  { %v2087_v32 = vmul.f32 1.442695, %v2085_v16 }
 0xe1b   :  { %v2084_v38 = vpop.xlane.xlu0 %2083 }
 0xe1c   :  { %5303 = vpow2.f32 %v2087_v32  ;;  %v2086_v31 = vsub.f32 %v2078_v42, %v2084_v38  ;;  %v1902_v54 = vpop.permute.xlu1 %1901 }
 0xe1d   :  { %4928 = vmatpush3.bf16.msra.mxu1 %v1902_v54 }
 0xe1e   :  { %v2089_v60 = vmul.f32 1.442695, %v2086_v31  ;;  %4950 = vmatprep.subr.mxu1 %v2170_v2 }
 0xe20   :  { %5305 = vpow2.f32 %v2089_v60  ;;  %v2157_v7 = vpop.permute.xlu1 %2156 }
 0xe21   :  { %v2168_v16 = vmul.f32 %v5648_v25, %v2157_v7 }
 0xe22   :  { %v5300_v59 = vpop.eup %5299 }
 0xe23   :  { %v1893_v55 = vsel %vm485_vm12, %v5300_v59, 0.0 }
 0xe24   :  { %1894 = vadd.xlane.f32.xlu0 %v1893_v55 }
 0xe25   :  { %v5302_v44 = vpop.eup %5301  ;;  %v2362_v15 = vpop.permute.xlu1 %2361 }
 0xe26   :  { %v1890_v45 = vsel %vm485_vm12, %v5302_v44, 0.0  ;;  %v2370_v60 = vmul.f32 %v5640_v21, %v2362_v15 }
 0xe27   :  { %1891 = vadd.xlane.f32.xlu1 %v1890_v45 }
 0xe29   :  { %v5304_v1 = vpop.eup %5303  ;;  %v2103_v23 = vpop.permute.xlu1 %2102 }
 0xe2a   :  { %4945 = vmatpush3.bf16.msra.mxu0 %v2103_v23  ;;  %v2091_v10 = vsel %vm485_vm12, %v5304_v1, 0.0  ;;  %v2266_v23 = vsub.s32 4, %v5612_v8 }
 0xe2b   :  { %2092 = vadd.xlane.f32.xlu1 %v2091_v10  ;;  %4967 = vmatprep.subr.mxu0 %v2371_v20 }
 0xe2d   :  { %v5306_v42 = vpop.eup %5305 }
 0xe2e   :  { %v2094_v51 = vsel %vm485_vm12, %v5306_v42, 0.0 }
 0xe2f   :  { %2095 = vadd.xlane.f32.xlu0 %v2094_v51 }
 0xe3c   :  { %2353 = vperm.xlu1 %5203, %v5832_v30   ;;  %v2153_v30 = vpop.permute.xlu1 %2152 }
 0xe3d   :  { %v2167_v32 = vmul.f32 %v5655_v29, %v2153_v30 }
 0xe40   :  { %5204 = vset.pattern.permute.xlu1 %v5416_v35 }
 0xe41   :  { %2176 = vperm.xlu1 %5204, %v5888_v33  }
 0xe45   :  { %2261 = vperm.xlu1 %5204, %v5890_v34   ;;  %2160 = vperm.xlu0 %5198, %v5839_v0   ;;  %v2358_v0 = vpop.permute.xlu1 %2357 }
 0xe46   :  { %v2369_v7 = vmul.f32 %v5648_v25, %v2358_v0 }
 0xe49   :  { %5206 = vset.pattern.permute.xlu1 %v5417_v63  ;;  %2172 = vperm.xlu0 %5198, %v5904_v39  }
 0xe4a   :  { %2377 = vperm.xlu1 %5206, %v5888_v33  }
 0xe4d   :  { %2257 = vperm.xlu0 %5198, %v5894_v36  }
 0xe4e   :  { %2458 = vperm.xlu1 %5206, %v5894_v36  }
 0xe51   :  { %5205 = vset.pattern.permute.xlu0 %v5417_v63 }
 0xe52   :  { %2373 = vperm.xlu0 %5205, %v5904_v39   ;;  %5207 = vset.pattern.permute.xlu1 %v5412_v56 }
 0xe56   :  { %2462 = vperm.xlu0 %5205, %v5890_v34  }
 0xe5a   :  { %5208 = vset.pattern.permute.xlu0 %v5407_v43 }
 0xead   :  { %v1895_v61 = vpop.xlane.xlu0 %1894 }
 0xeae   :  { %5307 = vrcp.f32 %v1895_v61  ;;  %v2267_v61 = vrot.slane %v5919_v12, %v2266_v23 }
 0xeb0   :  { %v1892_v58 = vpop.xlane.xlu1 %1891 }
 0xeb1   :  { %5309 = vrcp.f32 %v1892_v58 }
 0xeb4   :  { %v2093_v33 = vpop.xlane.xlu1 %2092 }
 0xeb5   :  { %5311 = vrcp.f32 %v2093_v33 }
 0xeb8   :  { %v2096_v9 = vpop.xlane.xlu0 %2095 }
 0xeb9   :  { %5313 = vrcp.f32 %v2096_v9 }
 0xebb   :  { %v5308_v36 = vpop.eup %5307 }
 0xebc   :  { %v1899_v39 = vmul.f32 %v5308_v36, %v5300_v59 }
 0xebe   :  { %v5310_v17 = vpop.eup %5309 }
 0xebf   :  { %v1898_v22 = vmul.f32 %v5310_v17, %v5302_v44 }
 0xec0   :  { %v2161_v4 = vpop.permute.xlu0 %2160 }
 0xec1   :  { %v2169_v5 = vmul.f32 %v5640_v21, %v2161_v4  ;;  %v1900_v34 = vpack.c.bf16 %v1899_v39, %v1898_v22  ;;  %v2467_v4 = vsub.s32 5, %v5612_v8 }
 0xec2   :  { %v5312_v24 = vpop.eup %5311 }
 0xec3   :  { %4930 = vmatmul.mubr.msk.bf16.vlgmr.msra.gmra.mxu1 %vm485_vm12, %v1900_v34  ;;  %v2099_v38 = vmul.f32 %v5312_v24, %v5304_v1 }
 0xec4   :  { %4951 = vmatpush3.msra.mxu1 %v2170_v2  ;;  %4958 = vmatprep.mubr.msk.f32.mxu1 %vm403_vm9, %v5622_v14  ;;  %v2354_v2 = vpop.permute.xlu1 %2353  ;;  %v2173_v55 = vpop.permute.xlu0 %2172 }
 0xec5   :  { %4952 = vmatprep.subr.mxu1 %v2169_v5  ;;  %v2368_v59 = vmul.f32 %v5655_v29, %v2354_v2 }
 0xec6   :  { %v5314_v26 = vpop.eup %5313  ;;  %4953 = vmatpush3.msra.mxu1 %v2169_v5 }
 0xec7   :  { %4954 = vmatprep.subr.mxu1 %v2168_v16  ;;  %v2100_v31 = vmul.f32 %v5314_v26, %v5306_v42 }
 0xec8   :  { %4955 = vmatpush3.msra.mxu1 %v2168_v16  ;;  %v2177_v44 = vpop.permute.xlu1 %2176  ;;  %v2258_v45 = vpop.permute.xlu0 %2257 }
 0xec9   :  { %4956 = vmatprep.subr.mxu1 %v2167_v32  ;;  %v2101_v54 = vpack.c.bf16 %v2100_v31, %v2099_v38  ;;  %v2180_v0 = vmul.f32 %v5689_v48, %v2177_v44  ;;  %v2268_v34 = vadd.f32 %v2267_v61, %v2258_v45 }
 0xeca   :  { %4957 = vmatpush3.msra.mxu1 %v2167_v32 }
 0xecb   :  { %4947 = vmatmul.mubr.msk.bf16.vlgmr.msra.gmra.mxu0 %vm485_vm12, %v2101_v54  ;;  %4959 = vmatmul.mubr.msk.f32.vlgmr.msra.gmra.mxu1 %vm403_vm9, %v5651_v27  ;;  %v2468_v54 = vrot.slane %v5919_v12, %v2467_v4 }
 0xecc   :  { %4968 = vmatpush3.msra.mxu0 %v2371_v20  ;;  %4975 = vmatprep.mubr.msk.f32.mxu0 %vm403_vm9, %v5622_v14  ;;  %v2262_v10 = vpop.permute.xlu1 %2261 }
 0xecd   :  { %4969 = vmatprep.subr.mxu0 %v2370_v60  ;;  %4961 = vmatprep.subr.bf16.mxu1 %v5409_v13  ;;  %v2374_v58 = vpop.permute.xlu0 %2373  ;;  %v2269_v36 = vadd.f32 %v2267_v61, %v2262_v10 }
 0xece   :  { %4970 = vmatpush3.msra.mxu0 %v2370_v60  ;;  %4963 = vmatprep.mubr.msk.bf16.mxu1 %vm5411_vm13, %v5409_v13 }
 0xecf   :  { %4971 = vmatprep.subr.mxu0 %v2369_v7 }
 0xed0   :  { %4972 = vmatpush3.msra.mxu0 %v2369_v7  ;;  %v2378_v17 = vpop.permute.xlu1 %2377 }
 0xed1   :  { %4973 = vmatprep.subr.mxu0 %v2368_v59  ;;  %v2463_v60 = vpop.permute.xlu0 %2462  ;;  %v2381_v7 = vmul.f32 %v5689_v48, %v2378_v17 }
 0xed2   :  { %4974 = vmatpush3.msra.mxu0 %v2368_v59 }
 0xed3   :  { %4976 = vmatmul.mubr.msk.f32.vlgmr.msra.gmra.mxu0 %vm403_vm9, %v5651_v27  ;;  %4978 = vmatprep.subr.bf16.mxu0 %v5409_v13 }
 0xed4   :  { %4980 = vmatprep.mubr.msk.bf16.mxu0 %vm5411_vm13, %v5409_v13  ;;  %v2459_v44 = vpop.permute.xlu1 %2458 }
 0xf83   :  { %v1941_v15 = vpop.f32.mrf.mxu1 }
 0xf84   :  { %v1948_v1 = vadd.f32 %v1941_v15, %v6007_v19  ;;  %v2179_v19 = vmul.f32 %v5692_v50, %v2173_v55  ;;  %v2380_v15 = vmul.f32 %v5692_v50, %v2374_v58 }
 0xf85   :  { %v4931_v20 = vpop.f32.mrf.mxu1 }
 0xf86   :  { %v2470_v20 = vadd.f32 %v2468_v54, %v2463_v60 }
 0xf87   :  { %v1944_v42 = vpop.f32.mrf.mxu1 }
 0xf88   :  { %v1949_v51 = vadd.f32 %v1944_v42, %v6015_v62 }
 0xf89   :  { %v4932_v30 = vpop.f32.mrf.mxu1 }
 0xf8b   :  { %v2142_v33 = vpop.f32.mrf.mxu0  ;;  %v4960_v9 = vpop.f32.mrf.mxu1 }
 0xf8c   :  { %v6099_v22 = vadd.f32 %v2142_v33, %v1948_v1  ;;  %v2253_v39 = vadd.f32 %v4960_v9, %v2180_v0  ;;  %v2469_v0 = vadd.f32 %v2468_v54, %v2459_v44 }
 0xf8d   :  { %v4948_v62 = vpop.f32.mrf.mxu0  ;;  %v2247_v5 = vpop.f32.mrf.mxu1 }
 0xf8e   :  { %v2271_v24 = vadd.f32 %v2269_v36, %v2253_v39  ;;  %v2248_v16 = vadd.f32 %v2247_v5, %v2179_v19 }
 0xf8f   :  { %v2145_v26 = vpop.f32.mrf.mxu0 }
 0xf90   :  { %v2270_v32 = vadd.f32 %v2268_v34, %v2248_v16  ;;  %v6102_v38 = vadd.f32 %v2145_v26, %v1949_v51  ;;  %vm2273_vm4 = vcmp.ge.f32.partialorder %v2271_v24, 0.0  ;;  %v2275_v31 = vmul.f32 0.2, %v2271_v24 }
 0xf91   :  { %v4949_v2 = vpop.f32.mrf.mxu0 }
 0xf92   :  { %v2274_v59 = vmul.f32 0.2, %v2270_v32  ;;  %v2277_v55 = vsel %vm2273_vm4, %v2271_v24, %v2275_v31  ;;  %vm2272_vm5 = vcmp.ge.f32.partialorder %v2270_v32, 0.0 }
 0xf93   :  { %v4977_v45 = vpop.f32.mrf.mxu0  ;;  %v2279_v1 = vsel %vm501_vm7, %v2277_v55, -1e+30 }
 0xf94   :  { %v2454_v10 = vadd.f32 %v4977_v45, %v2381_v7  ;;  %v2283_v42 = vsel %vm485_vm12, %v2279_v1, -inf  ;;  %v2276_v51 = vsel %vm2272_vm5, %v2270_v32, %v2274_v59 }
 0xf95   :  { %v2448_v12 = vpop.f32.mrf.mxu0  ;;  %2284 = vmax.xlane.f32.xlu0 %v2283_v42  ;;  %v2278_v30 = vsel %vm500_vm10, %v2276_v51, -1e+30 }
 0xf96   :  { %v2472_v61 = vadd.f32 %v2470_v20, %v2454_v10  ;;  %v2449_v33 = vadd.f32 %v2448_v12, %v2380_v15  ;;  %v2280_v9 = vsel %vm485_vm12, %v2278_v30, -inf }
 0xf97   :  { %2281 = vmax.xlane.f32.xlu1 %v2280_v9 }
 0xf98   :  { %v2476_v58 = vmul.f32 0.2, %v2472_v61  ;;  %v2471_v36 = vadd.f32 %v2469_v0, %v2449_v33  ;;  %vm2474_vm6 = vcmp.ge.f32.partialorder %v2472_v61, 0.0 }
 0xf9a   :  { %v2478_v19 = vsel %vm2474_vm6, %v2472_v61, %v2476_v58  ;;  %vm2473_vm8 = vcmp.ge.f32.partialorder %v2471_v36, 0.0  ;;  %v2475_v17 = vmul.f32 0.2, %v2471_v36 }
 0xf9b   :  { %v2480_v39 = vsel %vm501_vm7, %v2478_v19, -1e+30 }
 0xf9c   :  { %v2484_v62 = vsel %vm485_vm12, %v2480_v39, -inf  ;;  %v2477_v5 = vsel %vm2473_vm8, %v2471_v36, %v2475_v17 }
 0xf9d   :  { %2485 = vmax.xlane.f32.xlu1 %v2484_v62  ;;  %v2479_v34 = vsel %vm500_vm10, %v2477_v5, -1e+30 }
 0xf9e   :  { %v2481_v24 = vsel %vm485_vm12, %v2479_v34, -inf }
 0xf9f   :  { %2482 = vmax.xlane.f32.xlu0 %v2481_v24  ;;  %v2567_v24 = vld [vmem:[%s6534_s14 + $0x8] sm:$0xff] }
0x101e   :  { %v2285_v16 = vpop.xlane.xlu0 %2284 }
0x101f   :  { %v2287_v26 = vsub.f32 %v2279_v1, %v2285_v16 }
0x1020   :  { %v2282_v32 = vpop.xlane.xlu1 %2281 }
0x1021   :  { %v2290_v31 = vmul.f32 1.442695, %v2287_v26  ;;  %v2286_v54 = vsub.f32 %v2278_v30, %v2282_v32  ;;  %v2619_v26 = vld [vmem:[%s6535_s15 + $0x28] sm:$0xff] }
0x1022   :  { %v2707_v32 = vld [vmem:[%s6536_s16 + $0x28] sm:$0xff] }
0x1023   :  { %5315 = vpow2.f32 %v2290_v31  ;;  %v2288_v60 = vmul.f32 1.442695, %v2286_v54  ;;  %v2618_v31 = vld [vmem:[%s6535_s15 + $0x20] sm:$0xff]  ;;  %v2617_v54 = vld [vmem:[%s6535_s15 + $0x18] sm:$0xff] }
0x1025   :  { %5317 = vpow2.f32 %v2288_v60  ;;  %v2616_v60 = vld [vmem:[%s6535_s15 + $0x10] sm:$0xff] }
0x1026   :  { %v2486_v2 = vpop.xlane.xlu1 %2485 }
0x1027   :  { %v2488_v7 = vsub.f32 %v2480_v39, %v2486_v2 }
0x1028   :  { %v2483_v59 = vpop.xlane.xlu0 %2482 }
0x1029   :  { %v2491_v55 = vmul.f32 1.442695, %v2488_v7  ;;  %v2487_v44 = vsub.f32 %v2479_v34, %v2483_v59  ;;  %v2566_v34 = vld [vmem:[%s6534_s14] sm:$0xff] }
0x102a   :  { %v2569_v16 = vpack.c.bf16 %v2567_v24, %v2566_v34 }
0x102b   :  { %5319 = vpow2.f32 %v2491_v55  ;;  %v2489_v15 = vmul.f32 1.442695, %v2487_v44 }
0x102d   :  { %5321 = vpow2.f32 %v2489_v15 }
0x1030   :  { %v5316_v45 = vpop.eup %5315 }
0x1031   :  { %v2295_v20 = vsel %vm485_vm12, %v5316_v45, 0.0 }
0x1032   :  { %v5318_v10 = vpop.eup %5317  ;;  %2296 = vadd.xlane.f32.xlu1 %v2295_v20 }
0x1033   :  { %v2292_v1 = vsel %vm485_vm12, %v5318_v10, 0.0 }
0x1034   :  { %2293 = vadd.xlane.f32.xlu0 %v2292_v1 }
0x1038   :  { %v5320_v42 = vpop.eup %5319 }
0x1039   :  { %v2496_v51 = vsel %vm485_vm12, %v5320_v42, 0.0 }
0x103a   :  { %v5322_v12 = vpop.eup %5321  ;;  %2497 = vadd.xlane.f32.xlu1 %v2496_v51 }
0x103b   :  { %v2493_v30 = vsel %vm485_vm12, %v5322_v12, 0.0 }
0x103c   :  { %2494 = vadd.xlane.f32.xlu0 %v2493_v30 }
0x104b   :  { %2504 = vrot.lane.b32.xlu1 %v5812_v46, %s5420_s26 }
0x104f   :  { %2816 = vrot.lane.b32.xlu1 %v5586_v52, %s5421_s27 }
0x1052   :  { %2303 = vrot.lane.b32.xlu0 %v5812_v46, %s5422_s3 }
0x1053   :  { %2820 = vrot.lane.b32.xlu1 %v5592_v57, %s5421_s27 }
0x1056   :  { %2818 = vrot.lane.b32.xlu0 %v5584_v49, %s5421_s27 }
0x105a   :  { %2822 = vrot.lane.b32.xlu0 %v5588_v53, %s5421_s27 }
0x10bb   :  { %v2297_v0 = vpop.xlane.xlu1 %2296 }
0x10bc   :  { %5323 = vrcp.f32 %v2297_v0 }
0x10bd   :  { %v2294_v61 = vpop.xlane.xlu0 %2293 }
0x10be   :  { %5325 = vrcp.f32 %v2294_v61 }
0x10c3   :  { %v2498_v33 = vpop.xlane.xlu1 %2497 }
0x10c4   :  { %5327 = vrcp.f32 %v2498_v33 }
0x10c5   :  { %v2495_v9 = vpop.xlane.xlu0 %2494 }
0x10c6   :  { %5329 = vrcp.f32 %v2495_v9 }
0x10c7   :  { %v2505_v58 = vpop.permute.xlu1 %2504 }
0x10c8   :  { %4979 = vmatpush3.bf16.msra.mxu0 %v2505_v58 }
0x10c9   :  { %v5324_v52 = vpop.eup %5323  ;;  %v2304_v36 = vpop.permute.xlu0 %2303  ;;  %4990 = vmatprep.subr.mxu0 %v2619_v26 }
0x10ca   :  { %4962 = vmatpush3.bf16.msra.mxu1 %v2304_v36  ;;  %v2301_v49 = vmul.f32 %v5324_v52, %v5316_v45  ;;  %v2704_v36 = vld [vmem:[%s6536_s16 + $0x10] sm:$0xff] }
0x10cb   :  { %v5326_v46 = vpop.eup %5325  ;;  %4984 = vmatprep.subr.bf16.mxu1 %v5409_v13 }
0x10cc   :  { %v2300_v57 = vmul.f32 %v5326_v46, %v5318_v10  ;;  %v2615_v46 = vld [vmem:[%s6535_s15 + $0x8] sm:$0xff] }
0x10cd   :  { %v2819_v24 = vpop.permute.xlu0 %2818 }
0x10ce   :  { %v2302_v19 = vpack.c.bf16 %v2301_v49, %v2300_v57  ;;  %v2703_v57 = vld [vmem:[%s6536_s16 + $0x8] sm:$0xff]  ;;  %v2614_v49 = vld [vmem:[%s6535_s15] sm:$0xff]  ;;  %s5423_s15 = smov 120  }
0x10d0   :  { %4964 = vmatmul.mubr.msk.bf16.vlgmr.msra.gmra.mxu1 %vm485_vm12, %v2302_v19  ;;  %v2702_v19 = vld [vmem:[%s6536_s16] sm:$0xff] }
0x10d1   :  { %v5328_v53 = vpop.eup %5327  ;;  %4986 = vmatprep.mubr.msk.bf16.mxu1 %vm5411_vm13, %v5409_v13  ;;  %4985 = vmatpush3.bf16.msra.mxu1 %v2569_v16 }
0x10d2   :  { %v2502_v62 = vmul.f32 %v5328_v53, %v5320_v42  ;;  %5005 = vmatprep.subr.mxu1 %v2707_v32  ;;  %v4489_v42 = vld [vmem:[%s6533_s13] ss:$0 sm:$0xff] }
0x10d3   :  { %v5330_v17 = vpop.eup %5329  ;;  %v2815_v53 = vld [vmem:[%s6537_s17] sm:$0xf]  ;;  %s5425_s17 = smov 88  }
0x10d4   :  { %v2501_v39 = vmul.f32 %v5330_v17, %v5322_v12 }
0x10d6   :  { %v2503_v5 = vpack.c.bf16 %v2502_v62, %v2501_v39  ;;  %v2817_v62 = vpop.permute.xlu1 %2816 }
0x10d8   :  { %4981 = vmatmul.mubr.msk.bf16.vlgmr.msra.gmra.mxu0 %vm485_vm12, %v2503_v5 }
0x10d9   :  { %4991 = vmatpush3.msra.mxu0 %v2619_v26 }
0x10da   :  { %4992 = vmatprep.subr.mxu0 %v2618_v31  ;;  %v2821_v26 = vpop.permute.xlu1 %2820 }
0x10db   :  { %4993 = vmatpush3.msra.mxu0 %v2618_v31 }
0x10dc   :  { %4994 = vmatprep.subr.mxu0 %v2617_v54 }
0x10dd   :  { %4995 = vmatpush3.msra.mxu0 %v2617_v54 }
0x10de   :  { %4996 = vmatprep.subr.mxu0 %v2616_v60 }
0x10df   :  { %4997 = vmatpush3.msra.mxu0 %v2616_v60 }
0x10e0   :  { %4998 = vmatprep.subr.mxu0 %v2615_v46 }
0x10e1   :  { %4999 = vmatpush3.msra.mxu0 %v2615_v46 }
0x10e2   :  { %5000 = vmatprep.subr.mxu0 %v2614_v49 }
0x10e3   :  { %5001 = vmatpush3.msra.mxu0 %v2614_v49 }
0x10e4   :  { %5020 = vmatprep.subr.msk.mxu0 %vm242_vm2, %v2815_v53 }
0x1190   :  { %v2343_v2 = vpop.f32.mrf.mxu1 }
0x1191   :  { %v2350_v44 = vadd.f32 %v2343_v2, %v6099_v22  ;;  %v2706_v22 = vld [vmem:[%s6536_s16 + $0x20] sm:$0xff] }
0x1192   :  { %v4965_v7 = vpop.f32.mrf.mxu1 }
0x1194   :  { %v2346_v59 = vpop.f32.mrf.mxu1 }
0x1195   :  { %v2351_v10 = vadd.f32 %v2346_v59, %v6102_v38  ;;  %v2705_v38 = vld [vmem:[%s6536_s16 + $0x18] sm:$0xff]  ;;  %s5424_s16 = smov 104  }
0x1196   :  { %v4966_v55 = vpop.f32.mrf.mxu1 }
0x1198   :  { %v2544_v15 = vpop.f32.mrf.mxu0 }
0x1199   :  { %v2551_v45 = vadd.f32 %v2544_v15, %v2350_v44 }
0x119a   :  { %v4982_v20 = vpop.f32.mrf.mxu0 }
0x119b   :  { %v2553_v1 = vmul.f32 0.16666667, %v2551_v45 }
0x119c   :  { %v2547_v51 = vpop.f32.mrf.mxu0 }
0x119d   :  { %v2552_v12 = vadd.f32 %v2547_v51, %v2351_v10  ;;  %v2562_v0 = vadd.f32 %v4489_v42, %v2553_v1 }
0x119e   :  { %v4983_v30 = vpop.f32.mrf.mxu0 }
0x119f   :  { %v2554_v61 = vmul.f32 0.16666667, %v2552_v12  ;;  %v2564_v9 = vmax.f32 %v2562_v0, 0.0 }
0x11a1   :  { %v2563_v33 = vadd.f32 %v4489_v42, %v2554_v61 }
0x11a3   :  { %v2565_v58 = vmax.f32 %v2563_v33, 0.0 }
0x11a5   :  { %v2568_v52 = vpack.c.bf16 %v2565_v58, %v2564_v9 }
0x11a7   :  { %4987 = vmatmul.mubr.msk.bf16.vlgmr.msra.gmra.mxu1 %vm485_vm12, %v2568_v52 }
0x11a8   :  { %5006 = vmatpush3.msra.mxu1 %v2707_v32  ;;  %v2823_v32 = vpop.permute.xlu0 %2822 }
0x11a9   :  { %5007 = vmatprep.subr.mxu1 %v2706_v22 }
0x11aa   :  { %5008 = vmatpush3.msra.mxu1 %v2706_v22 }
0x11ab   :  { %5009 = vmatprep.subr.mxu1 %v2705_v38 }
0x11ac   :  { %5010 = vmatpush3.msra.mxu1 %v2705_v38 }
0x11ad   :  { %5011 = vmatprep.subr.mxu1 %v2704_v36 }
0x11ae   :  { %5012 = vmatpush3.msra.mxu1 %v2704_v36 }
0x11af   :  { %5013 = vmatprep.subr.mxu1 %v2703_v57 }
0x11b0   :  { %5014 = vmatpush3.msra.mxu1 %v2703_v57 }
0x11b1   :  { %5015 = vmatprep.subr.mxu1 %v2702_v19 }
0x11b2   :  { %5016 = vmatpush3.msra.mxu1 %v2702_v19 }
0x1267   :  { %v2607_v17 = vpop.f32.mrf.mxu1 }
0x1268   :  { %5002 = vmatprep.mubr.msk.f32.mxu0 %vm2620_vm11, %v2607_v17  ;;  %5017 = vmatprep.mubr.msk.f32.mxu1 %vm2620_vm11, %v2607_v17 }
0x1269   :  { %v4988_v39 = vpop.f32.mrf.mxu1 }
0x126b   :  { %v2610_v5 = vpop.f32.mrf.mxu1 }
0x126c   :  { %v6188_v34 = vpack.c.bf16 %v2610_v5, %v2607_v17  ;;  %5003 = vmatmul.mubr.msk.f32.vlgmr.msra.gmra.mxu0 %vm2620_vm11, %v2610_v5  ;;  %5018 = vmatmul.mubr.msk.f32.vlgmr.msra.gmra.mxu1 %vm2620_vm11, %v2610_v5 }
0x126d   :  { %v4989_v16 = vpop.f32.mrf.mxu1  ;;  %5022 = vmatprep.mubr.msk.f32.mxu0 %vm1170_vm3, %v2817_v62  ;;  %5021 = vmatpush3.msk.msra.mxu0 %vm242_vm2, %v2815_v53 }
0x126e   :  { %5036 = vmatprep.mubr.msk.f32.mxu1 %vm403_vm9, %v5622_v14 }
0x1270   :  { %5023 = vmatmul.mubr.msk.f32.vlgmr.msra.gmra.mxu0 %vm1170_vm3, %v2819_v24 }
0x1271   :  { %5025 = vmatprep.mubr.msk.f32.mxu0 %vm1170_vm3, %v2821_v26 }
0x1274   :  { %5026 = vmatmul.mubr.msk.f32.gmra.mxu0 %vm1170_vm3, %v2823_v32 }
0x1275   :  { %5047 = vmatprep.mubr.msk.f32.mxu0 %vm403_vm9, %v5622_v14 }
0x132c   :  { %v6199_v31 = vpop.f32.mrf.mxu0  ;;  %v6228_v55 = vpop.f32.mrf.mxu1 }
0x132e   :  { %v6201_v54 = vpop.f32.mrf.mxu0  ;;  %v6235_v44 = vpop.f32.mrf.mxu1 }
0x1330   :  { %v6203_v60 = vpop.f32.mrf.mxu0 }
0x1332   :  { %v6205_v2 = vpop.f32.mrf.mxu0 }
0x1334   :  { %v6207_v7 = vpop.f32.mrf.mxu0 }
0x1335   :  { %3014 = vperm.xlu0 %5208, %v6207_v7   ;;  %3171 = vperm.xlu1 %5207, %v6207_v7  }
0x1336   :  { %5028 = vmatprep.subr.mxu1 %v6207_v7  ;;  %v6212_v59 = vpop.f32.mrf.mxu0 }
0x1337   :  { %5029 = vmatpush3.msra.mxu1 %v6207_v7 }
0x1338   :  { %5030 = vmatprep.subr.mxu1 %v6212_v59 }
0x1339   :  { %5031 = vmatpush3.msra.mxu1 %v6212_v59  ;;  %5209 = vset.pattern.permute.xlu0 %v5412_v56 }
0x133a   :  { %5210 = vset.pattern.permute.xlu1 %v5407_v43  ;;  %5032 = vmatprep.subr.mxu1 %v6203_v60 }
0x133b   :  { %3163 = vperm.xlu0 %5209, %v6203_v60   ;;  %3004 = vperm.xlu1 %5210, %v6203_v60  }
0x133c   :  { %5033 = vmatpush3.msra.mxu1 %v6203_v60 }
0x133d   :  { %5034 = vmatprep.subr.mxu1 %v6205_v2 }
0x133e   :  { %5035 = vmatpush3.msra.mxu1 %v6205_v2 }
0x133f   :  { %5037 = vmatmul.mubr.msk.f32.vlgmr.msra.gmra.mxu1 %vm403_vm9, %v5651_v27  ;;  %5214 = vset.pattern.permute.xlu0 %v5407_v43 }
0x1340   :  { %5211 = vset.pattern.permute.xlu1 %v5412_v56  ;;  %2999 = vperm.xlu0 %5214, %v6205_v2  }
0x1341   :  { %3167 = vperm.xlu1 %5211, %v6212_v59   ;;  %5058 = vmatprep.mubr.msk.f32.mxu1 %vm403_vm9, %v5622_v14 }
0x1344   :  { %5215 = vset.pattern.permute.xlu0 %v5412_v56 }
0x1345   :  { %5212 = vset.pattern.permute.xlu1 %v5407_v43  ;;  %3264 = vperm.xlu0 %5215, %v6235_v44  }
0x1346   :  { %3009 = vperm.xlu1 %5212, %v6212_v59  }
0x1349   :  { %5220 = vset.pattern.permute.xlu0 %v5407_v43 }
0x134a   :  { %5213 = vset.pattern.permute.xlu1 %v5412_v56 }
0x134b   :  { %3159 = vperm.xlu1 %5213, %v6205_v2  }
0x134f   :  { %3268 = vperm.xlu1 %5213, %v6228_v55  }
0x1353   :  { %5216 = vset.pattern.permute.xlu1 %v5407_v43 }
0x1354   :  { %3110 = vperm.xlu1 %5216, %v6235_v44  }
0x1358   :  { %5217 = vset.pattern.permute.xlu1 %v5412_v56 }
0x13b0   :  { %v3015_v15 = vpop.permute.xlu0 %3014  ;;  %v3172_v45 = vpop.permute.xlu1 %3171 }
0x13b1   :  { %v3020_v20 = vmul.f32 %v5634_v18, %v3015_v15  ;;  %v3177_v10 = vmul.f32 %v5634_v18, %v3172_v45 }
0x13b3   :  { %5039 = vmatprep.subr.mxu0 %v3020_v20  ;;  %5050 = vmatprep.subr.mxu1 %v3177_v10 }
0x13b4   :  { %5040 = vmatpush3.msra.mxu0 %v3020_v20  ;;  %5051 = vmatpush3.msra.mxu1 %v3177_v10 }
0x13b6   :  { %v3005_v1 = vpop.permute.xlu1 %3004  ;;  %v3164_v42 = vpop.permute.xlu0 %3163 }
0x13b7   :  { %v3175_v30 = vmul.f32 %v5648_v25, %v3164_v42  ;;  %v3018_v9 = vmul.f32 %v5648_v25, %v3005_v1 }
0x13bb   :  { %v3000_v33 = vpop.permute.xlu0 %2999 }
0x13bc   :  { %v3168_v51 = vpop.permute.xlu1 %3167  ;;  %v3017_v58 = vmul.f32 %v5655_v29, %v3000_v33 }
0x13bd   :  { %v3176_v12 = vmul.f32 %v5640_v21, %v3168_v51 }
0x13bf   :  { %5052 = vmatprep.subr.mxu1 %v3176_v12 }
0x13c0   :  { %5053 = vmatpush3.msra.mxu1 %v3176_v12  ;;  %v3265_v49 = vpop.permute.xlu0 %3264 }
0x13c1   :  { %v3010_v0 = vpop.permute.xlu1 %3009  ;;  %5054 = vmatprep.subr.mxu1 %v3175_v30 }
0x13c2   :  { %v3019_v61 = vmul.f32 %v5640_v21, %v3010_v0  ;;  %5055 = vmatpush3.msra.mxu1 %v3175_v30 }
0x13c4   :  { %5041 = vmatprep.subr.mxu0 %v3019_v61 }
0x13c5   :  { %5042 = vmatpush3.msra.mxu0 %v3019_v61 }
0x13c6   :  { %5043 = vmatprep.subr.mxu0 %v3018_v9  ;;  %v3160_v52 = vpop.permute.xlu1 %3159 }
0x13c7   :  { %v3174_v22 = vmul.f32 %v5655_v29, %v3160_v52  ;;  %5044 = vmatpush3.msra.mxu0 %v3018_v9 }
0x13c8   :  { %5045 = vmatprep.subr.mxu0 %v3017_v58 }
0x13c9   :  { %5046 = vmatpush3.msra.mxu0 %v3017_v58  ;;  %5056 = vmatprep.subr.mxu1 %v3174_v22 }
0x13ca   :  { %5048 = vmatmul.mubr.msk.f32.vlgmr.msra.gmra.mxu0 %vm403_vm9, %v5651_v27  ;;  %5057 = vmatpush3.msra.mxu1 %v3174_v22 }
0x13cb   :  { %5059 = vmatmul.mubr.msk.f32.vlgmr.msra.gmra.mxu1 %vm403_vm9, %v5651_v27  ;;  %5067 = vmatprep.subr.bf16.mxu1 %v5409_v13 }
0x13cc   :  { %5068 = vmatpush3.bf16.msra.mxu1 %v6188_v34  ;;  %5061 = vmatprep.subr.bf16.mxu0 %v5409_v13 }
0x13cd   :  { %5063 = vmatprep.mubr.msk.bf16.mxu0 %vm5411_vm13, %v5409_v13  ;;  %5069 = vmatprep.mubr.msk.bf16.mxu1 %vm5411_vm13, %v5409_v13 }
0x13ff   :  { %v5038_v38 = vpop.f32.mrf.mxu1 }
0x1400   :  { %v6268_v36 = vmul.f32 %v5885_v28, %v5038_v38 }
0x1401   :  { %v2986_v46 = vpop.f32.mrf.mxu1 }
0x1402   :  { %v6271_v57 = vmul.f32 %v5900_v37, %v2986_v46  ;;  %3183 = vperm.xlu1 %5217, %v6268_v36  }
0x1404   :  { %3023 = vperm.xlu0 %5220, %v6271_v57  }
0x1406   :  { %5218 = vset.pattern.permute.xlu1 %v5407_v43  ;;  %v3269_v43 = vpop.permute.xlu1 %3268 }
0x1407   :  { %3028 = vperm.xlu1 %5218, %v6268_v36  }
0x1408   :  { %3115 = vperm.xlu0 %5220, %v6228_v55  }
0x140b   :  { %5219 = vset.pattern.permute.xlu1 %v5412_v56  ;;  %v3111_v56 = vpop.permute.xlu1 %3110 }
0x140c   :  { %3179 = vperm.xlu1 %5219, %v6271_v57   ;;  %5221 = vset.pattern.permute.xlu0 %v5413_v40 }
0x1435   :  { %2783 = vxpose.xlu1.b32.start [1/2] (short) (narrow) %v6201_v54, 8 }
0x1439   :  { %2784 = vxpose.xlu1.b32.end [2/2] (short) (narrow) %v6199_v31, 8 }
0x1457   :  { %5222 = vset.pattern.permute.xlu1 %v5413_v40 }
0x1458   :  { %3411 = vperm.xlu1 %5222, %v6212_v59  }
0x145c   :  { %5223 = vset.pattern.permute.xlu1 %v5414_v11 }
0x145d   :  { %3616 = vperm.xlu1 %5223, %v6207_v7  }
0x1461   :  { %5224 = vset.pattern.permute.xlu1 %v5413_v40 }
0x1462   :  { %3407 = vperm.xlu1 %5224, %v6203_v60  }
0x1466   :  { %3403 = vperm.xlu1 %5224, %v6205_v2  }
0x146a   :  { %5226 = vset.pattern.permute.xlu1 %v5414_v11 }
0x147d   :  { %v3184_v28 = vpop.permute.xlu1 %3183 }
0x147e   :  { %v3187_v5 = vmul.f32 %v5689_v48, %v3184_v28 }
0x147f   :  { %v3024_v39 = vpop.permute.xlu0 %3023 }
0x1480   :  { %v3031_v24 = vmul.f32 %v5692_v50, %v3024_v39 }
0x1482   :  { %v3029_v37 = vpop.permute.xlu1 %3028 }
0x1483   :  { %v3032_v51 = vmul.f32 %v5689_v48, %v3029_v37  ;;  %v3116_v12 = vpop.permute.xlu0 %3115 }
0x1487   :  { %v3180_v53 = vpop.permute.xlu1 %3179 }
0x1488   :  { %v3186_v32 = vmul.f32 %v5692_v50, %v3180_v53 }
0x148a   :  { %v5049_v19 = vpop.f32.mrf.mxu0 }
0x148b   :  { %v5060_v17 = vpop.f32.mrf.mxu1  ;;  %v3105_v9 = vadd.f32 %v5049_v19, %v3032_v51 }
0x148c   :  { %v3099_v62 = vpop.f32.mrf.mxu0  ;;  %v3260_v15 = vadd.f32 %v5060_v17, %v3187_v5 }
0x148d   :  { %v3254_v16 = vpop.f32.mrf.mxu1  ;;  %v3100_v45 = vadd.f32 %v3099_v62, %v3031_v24 }
0x148e   :  { %v3255_v20 = vadd.f32 %v3254_v16, %v3186_v32 }
0x14b1   :  { %v6293_v26 = vpop.trf.xlu1 }
0x14b2   :  { %v3274_v31 = vrot.slane %v6293_v26, %v1620_v6  ;;  %v3121_v54 = vrot.slane %v6293_v26, %v5686_v47 }
0x14b4   :  { %v3276_v10 = vadd.f32 %v3274_v31, %v3269_v43  ;;  %v3275_v1 = vadd.f32 %v3274_v31, %v3265_v49  ;;  %v3122_v42 = vadd.f32 %v3121_v54, %v3111_v56  ;;  %v3123_v33 = vadd.f32 %v3121_v54, %v3116_v12 }
0x14b6   :  { %v3278_v30 = vadd.f32 %v3276_v10, %v3260_v15  ;;  %v3277_v0 = vadd.f32 %v3275_v1, %v3255_v20  ;;  %v3124_v61 = vadd.f32 %v3122_v42, %v3100_v45  ;;  %v3125_v38 = vadd.f32 %v3123_v33, %v3105_v9 }
0x14b8   :  { %vm3280_vm2 = vcmp.ge.f32.partialorder %v3278_v30, 0.0  ;;  %v3282_v58 = vmul.f32 0.2, %v3278_v30  ;;  %vm3279_vm3 = vcmp.ge.f32.partialorder %v3277_v0, 0.0  ;;  %v3281_v6 = vmul.f32 0.2, %v3277_v0 }
0x14b9   :  { %v3128_v22 = vmul.f32 0.2, %v3124_v61  ;;  %vm3126_vm14 = vcmp.ge.f32.partialorder %v3124_v61, 0.0  ;;  %v3129_v37 = vmul.f32 0.2, %v3125_v38  ;;  %vm3127_vm15 = vcmp.ge.f32.partialorder %v3125_v38, 0.0 }
0x14ba   :  { %v3284_v52 = vsel %vm3280_vm2, %v3278_v30, %v3282_v58  ;;  %v3283_v47 = vsel %vm3279_vm3, %v3277_v0, %v3281_v6 }
0x14bb   :  { %v3286_v46 = vsel %vm501_vm7, %v3284_v52, -1e+30  ;;  %v3285_v56 = vsel %vm500_vm10, %v3283_v47, -1e+30  ;;  %v3130_v28 = vsel %vm3126_vm14, %v3124_v61, %v3128_v22  ;;  %v3131_v53 = vsel %vm3127_vm15, %v3125_v38, %v3129_v37 }
0x14bc   :  { %v3290_v43 = vsel %vm485_vm12, %v3286_v46, -inf  ;;  %v3287_v49 = vsel %vm485_vm12, %v3285_v56, -inf  ;;  %v3132_v19 = vsel %vm500_vm10, %v3130_v28, -1e+30  ;;  %v3133_v39 = vsel %vm501_vm7, %v3131_v53, -1e+30 }
0x14bd   :  { %3291 = vmax.xlane.f32.xlu0 %v3290_v43  ;;  %v3134_v17 = vsel %vm485_vm12, %v3132_v19, -inf  ;;  %v3137_v62 = vsel %vm485_vm12, %v3133_v39, -inf }
0x14c1   :  { %3288 = vmax.xlane.f32.xlu0 %v3287_v49 }
0x14c5   :  { %3135 = vmax.xlane.f32.xlu0 %v3134_v17 }
0x14c9   :  { %3138 = vmax.xlane.f32.xlu0 %v3137_v62 }
0x14d3   :  { %v6314_v5 = vpop.permute.xlu1 %3411 }
0x14d8   :  { %v3617_v24 = vpop.permute.xlu1 %3616 }
0x14d9   :  { %v6317_v16 = vmul.f32 %v5634_v18, %v3617_v24  ;;  %v3420_v24 = vmul.f32 %v5640_v21, %v6314_v5 }
0x14db   :  { %5090 = vmatprep.subr.mxu1 %v6317_v16 }
0x14dd   :  { %v3408_v43 = vpop.permute.xlu1 %3407 }
0x14df   :  { %3415 = vperm.xlu0 %5221, %v6207_v7  }
0x14e1   :  { %v3404_v28 = vpop.permute.xlu1 %3403 }
0x14e3   :  { %3311 = vrot.lane.b32.xlu0 %v6188_v34, %s5423_s15 }
0x14e4   :  { %5225 = vset.pattern.permute.xlu0 %v5414_v11 }
0x14e7   :  { %3612 = vperm.xlu0 %5225, %v6212_v59  }
0x1546   :  { %v3292_v32 = vpop.xlane.xlu0 %3291 }
0x1547   :  { %v3294_v31 = vsub.f32 %v3286_v46, %v3292_v32  ;;  %v3419_v32 = vmul.f32 %v5648_v25, %v3408_v43 }
0x1549   :  { %v3297_v54 = vmul.f32 1.442695, %v3294_v31  ;;  %v3418_v31 = vmul.f32 %v5655_v29, %v3404_v28 }
0x154a   :  { %v3289_v15 = vpop.xlane.xlu0 %3288 }
0x154b   :  { %5331 = vpow2.f32 %v3297_v54  ;;  %v3293_v45 = vsub.f32 %v3285_v56, %v3289_v15 }
0x154d   :  { %v3295_v20 = vmul.f32 1.442695, %v3293_v45 }
0x154e   :  { %v3136_v10 = vpop.xlane.xlu0 %3135 }
0x154f   :  { %5333 = vpow2.f32 %v3295_v20  ;;  %v3140_v1 = vsub.f32 %v3132_v19, %v3136_v10 }
0x1551   :  { %v3142_v12 = vmul.f32 1.442695, %v3140_v1 }
0x1552   :  { %v3139_v42 = vpop.xlane.xlu0 %3138 }
0x1553   :  { %v3141_v51 = vsub.f32 %v3133_v39, %v3139_v42 }
0x1555   :  { %v3144_v30 = vmul.f32 1.442695, %v3141_v51 }
0x1557   :  { %5335 = vpow2.f32 %v3144_v30 }
0x1558   :  { %v5332_v0 = vpop.eup %5331  ;;  %5337 = vpow2.f32 %v3142_v12 }
0x1559   :  { %v3302_v61 = vsel %vm485_vm12, %v5332_v0, 0.0 }
0x155a   :  { %3303 = vadd.xlane.f32.xlu0 %v3302_v61  ;;  %v3416_v33 = vpop.permute.xlu0 %3415 }
0x155b   :  { %v3421_v6 = vmul.f32 %v5634_v18, %v3416_v33 }
0x155c   :  { %v5334_v9 = vpop.eup %5333 }
0x155d   :  { %v3299_v58 = vsel %vm485_vm12, %v5334_v9, 0.0 }
0x155e   :  { %3300 = vadd.xlane.f32.xlu1 %v3299_v58  ;;  %v3312_v52 = vpop.permute.xlu0 %3311 }
0x155f   :  { %5062 = vmatpush3.bf16.msra.mxu0 %v3312_v52  ;;  %v6558_v52 = vsub.s32 2, %v5612_v8 }
0x1560   :  { %5073 = vmatprep.subr.mxu0 %v3421_v6 }
0x1562   :  { %v3613_v56 = vpop.permute.xlu0 %3612 }
0x1563   :  { %v3621_v1 = vmul.f32 %v5640_v21, %v3613_v56 }
0x1564   :  { %v5336_v47 = vpop.eup %5335 }
0x1565   :  { %v3149_v22 = vsel %vm485_vm12, %v5336_v47, 0.0  ;;  %v5338_v38 = vpop.eup %5337 }
0x1566   :  { %3150 = vadd.xlane.f32.xlu0 %v3149_v22  ;;  %v3146_v46 = vsel %vm485_vm12, %v5338_v38, 0.0 }
0x156a   :  { %3147 = vadd.xlane.f32.xlu0 %v3146_v46 }
0x156f   :  { %3608 = vperm.xlu1 %5226, %v6203_v60  }
0x1573   :  { %5227 = vset.pattern.permute.xlu1 %v5413_v40 }
0x1574   :  { %3423 = vperm.xlu1 %5227, %v6271_v57  }
0x1578   :  { %3508 = vperm.xlu1 %5227, %v6235_v44  }
0x157c   :  { %3512 = vperm.xlu1 %5227, %v6228_v55  }
0x1580   :  { %5230 = vset.pattern.permute.xlu1 %v5414_v11  ;;  %3604 = vperm.xlu0 %5225, %v6205_v2  }
0x1581   :  { %3628 = vperm.xlu1 %5230, %v6268_v36  }
0x1584   :  { %5228 = vset.pattern.permute.xlu0 %v5413_v40 }
0x1585   :  { %3709 = vperm.xlu1 %5230, %v6235_v44   ;;  %3427 = vperm.xlu0 %5228, %v6268_v36  }
0x1589   :  { %5229 = vset.pattern.permute.xlu0 %v5414_v11  ;;  %5232 = vset.pattern.permute.xlu1 %v5416_v35 }
0x158a   :  { %3624 = vperm.xlu0 %5229, %v6271_v57  }
0x158e   :  { %3713 = vperm.xlu0 %5229, %v6228_v55  }
0x1592   :  { %5231 = vset.pattern.permute.xlu0 %v5416_v35 }
0x15e3   :  { %v3304_v37 = vpop.xlane.xlu0 %3303 }
0x15e4   :  { %5339 = vrcp.f32 %v3304_v37 }
0x15e7   :  { %v3301_v40 = vpop.xlane.xlu1 %3300 }
0x15e8   :  { %5341 = vrcp.f32 %v3301_v40 }
0x15eb   :  { %v3609_v10 = vpop.permute.xlu1 %3608 }
0x15ec   :  { %v3620_v51 = vmul.f32 %v5648_v25, %v3609_v10 }
0x15ef   :  { %v3151_v49 = vpop.xlane.xlu0 %3150 }
0x15f0   :  { %5343 = vrcp.f32 %v3151_v49 }
0x15f1   :  { %v5340_v19 = vpop.eup %5339 }
0x15f2   :  { %v3308_v39 = vmul.f32 %v5340_v19, %v5332_v0 }
0x15f3   :  { %v3148_v53 = vpop.xlane.xlu0 %3147 }
0x15f4   :  { %5345 = vrcp.f32 %v3148_v53 }
0x15f5   :  { %v5342_v11 = vpop.eup %5341 }
0x15f6   :  { %v3307_v17 = vmul.f32 %v5342_v11, %v5334_v9 }
0x15f8   :  { %v3309_v62 = vpack.c.bf16 %v3308_v39, %v3307_v17 }
0x15fa   :  { %5064 = vmatmul.mubr.msk.bf16.vlgmr.msra.gmra.mxu0 %vm485_vm12, %v3309_v62 }
0x15fb   :  { %5074 = vmatpush3.msra.mxu0 %v3421_v6  ;;  %5081 = vmatprep.mubr.msk.f32.mxu0 %vm403_vm9, %v5622_v14  ;;  %v3605_v42 = vpop.permute.xlu0 %3604 }
0x15fc   :  { %5075 = vmatprep.subr.mxu0 %v3420_v24  ;;  %v3619_v12 = vmul.f32 %v5655_v29, %v3605_v42 }
0x15fd   :  { %5076 = vmatpush3.msra.mxu0 %v3420_v24  ;;  %v5344_v54 = vpop.eup %5343 }
0x15fe   :  { %5077 = vmatprep.subr.mxu0 %v3419_v32  ;;  %v3155_v45 = vmul.f32 %v5344_v54, %v5336_v47  ;;  %v3518_v47 = vrot.slane %v6293_v26, %v6558_v52 }
0x15ff   :  { %5078 = vmatpush3.msra.mxu0 %v3419_v32 }
0x1600   :  { %5079 = vmatprep.subr.mxu0 %v3418_v31  ;;  %v3428_v33 = vpop.permute.xlu0 %3427 }
0x1601   :  { %v5346_v15 = vpop.eup %5345  ;;  %5080 = vmatpush3.msra.mxu0 %v3418_v31  ;;  %v3431_v22 = vmul.f32 %v5689_v48, %v3428_v33 }
0x1602   :  { %5082 = vmatmul.mubr.msk.f32.vlgmr.msra.gmra.mxu0 %vm403_vm9, %v5651_v27  ;;  %v3154_v5 = vmul.f32 %v5346_v15, %v5338_v38  ;;  %5084 = vmatprep.subr.bf16.mxu0 %v5409_v13 }
0x1603   :  { %5086 = vmatprep.mubr.msk.bf16.mxu0 %vm5411_vm13, %v5409_v13 }
0x1604   :  { %v3156_v20 = vpack.c.bf16 %v3155_v45, %v3154_v5 }
0x1605   :  { %v3625_v19 = vpop.permute.xlu0 %3624 }
0x1606   :  { %5070 = vmatmul.mubr.msk.bf16.vlgmr.msra.gmra.mxu1 %vm485_vm12, %v3156_v20  ;;  %v3631_v33 = vmul.f32 %v5692_v50, %v3625_v19 }
0x1607   :  { %5091 = vmatpush3.msra.mxu1 %v6317_v16  ;;  %5098 = vmatprep.mubr.msk.f32.mxu1 %vm403_vm9, %v5622_v14  ;;  %v3424_v16 = vpop.permute.xlu1 %3423 }
0x1608   :  { %5092 = vmatprep.subr.mxu1 %v3621_v1  ;;  %v3430_v46 = vmul.f32 %v5692_v50, %v3424_v16 }
0x1609   :  { %5093 = vmatpush3.msra.mxu1 %v3621_v1  ;;  %v3714_v10 = vpop.permute.xlu0 %3713 }
0x160a   :  { %5094 = vmatprep.subr.mxu1 %v3620_v51 }
0x160b   :  { %5095 = vmatpush3.msra.mxu1 %v3620_v51  ;;  %v3509_v30 = vpop.permute.xlu1 %3508 }
0x160c   :  { %5096 = vmatprep.subr.mxu1 %v3619_v12  ;;  %v3519_v37 = vadd.f32 %v3518_v47, %v3509_v30 }
0x160d   :  { %5097 = vmatpush3.msra.mxu1 %v3619_v12  ;;  %v6559_v12 = vsub.s32 3, %v5612_v8 }
0x160e   :  { %5099 = vmatmul.mubr.msk.f32.vlgmr.msra.gmra.mxu1 %vm403_vm9, %v5651_v27  ;;  %5101 = vmatprep.subr.bf16.mxu1 %v5409_v13 }
0x160f   :  { %5103 = vmatprep.mubr.msk.bf16.mxu1 %vm5411_vm13, %v5409_v13  ;;  %v3513_v58 = vpop.permute.xlu1 %3512  ;;  %v3719_v16 = vrot.slane %v6293_v26, %v6559_v12 }
0x1610   :  { %v3520_v43 = vadd.f32 %v3518_v47, %v3513_v58 }
0x1613   :  { %v3629_v62 = vpop.permute.xlu1 %3628 }
0x1614   :  { %v3632_v51 = vmul.f32 %v5689_v48, %v3629_v62 }
0x16ba   :  { %v3351_v0 = vpop.f32.mrf.mxu0 }
0x16bc   :  { %v5065_v61 = vpop.f32.mrf.mxu0 }
0x16be   :  { %v3354_v9 = vpop.f32.mrf.mxu0 }
0x16c0   :  { %v5066_v6 = vpop.f32.mrf.mxu0 }
0x16c2   :  { %v5083_v38 = vpop.f32.mrf.mxu0 }
0x16c3   :  { %v3504_v56 = vadd.f32 %v5083_v38, %v3431_v22 }
0x16c4   :  { %v3498_v28 = vpop.f32.mrf.mxu0 }
0x16c5   :  { %v3522_v40 = vadd.f32 %v3520_v43, %v3504_v56  ;;  %v3499_v49 = vadd.f32 %v3498_v28, %v3430_v46 }
0x16c6   :  { %v3395_v53 = vpop.f32.mrf.mxu1 }
0x16c7   :  { %v3526_v11 = vmul.f32 0.2, %v3522_v40  ;;  %v3521_v17 = vadd.f32 %v3519_v37, %v3499_v49  ;;  %v6374_v39 = vadd.f32 %v3395_v53, %v3351_v0  ;;  %vm3524_vm1 = vcmp.ge.f32.partialorder %v3522_v40, 0.0  ;;  %v3710_v0 = vpop.permute.xlu1 %3709 }
0x16c8   :  { %v5071_v24 = vpop.f32.mrf.mxu1  ;;  %v3720_v52 = vadd.f32 %v3719_v16, %v3710_v0 }
0x16c9   :  { %v3525_v32 = vmul.f32 0.2, %v3521_v17  ;;  %v3528_v31 = vsel %vm3524_vm1, %v3522_v40, %v3526_v11  ;;  %vm3523_vm4 = vcmp.ge.f32.partialorder %v3521_v17, 0.0 }
0x16ca   :  { %v3398_v54 = vpop.f32.mrf.mxu1  ;;  %v3530_v15 = vsel %vm501_vm7, %v3528_v31, -1e+30 }
0x16cb   :  { %v6378_v5 = vadd.f32 %v3398_v54, %v3354_v9  ;;  %v3534_v45 = vsel %vm485_vm12, %v3530_v15, -inf  ;;  %v3527_v20 = vsel %vm3523_vm4, %v3521_v17, %v3525_v32  ;;  %v3721_v9 = vadd.f32 %v3719_v16, %v3714_v10 }
0x16cc   :  { %v5072_v1 = vpop.f32.mrf.mxu1  ;;  %3535 = vmax.xlane.f32.xlu0 %v3534_v45  ;;  %v3529_v42 = vsel %vm500_vm10, %v3527_v20, -1e+30 }
0x16cd   :  { %v3531_v30 = vsel %vm485_vm12, %v3529_v42, -inf }
0x16ce   :  { %v5100_v61 = vpop.f32.mrf.mxu1  ;;  %3532 = vmax.xlane.f32.xlu1 %v3531_v30 }
0x16cf   :  { %v3705_v58 = vadd.f32 %v5100_v61, %v3632_v51 }
0x16d0   :  { %v3699_v6 = vpop.f32.mrf.mxu1 }
0x16d1   :  { %v3723_v47 = vadd.f32 %v3721_v9, %v3705_v58  ;;  %v3700_v22 = vadd.f32 %v3699_v6, %v3631_v33 }
0x16d3   :  { %v3727_v38 = vmul.f32 0.2, %v3723_v47  ;;  %v3722_v46 = vadd.f32 %v3720_v52, %v3700_v22  ;;  %vm3725_vm5 = vcmp.ge.f32.partialorder %v3723_v47, 0.0 }
0x16d5   :  { %v3726_v43 = vmul.f32 0.2, %v3722_v46  ;;  %v3729_v56 = vsel %vm3725_vm5, %v3723_v47, %v3727_v38  ;;  %vm3724_vm6 = vcmp.ge.f32.partialorder %v3722_v46, 0.0 }
0x16d6   :  { %v3731_v28 = vsel %vm501_vm7, %v3729_v56, -1e+30 }
0x16d7   :  { %v3735_v37 = vsel %vm485_vm12, %v3731_v28, -inf  ;;  %v3728_v40 = vsel %vm3724_vm6, %v3722_v46, %v3726_v43 }
0x16d8   :  { %3736 = vmax.xlane.f32.xlu1 %v3735_v37  ;;  %v3730_v49 = vsel %vm500_vm10, %v3728_v40, -1e+30 }
0x16d9   :  { %v3732_v19 = vsel %vm485_vm12, %v3730_v49, -inf }
0x16da   :  { %3733 = vmax.xlane.f32.xlu0 %v3732_v19 }
0x16e9   :  { %3813 = vperm.xlu1 %5232, %v6212_v59  }
0x16ed   :  { %5233 = vset.pattern.permute.xlu1 %v5417_v63 }
0x16ee   :  { %4018 = vperm.xlu1 %5233, %v6207_v7  }
0x16f0   :  { %3817 = vperm.xlu0 %5231, %v6207_v7  }
0x16f2   :  { %3554 = vrot.lane.b32.xlu1 %v6188_v34, %s5415_s10 }
0x16f3   :  { %5234 = vset.pattern.permute.xlu1 %v5416_v35 }
0x16f4   :  { %5238 = vset.pattern.permute.xlu0 %v5417_v63 }
0x16f6   :  { %3809 = vperm.xlu1 %5234, %v6203_v60  }
0x16fa   :  { %5235 = vset.pattern.permute.xlu1 %v5417_v63 }
0x16fb   :  { %4014 = vperm.xlu1 %5235, %v6212_v59  }
0x16ff   :  { %3755 = vrot.lane.b32.xlu1 %v6188_v34, %s5424_s16 }
0x1700   :  { %5236 = vset.pattern.permute.xlu1 %v5416_v35 }
0x1703   :  { %3805 = vperm.xlu1 %5236, %v6205_v2  }
0x1707   :  { %5237 = vset.pattern.permute.xlu1 %v5417_v63 }
0x1755   :  { %v3536_v7 = vpop.xlane.xlu0 %3535 }
0x1756   :  { %v3538_v53 = vsub.f32 %v3530_v15, %v3536_v7 }
0x1757   :  { %v3533_v11 = vpop.xlane.xlu1 %3532 }
0x1758   :  { %v3541_v17 = vmul.f32 1.442695, %v3538_v53  ;;  %v3537_v62 = vsub.f32 %v3529_v42, %v3533_v11 }
0x175a   :  { %5347 = vpow2.f32 %v3541_v17  ;;  %v3539_v24 = vmul.f32 1.442695, %v3537_v62 }
0x175c   :  { %5349 = vpow2.f32 %v3539_v24 }
0x1761   :  { %v3737_v32 = vpop.xlane.xlu1 %3736 }
0x1762   :  { %v3739_v31 = vsub.f32 %v3731_v28, %v3737_v32 }
0x1763   :  { %v3734_v59 = vpop.xlane.xlu0 %3733 }
0x1764   :  { %v3742_v54 = vmul.f32 1.442695, %v3739_v31  ;;  %v3738_v45 = vsub.f32 %v3730_v49, %v3734_v59 }
0x1765   :  { %v3814_v20 = vpop.permute.xlu1 %3813 }
0x1766   :  { %5351 = vpow2.f32 %v3742_v54  ;;  %v3740_v10 = vmul.f32 1.442695, %v3738_v45 }
0x1767   :  { %v5348_v1 = vpop.eup %5347 }
0x1768   :  { %5353 = vpow2.f32 %v3740_v10  ;;  %v3546_v51 = vsel %vm485_vm12, %v5348_v1, 0.0 }
0x1769   :  { %v5350_v12 = vpop.eup %5349  ;;  %3547 = vadd.xlane.f32.xlu1 %v3546_v51  ;;  %v4019_v15 = vpop.permute.xlu1 %4018 }
0x176a   :  { %v3543_v42 = vsel %vm485_vm12, %v5350_v12, 0.0  ;;  %v4024_v47 = vmul.f32 %v5634_v18, %v4019_v15 }
0x176b   :  { %v3818_v16 = vpop.permute.xlu0 %3817  ;;  %3544 = vadd.xlane.f32.xlu0 %v3543_v42 }
0x176c   :  { %v3823_v30 = vmul.f32 %v5634_v18, %v3818_v16 }
0x176d   :  { %v3555_v0 = vpop.permute.xlu1 %3554 }
0x176e   :  { %5085 = vmatpush3.bf16.msra.mxu0 %v3555_v0 }
0x176f   :  { %5107 = vmatprep.subr.mxu0 %v3823_v30 }
0x1771   :  { %v3810_v61 = vpop.permute.xlu1 %3809 }
0x1773   :  { %v5352_v33 = vpop.eup %5351 }
0x1774   :  { %v3747_v9 = vsel %vm485_vm12, %v5352_v33, 0.0 }
0x1775   :  { %v5354_v58 = vpop.eup %5353  ;;  %3748 = vadd.xlane.f32.xlu1 %v3747_v9 }
0x1776   :  { %v4015_v6 = vpop.permute.xlu1 %4014  ;;  %v3744_v52 = vsel %vm485_vm12, %v5354_v58, 0.0 }
0x1777   :  { %3745 = vadd.xlane.f32.xlu0 %v3744_v52  ;;  %v4023_v53 = vmul.f32 %v5640_v21, %v4015_v6 }
0x177a   :  { %v3756_v22 = vpop.permute.xlu1 %3755 }
0x177b   :  { %5102 = vmatpush3.bf16.msra.mxu1 %v3756_v22 }
0x177c   :  { %5124 = vmatprep.subr.mxu1 %v4024_v47 }
0x177e   :  { %v3806_v18 = vpop.permute.xlu1 %3805 }
0x1786   :  { %4010 = vperm.xlu1 %5237, %v6203_v60  }
0x178a   :  { %5239 = vset.pattern.permute.xlu1 %v5416_v35 }
0x178b   :  { %3825 = vperm.xlu1 %5239, %v6271_v57  }
0x178d   :  { %4006 = vperm.xlu0 %5238, %v6205_v2  }
0x178f   :  { %3829 = vperm.xlu1 %5239, %v6268_v36  }
0x1791   :  { %5240 = vset.pattern.permute.xlu0 %v5416_v35 }
0x1792   :  { %3910 = vperm.xlu0 %5240, %v6235_v44  }
0x1793   :  { %3914 = vperm.xlu1 %5239, %v6228_v55  }
0x1796   :  { %5242 = vset.pattern.permute.xlu0 %v5417_v63 }
0x1797   :  { %4030 = vperm.xlu0 %5242, %v6268_v36   ;;  %5241 = vset.pattern.permute.xlu1 %v5417_v63 }
0x1798   :  { %4026 = vperm.xlu1 %5241, %v6271_v57   ;;  %v3822_v57 = vmul.f32 %v5640_v21, %v3814_v20 }
0x179c   :  { %4111 = vperm.xlu1 %5241, %v6235_v44   ;;  %v3820_v44 = vmul.f32 %v5655_v29, %v3806_v18 }
0x17a0   :  { %4115 = vperm.xlu1 %5241, %v6228_v55   ;;  %v3821_v55 = vmul.f32 %v5648_v25, %v3810_v61 }
0x17f2   :  { %v3548_v60 = vpop.xlane.xlu1 %3547 }
0x17f3   :  { %5355 = vrcp.f32 %v3548_v60 }
0x17f4   :  { %v3545_v35 = vpop.xlane.xlu0 %3544 }
0x17f5   :  { %5357 = vrcp.f32 %v3545_v35 }
0x17fe   :  { %v3749_v2 = vpop.xlane.xlu1 %3748 }
0x17ff   :  { %5359 = vrcp.f32 %v3749_v2 }
0x1800   :  { %v5356_v38 = vpop.eup %5355  ;;  %v3746_v46 = vpop.xlane.xlu0 %3745 }
0x1801   :  { %5361 = vrcp.f32 %v3746_v46  ;;  %v3552_v56 = vmul.f32 %v5356_v38, %v5348_v1 }
0x1802   :  { %v5358_v43 = vpop.eup %5357  ;;  %v4011_v7 = vpop.permute.xlu1 %4010 }
0x1803   :  { %v3551_v36 = vmul.f32 %v5358_v43, %v5350_v12  ;;  %v4022_v17 = vmul.f32 %v5648_v25, %v4011_v7 }
0x1805   :  { %v3553_v63 = vpack.c.bf16 %v3552_v56, %v3551_v36  ;;  %v4121_v36 = vrot.slane %v6293_v26, %v2467_v4 }
0x1806   :  { %v3826_v21 = vpop.permute.xlu1 %3825 }
0x1807   :  { %5087 = vmatmul.mubr.msk.bf16.vlgmr.msra.gmra.mxu0 %vm485_vm12, %v3553_v63  ;;  %v3832_v51 = vmul.f32 %v5692_v50, %v3826_v21 }
0x1808   :  { %5108 = vmatpush3.msra.mxu0 %v3823_v30  ;;  %5115 = vmatprep.mubr.msk.f32.mxu0 %vm403_vm9, %v5622_v14  ;;  %v4007_v11 = vpop.permute.xlu0 %4006 }
0x1809   :  { %5109 = vmatprep.subr.mxu0 %v3822_v57  ;;  %v4021_v62 = vmul.f32 %v5655_v29, %v4007_v11 }
0x180a   :  { %5110 = vmatpush3.msra.mxu0 %v3822_v57 }
0x180b   :  { %5111 = vmatprep.subr.mxu0 %v3821_v55 }
0x180c   :  { %v5360_v28 = vpop.eup %5359  ;;  %5112 = vmatpush3.msra.mxu0 %v3821_v55 }
0x180d   :  { %5113 = vmatprep.subr.mxu0 %v3820_v44  ;;  %v3753_v49 = vmul.f32 %v5360_v28, %v5352_v33  ;;  %v3911_v10 = vpop.permute.xlu0 %3910 }
0x180e   :  { %v5362_v37 = vpop.eup %5361  ;;  %5114 = vmatpush3.msra.mxu0 %v3820_v44 }
0x180f   :  { %5116 = vmatmul.mubr.msk.f32.vlgmr.msra.gmra.mxu0 %vm403_vm9, %v5651_v27  ;;  %v3752_v40 = vmul.f32 %v5362_v37, %v5354_v58  ;;  %5118 = vmatprep.subr.bf16.mxu0 %v5409_v13 }
0x1810   :  { %5120 = vmatprep.mubr.msk.bf16.mxu0 %vm5411_vm13, %v5409_v13 }
0x1811   :  { %v3754_v19 = vpack.c.bf16 %v3753_v49, %v3752_v40 }
0x1812   :  { %v4031_v52 = vpop.permute.xlu0 %4030 }
0x1813   :  { %5104 = vmatmul.mubr.msk.bf16.vlgmr.msra.gmra.mxu1 %vm485_vm12, %v3754_v19  ;;  %v4034_v43 = vmul.f32 %v5689_v48, %v4031_v52 }
0x1814   :  { %5125 = vmatpush3.msra.mxu1 %v4024_v47  ;;  %5132 = vmatprep.mubr.msk.f32.mxu1 %vm403_vm9, %v5622_v14  ;;  %v3830_v14 = vpop.permute.xlu1 %3829 }
0x1815   :  { %5126 = vmatprep.subr.mxu1 %v4023_v53  ;;  %v3833_v20 = vmul.f32 %v5689_v48, %v3830_v14 }
0x1816   :  { %5127 = vmatpush3.msra.mxu1 %v4023_v53 }
0x1817   :  { %5128 = vmatprep.subr.mxu1 %v4022_v17 }
0x1818   :  { %5129 = vmatpush3.msra.mxu1 %v4022_v17  ;;  %v3915_v24 = vpop.permute.xlu1 %3914 }
0x1819   :  { %5130 = vmatprep.subr.mxu1 %v4021_v62 }
0x181a   :  { %5131 = vmatpush3.msra.mxu1 %v4021_v62 }
0x181b   :  { %5133 = vmatmul.mubr.msk.f32.vlgmr.msra.gmra.mxu1 %vm403_vm9, %v5651_v27  ;;  %5135 = vmatprep.subr.bf16.mxu1 %v5409_v13  ;;  %v3920_v27 = vrot.slane %v6293_v26, %v2266_v23 }
0x181c   :  { %5137 = vmatprep.mubr.msk.bf16.mxu1 %vm5411_vm13, %v5409_v13  ;;  %v4027_v54 = vpop.permute.xlu1 %4026 }
0x181d   :  { %v3922_v12 = vadd.f32 %v3920_v27, %v3915_v24  ;;  %v4033_v57 = vmul.f32 %v5692_v50, %v4027_v54 }
0x1820   :  { %v4112_v0 = vpop.permute.xlu1 %4111 }
0x1821   :  { %v4122_v37 = vadd.f32 %v4121_v36, %v4112_v0 }
0x1824   :  { %v4116_v2 = vpop.permute.xlu1 %4115 }
0x1825   :  { %v4123_v55 = vadd.f32 %v4121_v36, %v4116_v2 }
0x18c7   :  { %v3594_v25 = vpop.f32.mrf.mxu0 }
0x18c8   :  { %v3601_v32 = vadd.f32 %v3594_v25, %v6374_v39  ;;  %v3921_v39 = vadd.f32 %v3920_v27, %v3911_v10 }
0x18c9   :  { %v5088_v31 = vpop.f32.mrf.mxu0 }
0x18cb   :  { %v3597_v29 = vpop.f32.mrf.mxu0 }
0x18cc   :  { %v3602_v59 = vadd.f32 %v3597_v29, %v6378_v5 }
0x18cd   :  { %v5089_v45 = vpop.f32.mrf.mxu0 }
0x18cf   :  { %v5117_v1 = vpop.f32.mrf.mxu0 }
0x18d0   :  { %v3906_v15 = vadd.f32 %v5117_v1, %v3833_v20 }
0x18d1   :  { %v3900_v42 = vpop.f32.mrf.mxu0 }
0x18d2   :  { %v3924_v16 = vadd.f32 %v3922_v12, %v3906_v15  ;;  %v3901_v30 = vadd.f32 %v3900_v42, %v3832_v51 }
0x18d3   :  { %v3795_v5 = vpop.f32.mrf.mxu1 }
0x18d4   :  { %v3928_v61 = vmul.f32 0.2, %v3924_v16  ;;  %v3923_v33 = vadd.f32 %v3921_v39, %v3901_v30  ;;  %v6459_v9 = vadd.f32 %v3795_v5, %v3601_v32  ;;  %vm3926_vm9 = vcmp.ge.f32.partialorder %v3924_v16, 0.0 }
0x18d5   :  { %v5105_v58 = vpop.f32.mrf.mxu1 }
0x18d6   :  { %v3927_v6 = vmul.f32 0.2, %v3923_v33  ;;  %v3930_v23 = vsel %vm3926_vm9, %v3924_v16, %v3928_v61  ;;  %vm3925_vm8 = vcmp.ge.f32.partialorder %v3923_v33, 0.0 }
0x18d7   :  { %v3798_v47 = vpop.f32.mrf.mxu1  ;;  %v3932_v22 = vsel %vm501_vm7, %v3930_v23, -1e+30 }
0x18d8   :  { %v6463_v18 = vadd.f32 %v3798_v47, %v3602_v59  ;;  %v3936_v60 = vsel %vm485_vm12, %v3932_v22, -inf  ;;  %v3929_v35 = vsel %vm3925_vm8, %v3923_v33, %v3927_v6 }
0x18d9   :  { %v5106_v38 = vpop.f32.mrf.mxu1  ;;  %3937 = vmax.xlane.f32.xlu1 %v3936_v60  ;;  %v3931_v46 = vsel %vm500_vm10, %v3929_v35, -1e+30  ;;  %v4521_v35 = vld [vmem:[%s6560_s9] ss:$0 sm:$0xff] }
0x18da   :  { %v3933_v56 = vsel %vm485_vm12, %v3931_v46, -inf }
0x18db   :  { %v5134_v63 = vpop.f32.mrf.mxu1  ;;  %3934 = vmax.xlane.f32.xlu0 %v3933_v56 }
0x18dc   :  { %v4107_v44 = vadd.f32 %v5134_v63, %v4034_v43 }
0x18dd   :  { %v4101_v28 = vpop.f32.mrf.mxu1 }
0x18de   :  { %v4125_v40 = vadd.f32 %v4123_v55, %v4107_v44  ;;  %v4102_v49 = vadd.f32 %v4101_v28, %v4033_v57 }
0x18e0   :  { %v4129_v19 = vmul.f32 0.2, %v4125_v40  ;;  %v4124_v7 = vadd.f32 %v4122_v37, %v4102_v49  ;;  %vm4127_vm11 = vcmp.ge.f32.partialorder %v4125_v40, 0.0 }
0x18e2   :  { %v4128_v48 = vmul.f32 0.2, %v4124_v7  ;;  %vm4126_vm2 = vcmp.ge.f32.partialorder %v4124_v7, 0.0  ;;  %v4131_v11 = vsel %vm4127_vm11, %v4125_v40, %v4129_v19 }
0x18e3   :  { %v4133_v50 = vsel %vm501_vm7, %v4131_v11, -1e+30  ;;  %vm4224_vm7 = vcmp.eq.s32.totalorder %v5612_v8, %v4521_v35  ;;  %v4520_v8 = vld [vmem:[%s6538_s18] ss:$0 sm:$0xff] }
0x18e4   :  { %v4130_v53 = vsel %vm4126_vm2, %v4124_v7, %v4128_v48  ;;  %v4137_v17 = vsel %vm485_vm12, %v4133_v50, -inf  ;;  %v4522_v2 = vsel %vm4224_vm7, 1.0, %v5409_v13 }
0x18e5   :  { %v4132_v4 = vsel %vm500_vm10, %v4130_v53, -1e+30  ;;  %vm4227_vm10 = vcmask 123904  }
0x18e6   :  { %v4134_v26 = vsel %vm485_vm12, %v4132_v4, -inf  ;;  %v4228_v38 = vsel %vm4227_vm10, %v4522_v2, 0.0 }
0x18e7   :  { %4135 = vmax.xlane.f32.xlu0 %v4134_v26 }
0x18eb   :  { %4138 = vmax.xlane.f32.xlu0 %v4137_v17 }
0x1962   :  { %v3938_v62 = vpop.xlane.xlu1 %3937 }
0x1963   :  { %v3940_v21 = vsub.f32 %v3932_v22, %v3938_v62 }
0x1964   :  { %v3935_v14 = vpop.xlane.xlu0 %3934 }
0x1965   :  { %v3943_v24 = vmul.f32 1.442695, %v3940_v21  ;;  %v3939_v25 = vsub.f32 %v3931_v46, %v3935_v14 }
0x1967   :  { %5363 = vpow2.f32 %v3943_v24  ;;  %v3941_v32 = vmul.f32 1.442695, %v3939_v25  ;;  %v4524_v24 = vld [vmem:[%s6540_s20] ss:$0 sm:$0xff] }
0x1969   :  { %5365 = vpow2.f32 %v3941_v32 }
0x1970   :  { %v4136_v31 = vpop.xlane.xlu0 %4135 }
0x1971   :  { %v4140_v41 = vsub.f32 %v4132_v4, %v4136_v31 }
0x1973   :  { %v4142_v29 = vmul.f32 1.442695, %v4140_v41 }
0x1974   :  { %v5364_v59 = vpop.eup %5363  ;;  %v4139_v54 = vpop.xlane.xlu0 %4138 }
0x1975   :  { %5367 = vpow2.f32 %v4142_v29  ;;  %v4141_v45 = vsub.f32 %v4133_v50, %v4139_v54  ;;  %v3948_v3 = vsel %vm485_vm12, %v5364_v59, 0.0 }
0x1976   :  { %v5366_v20 = vpop.eup %5365  ;;  %3949 = vadd.xlane.f32.xlu0 %v3948_v3 }
0x1977   :  { %v4144_v27 = vmul.f32 1.442695, %v4141_v45  ;;  %v3945_v10 = vsel %vm485_vm12, %v5366_v20, 0.0 }
0x1978   :  { %3946 = vadd.xlane.f32.xlu1 %v3945_v10 }
0x1979   :  { %5369 = vpow2.f32 %v4144_v27 }
0x1982   :  { %v5368_v1 = vpop.eup %5367 }
0x1983   :  { %v4146_v51 = vsel %vm485_vm12, %v5368_v1, 0.0 }
0x1984   :  { %4147 = vadd.xlane.f32.xlu1 %v4146_v51 }
0x1986   :  { %v5370_v12 = vpop.eup %5369 }
0x1987   :  { %v4149_v15 = vsel %vm485_vm12, %v5370_v12, 0.0 }
0x1988   :  { %4150 = vadd.xlane.f32.xlu0 %v4149_v15 }
0x1995   :  { %3956 = vrot.lane.b32.xlu1 %v6188_v34, %s5418_s11 }
0x199e   :  { %4157 = vrot.lane.b32.xlu0 %v6188_v34, %s5425_s17 }
0x19b9   :  { %4229 = vadd.xlane.f32.xlu1 %v4228_v38 }
0x19ff   :  { %v3950_v42 = vpop.xlane.xlu0 %3949 }
0x1a00   :  { %5371 = vrcp.f32 %v3950_v42 }
0x1a01   :  { %v3947_v39 = vpop.xlane.xlu1 %3946 }
0x1a02   :  { %5373 = vrcp.f32 %v3947_v39 }
0x1a0d   :  { %v5372_v16 = vpop.eup %5371  ;;  %v4148_v30 = vpop.xlane.xlu1 %4147 }
0x1a0e   :  { %5375 = vrcp.f32 %v4148_v30  ;;  %v3954_v61 = vmul.f32 %v5372_v16, %v5364_v59 }
0x1a0f   :  { %v5374_v0 = vpop.eup %5373 }
0x1a10   :  { %v3953_v5 = vmul.f32 %v5374_v0, %v5366_v20 }
0x1a11   :  { %v4151_v33 = vpop.xlane.xlu0 %4150  ;;  %v3957_v58 = vpop.permute.xlu1 %3956 }
0x1a12   :  { %5377 = vrcp.f32 %v4151_v33  ;;  %5119 = vmatpush3.bf16.msra.mxu0 %v3957_v58  ;;  %v3955_v6 = vpack.c.bf16 %v3954_v61, %v3953_v5 }
0x1a13   :  { %5141 = vmatprep.subr.mxu0 %v5409_v13 }
0x1a15   :  { %v4158_v23 = vpop.permute.xlu0 %4157  ;;  %5121 = vmatmul.mubr.msk.bf16.vlgmr.msra.gmra.mxu0 %vm485_vm12, %v3955_v6 }
0x1a16   :  { %5136 = vmatpush3.bf16.msra.mxu1 %v4158_v23  ;;  %5145 = vmatprep.mubr.msk.f32.mxu0 %vm5411_vm13, %v5409_v13 }
0x1a1b   :  { %v5376_v34 = vpop.eup %5375 }
0x1a1c   :  { %v4154_v47 = vmul.f32 %v5376_v34, %v5368_v1 }
0x1a1f   :  { %v5378_v52 = vpop.eup %5377 }
0x1a20   :  { %v4155_v22 = vmul.f32 %v5378_v52, %v5370_v12 }
0x1a22   :  { %v4156_v60 = vpack.c.bf16 %v4155_v22, %v4154_v47 }
0x1a24   :  { %5138 = vmatmul.mubr.msk.bf16.vlgmr.msra.gmra.mxu1 %vm485_vm12, %v4156_v60 }
0x1ad5   :  { %v3996_v46 = vpop.f32.mrf.mxu0 }
0x1ad6   :  { %v4003_v63 = vadd.f32 %v3996_v46, %v6459_v9  ;;  %v4308_v9 = vld [vmem:[%s6539_s19] sm:$0xff]  ;;  %s5426_s19 = smov [#allocation2]  }
0x1ad7   :  { %v5122_v43 = vpop.f32.mrf.mxu0  ;;  %s4409_s20 = sshll.u32 %s5426_s19, 4  ;;  %s4410_s20 = int_to_ptr.vmem [resolvable:$true] %s4409_s20 }
0x1ad8   :  { %s5385_s25 = scalar_lea.vmem %s4410_s20, 32  ;;  %p5390_p1 = scmp.lt.s32.totalorder %s4410_s20, %s4410_s20 }
0x1ad9   :  { %v3999_v36 = vpop.f32.mrf.mxu0  ;;  %p5386_p0 = scmp.ne.s32.totalorder %s4410_s20, %s5385_s25  ;;  %p5391_p2 = scmp.lt.s32.totalorder %s5385_s25, %s5385_s25 }
0x1ada   :  { %v4004_v28 = vadd.f32 %v3999_v36, %v6463_v18  ;;  %v4230_v18 = vpop.xlane.xlu1 %4229 }
0x1adb   :  { %v5123_v56 = vpop.f32.mrf.mxu0  ;;  %v4304_v26 = vmax.f32 %v4230_v18, 1.0  ;;  %p5392_p3 = por %p5391_p2, %p5390_p1 }
0x1add   :  { %5379 = vrcp.f32 %v4304_v26  ;;  %p5393_p4 = pnand %p5392_p3, %p5386_p0 }
0x1ae4   :  { %v4197_v57 = vpop.f32.mrf.mxu1 }
0x1ae5   :  { %v4204_v55 = vadd.f32 %v4197_v57, %v4003_v63 }
0x1ae6   :  { %v5139_v44 = vpop.f32.mrf.mxu1 }
0x1ae7   :  { %v4206_v40 = vmul.f32 0.16666667, %v4204_v55 }
0x1ae8   :  { %v4200_v37 = vpop.f32.mrf.mxu1 }
0x1ae9   :  { %v4205_v49 = vadd.f32 %v4200_v37, %v4004_v28  ;;  %v4215_v48 = vadd.f32 %v4520_v8, %v4206_v40 }
0x1aea   :  { %v5140_v19 = vpop.f32.mrf.mxu1  ;;  %v5380_v50 = vpop.eup %5379 }
0x1aeb   :  { %v4207_v7 = vmul.f32 0.16666667, %v4205_v49  ;;  %v4217_v4 = vmax.f32 %v4215_v48, 0.0 }
0x1aed   :  { %v4216_v53 = vadd.f32 %v4520_v8, %v4207_v7 }
0x1aef   :  { %v4218_v11 = vmax.f32 %v4216_v53, 0.0 }
0x1af1   :  { %5142 = vmatpush3.msra.mxu0 %v4218_v11 }
0x1af2   :  { %5143 = vmatprep.subr.mxu0 %v5409_v13 }
0x1af3   :  { %5144 = vmatpush3.msra.mxu0 %v4217_v4 }
0x1af4   :  { %5146 = vmatmul.mubr.msk.f32.vlgmr.msra.gmra.mxu0 %vm485_vm12, %v4522_v2  ;;  %5148 = vmatprep.subr.mxu0 %v5409_v13  ;;  %vm4389_vm12 = vcmask 25600  }
0x1af5   :  { %5150 = vmatprep.mubr.msk.f32.mxu0 %vm5411_vm13, %v5409_v13  ;;  %5149 = vmatpush3.msra.mxu0 %v4308_v9 }
0x1bb4   :  { %v4300_v17 = vpop.f32.mrf.mxu0 }
0x1bb5   :  { %v4306_v62 = vmul.f32 %v5380_v50, %v4300_v17 }
0x1bb6   :  { %v5147_v21 = vpop.f32.mrf.mxu0 }
0x1bb7   :  { %v4307_v14 = vmax.f32 %v4306_v62, 0.0 }
0x1bb9   :  { %5151 = vmatmul.mubr.msk.f32.vlgmr.msra.gmra.mxu0 %vm896_vm0, %v4307_v14 }
0x1c79   :  { %v4385_v13 = vpop.f32.mrf.mxu0 }
0x1c7a   :  { %v4386_v25 = vadd.f32 %v4524_v24, %v4385_v13 }
0x1c7b   :  { %v5152_v32 = vpop.f32.mrf.mxu0 }
0x1c7c   :  { %v4390_v31 = vsel %vm4389_vm12, %v4386_v25, -inf }
0x1c7d   :  { %4391 = vmax.xlane.f32.xlu0 %v4390_v31 }
0x1d06   :  { %v4392_v41 = vpop.xlane.xlu0 %4391 }
0x1d07   :  { %v4393_v29 = vsub.f32 %v4386_v25, %v4392_v41 }
0x1d09   :  { %v4394_v59 = vmul.f32 1.442695, %v4393_v29 }
0x1d0b   :  { %5381 = vpow2.f32 %v4394_v59 }
0x1d18   :  { %v5382_v54 = vpop.eup %5381 }
0x1d19   :  { %v4396_v45 = vsel %vm4389_vm12, %v5382_v54, 0.0 }
0x1d1a   :  { %4397 = vadd.xlane.f32.xlu1 %v4396_v45 }
0x1da3   :  { %v4398_v3 = vpop.xlane.xlu1 %4397 }
0x1da4   :  { %5383 = vlog2.f32 %v4398_v3 }
0x1db1   :  { %v5384_v20 = vpop.eup %5383 }
0x1db2   :  { %v4400_v27 = vmul.f32 0.6931472, %v5384_v20 }
0x1db4   :  { %v4401_v10 = vsub.f32 %v4393_v29, %v4400_v27 }
0x1db6   :  { %4402 = vst.msk [vmem:[#allocation2] sm:$0x3] %vm4389_vm12, %v4401_v10 }
0x1db7   :  { %5396 = shalt.err (!%p5393_p4)
}
0x1db8   :  { %4412 = dma.vmem_to_hbm [thread:$0]  %s4410_s20, 32, %s6541_s21, [#allocation3]  }
0x1db9   :  { %5405 = dma.done.wait [#allocation3], 32  }
0x1dba   :  { %5406 = vsyncadd [#allocation3], 4294967264 }
0x1dbb   :  { %4416 = vsyncpa [#allocation3], 1 }

</bundles_post_ra>
